<compile_context>
chip_gen: v7x
topology: tpu7x:2x2x1
jax: 0.10.0
libtpu: 0.0.40
codegen_flags: <defaults>
</compile_context>

<pallas_src>
import jax
import jax.numpy as jnp
from jax import lax
from jax.experimental import pallas as pl
from jax.experimental.pallas import tpu as pltpu


def _shift_rows(a, sy):
    """b[y, x, c] = a[y+sy, x, c] with zero fill. Row shift = cheap vreg-row select."""
    if sy == 0:
        return a
    h = a.shape[0]
    z = jnp.zeros_like(a[:1])
    if sy == 1:
        return jnp.concatenate([a[1:], z], axis=0)
    return jnp.concatenate([z, a[:h - 1]], axis=0)


def _shift_cols(a, sx):
    """b[y, x, c] = a[y, x+sx, c] with zero fill. Column shift = sublane move (XLU)."""
    if sx == 0:
        return a
    w = a.shape[1]
    z = jnp.zeros_like(a[:, :1])
    if sx == 1:
        return jnp.concatenate([a[:, 1:], z], axis=1)
    return jnp.concatenate([z, a[:, :w - 1]], axis=1)


def _conv3x3_relu(a, w_ref, b_ref):
    """SAME 3x3 conv + bias + ReLU as a single im2col matmul.

    a:     (H, W, Ci)  bf16 activations
    w_ref: (9*Ci, Co)  bf16 weights, (ky, kx, ci) flattened row-major
    b_ref: (1, Co)     f32 bias
    returns (H*W, Co) float32.
    """
    h, w, ci = a.shape
    # Only three sublane shifts; the nine windows reuse them with cheap row shifts.
    a_by_dx = [_shift_cols(a, sx) for sx in (-1, 0, 1)]   # kx = sx + 1
    cols = []
    for sy in (-1, 0, 1):                                 # ky = sy + 1
        for adx in a_by_dx:
            cols.append(_shift_rows(adx, sy))
    patches = jnp.concatenate(cols, axis=-1).reshape(h * w, 9 * ci)   # (H*W, 9*Ci) bf16
    acc = jnp.dot(patches, w_ref[...], preferred_element_type=jnp.float32)
    return jnp.maximum(acc + b_ref[...], 0.0)


def _make_kernel(H, W, cin, cout):
    def kernel(x_ref, w1_ref, b1_ref, w2_ref, b2_ref, w3_ref, b3_ref, o_ref):
        x = x_ref[...]                                            # (H, W, Cin) bf16

        a1 = _conv3x3_relu(x, w1_ref, b1_ref)                     # (H*W, Cout) f32
        a1 = a1.reshape(H, W, cout).astype(jnp.bfloat16)

        a2 = _conv3x3_relu(a1, w2_ref, b2_ref)
        a2 = a2.reshape(H, W, cout).astype(jnp.bfloat16)

        a3 = _conv3x3_relu(a2, w3_ref, b3_ref)                    # (H*W, Cout) f32

        # 2x2 max-pool, stride 2 (fused, f32).
        a3 = a3.reshape(H // 2, 2, W // 2, 2, cout)
        pooled = jnp.max(jnp.max(a3, axis=3), axis=1)             # (H//2, W//2, Cout)

        # Lane-dense store: last axis is (W//2)*Cout wide instead of Cout.
        o_ref[...] = pooled.reshape(H // 2, (W // 2) * cout).astype(o_ref.dtype)

    return kernel


def unet_down_block(x_nchw, params):
    """Pallas implementation of UNetDownBlock.forward; in/out are NCHW like PyTorch."""
    w1, b1, w2, b2, w3, b3 = params
    N, Cin, H, W = x_nchw.shape
    Cout = w1.shape[-1]
    assert H % 2 == 0 and W % 2 == 0
    Ho, Wo = H // 2, W // 2

    # NHWC, bf16 for HBM->VMEM traffic and the MXU (f32 accumulation inside the kernel).
    x = jnp.transpose(x_nchw, (0, 2, 3, 1)).astype(jnp.bfloat16)
    # Single (9*Ci, Co) weight tiles matching the im2col (ky, kx, ci) ordering.
    w1f = w1.reshape(9 * Cin, Cout).astype(jnp.bfloat16)
    w2f = w2.reshape(9 * Cout, Cout).astype(jnp.bfloat16)
    w3f = w3.reshape(9 * Cout, Cout).astype(jnp.bfloat16)
    b1r = b1.reshape(1, Cout).astype(jnp.float32)
    b2r = b2.reshape(1, Cout).astype(jnp.float32)
    b3r = b3.reshape(1, Cout).astype(jnp.float32)

    grid_spec = pltpu.PrefetchScalarGridSpec(
        num_scalar_prefetch=0,
        grid=(N,),
        in_specs=[
            pl.BlockSpec((pl.Squeezed(), H, W, Cin), lambda n: (n, 0, 0, 0)),
            pl.BlockSpec((9 * Cin, Cout), lambda n: (0, 0)),
            pl.BlockSpec((1, Cout), lambda n: (0, 0)),
            pl.BlockSpec((9 * Cout, Cout), lambda n: (0, 0)),
            pl.BlockSpec((1, Cout), lambda n: (0, 0)),
            pl.BlockSpec((9 * Cout, Cout), lambda n: (0, 0)),
            pl.BlockSpec((1, Cout), lambda n: (0, 0)),
        ],
        out_specs=pl.BlockSpec((pl.Squeezed(), Ho, Wo * Cout), lambda n: (n, 0, 0)),
    )

    out_flat = pl.pallas_call(
        _make_kernel(H, W, Cin, Cout),
        out_shape=jax.ShapeDtypeStruct((N, Ho, Wo * Cout), jnp.float32),
        grid_spec=grid_spec,
        compiler_params=pltpu.CompilerParams(
            dimension_semantics=("parallel",),
            vmem_limit_bytes=32 * 1024 * 1024,   # safe on v5e/v6e/v7x; tiny usage here
        ),
    )(x, w1f, b1r, w2f, b2r, w3f, b3r)

    out_nhwc = out_flat.reshape(N, Ho, Wo, Cout)
    return jnp.transpose(out_nhwc, (0, 3, 1, 2)).astype(jnp.float32)   # back to NCHW


def reference(x_nchw, params):
    """Pure-JAX f32 reference matching the PyTorch forward pass."""
    w1, b1, w2, b2, w3, b3 = params
    y = x_nchw
    for w, b in ((w1, b1), (w2, b2), (w3, b3)):
        y = lax.conv_general_dilated(
            y, w, window_strides=(1, 1), padding="SAME",
            dimension_numbers=("NCHW", "HWIO", "NCHW"))
        y = jnp.maximum(y + b.reshape(1, -1, 1, 1), 0.0)
    y = lax.reduce_window(y, -jnp.inf, lax.max,
                          window_dimensions=(1, 1, 2, 2),
                          window_strides=(1, 1, 2, 2), padding="VALID")
    return y


if __name__ == "__main__":
    key = jax.random.PRNGKey(0)
    N, Cin, Cout, H, W = 2, 4, 8, 16, 16
    k = jax.random.split(key, 7)

    x = jax.random.normal(k[0], (N, Cin, H, W), jnp.float32)
    # Deterministic synthetic parameters (Conv2d weights stored as HWIO).
    w1 = 0.1 * jax.random.normal(k[1], (3, 3, Cin, Cout), jnp.float32)
    b1 = 0.05 * jax.random.normal(k[2], (Cout,), jnp.float32)
    w2 = 0.1 * jax.random.normal(k[3], (3, 3, Cout, Cout), jnp.float32)
    b2 = 0.05 * jax.random.normal(k[4], (Cout,), jnp.float32)
    w3 = 0.1 * jax.random.normal(k[5], (3, 3, Cout, Cout), jnp.float32)
    b3 = 0.05 * jax.random.normal(k[6], (Cout,), jnp.float32)
    params = (w1, b1, w2, b2, w3, b3)

    out = jax.block_until_ready(unet_down_block(x, params))
    ref = jax.block_until_ready(reference(x, params))

    assert out.shape == (N, Cout, H // 2, W // 2), out.shape
    # bf16 MXU inputs (f32 accumulation) vs. f32 reference -> slightly looser tolerance.
    assert jnp.allclose(out, ref, atol=2e-2, rtol=2e-2), \
        float(jnp.max(jnp.abs(out - ref)))
    print("KERNEL_OK")
</pallas_src>

<mosaic_0001>
module attributes {stable_mosaic.version = 11 : i64} {
  func.func @kernel(%arg0: i32, %arg1: memref<1x16x16x4xbf16, #tpu.memory_space<vmem>>, %arg2: memref<36x8xbf16, #tpu.memory_space<vmem>>, %arg3: memref<1x8xf32, #tpu.memory_space<vmem>>, %arg4: memref<72x8xbf16, #tpu.memory_space<vmem>>, %arg5: memref<1x8xf32, #tpu.memory_space<vmem>>, %arg6: memref<72x8xbf16, #tpu.memory_space<vmem>>, %arg7: memref<1x8xf32, #tpu.memory_space<vmem>>, %arg8: memref<1x8x64xf32, #tpu.memory_space<vmem>>) attributes {dimension_semantics = [#tpu.dimension_semantics<parallel>], iteration_bounds = array<i64: 2>, scalar_prefetch = 0 : i64, scratch_operands = 0 : i64, tpu.core_type = #tpu.core_type<tc>, window_params = [{transform_indices = @transform_0, window_bounds = array<i64: 1, 16, 16, 4>}, {pipeline_mode = #tpu.pipeline_mode<synchronous>, transform_indices = @transform_1, window_bounds = array<i64: 36, 8>}, {pipeline_mode = #tpu.pipeline_mode<synchronous>, transform_indices = @transform_2, window_bounds = array<i64: 1, 8>}, {pipeline_mode = #tpu.pipeline_mode<synchronous>, transform_indices = @transform_3, window_bounds = array<i64: 72, 8>}, {pipeline_mode = #tpu.pipeline_mode<synchronous>, transform_indices = @transform_4, window_bounds = array<i64: 1, 8>}, {pipeline_mode = #tpu.pipeline_mode<synchronous>, transform_indices = @transform_5, window_bounds = array<i64: 72, 8>}, {pipeline_mode = #tpu.pipeline_mode<synchronous>, transform_indices = @transform_6, window_bounds = array<i64: 1, 8>}, {transform_indices = @transform_7, window_bounds = array<i64: 1, 8, 64>}]} {
    %c0 = arith.constant 0 : index
    %c0_0 = arith.constant 0 : index
    %c0_1 = arith.constant 0 : index
    %c0_2 = arith.constant 0 : index
    %0 = vector.load %arg1[%c0, %c0_0, %c0_1, %c0_2] : memref<1x16x16x4xbf16, #tpu.memory_space<vmem>>, vector<1x16x16x4xbf16>
    %1 = vector.shape_cast %0 : vector<1x16x16x4xbf16> to vector<16x16x4xbf16>
    %cst = arith.constant 0.000000e+00 : bf16
    %2 = vector.broadcast %cst : bf16 to vector<16x1x4xbf16>
    %3 = vector.extract_strided_slice %1 {offsets = [0, 0, 0], sizes = [16, 15, 4], strides = [1, 1, 1]} : vector<16x16x4xbf16> to vector<16x15x4xbf16>
    %4 = tpu.concatenate %2, %3 in 1 : vector<16x1x4xbf16>, vector<16x15x4xbf16> -> vector<16x16x4xbf16>
    %cst_3 = arith.constant 0.000000e+00 : bf16
    %5 = vector.broadcast %cst_3 : bf16 to vector<16x1x4xbf16>
    %6 = vector.extract_strided_slice %1 {offsets = [0, 1, 0], sizes = [16, 15, 4], strides = [1, 1, 1]} : vector<16x16x4xbf16> to vector<16x15x4xbf16>
    %7 = tpu.concatenate %6, %5 in 1 : vector<16x15x4xbf16>, vector<16x1x4xbf16> -> vector<16x16x4xbf16>
    %cst_4 = arith.constant 0.000000e+00 : bf16
    %8 = vector.broadcast %cst_4 : bf16 to vector<1x16x4xbf16>
    %9 = vector.extract_strided_slice %4 {offsets = [0, 0, 0], sizes = [15, 16, 4], strides = [1, 1, 1]} : vector<16x16x4xbf16> to vector<15x16x4xbf16>
    %10 = tpu.concatenate %8, %9 in 0 : vector<1x16x4xbf16>, vector<15x16x4xbf16> -> vector<16x16x4xbf16>
    %cst_5 = arith.constant 0.000000e+00 : bf16
    %11 = vector.broadcast %cst_5 : bf16 to vector<1x16x4xbf16>
    %12 = vector.extract_strided_slice %1 {offsets = [0, 0, 0], sizes = [15, 16, 4], strides = [1, 1, 1]} : vector<16x16x4xbf16> to vector<15x16x4xbf16>
    %13 = tpu.concatenate %11, %12 in 0 : vector<1x16x4xbf16>, vector<15x16x4xbf16> -> vector<16x16x4xbf16>
    %cst_6 = arith.constant 0.000000e+00 : bf16
    %14 = vector.broadcast %cst_6 : bf16 to vector<1x16x4xbf16>
    %15 = vector.extract_strided_slice %7 {offsets = [0, 0, 0], sizes = [15, 16, 4], strides = [1, 1, 1]} : vector<16x16x4xbf16> to vector<15x16x4xbf16>
    %16 = tpu.concatenate %14, %15 in 0 : vector<1x16x4xbf16>, vector<15x16x4xbf16> -> vector<16x16x4xbf16>
    %cst_7 = arith.constant 0.000000e+00 : bf16
    %17 = vector.broadcast %cst_7 : bf16 to vector<1x16x4xbf16>
    %18 = vector.extract_strided_slice %4 {offsets = [1, 0, 0], sizes = [15, 16, 4], strides = [1, 1, 1]} : vector<16x16x4xbf16> to vector<15x16x4xbf16>
    %19 = tpu.concatenate %18, %17 in 0 : vector<15x16x4xbf16>, vector<1x16x4xbf16> -> vector<16x16x4xbf16>
    %cst_8 = arith.constant 0.000000e+00 : bf16
    %20 = vector.broadcast %cst_8 : bf16 to vector<1x16x4xbf16>
    %21 = vector.extract_strided_slice %1 {offsets = [1, 0, 0], sizes = [15, 16, 4], strides = [1, 1, 1]} : vector<16x16x4xbf16> to vector<15x16x4xbf16>
    %22 = tpu.concatenate %21, %20 in 0 : vector<15x16x4xbf16>, vector<1x16x4xbf16> -> vector<16x16x4xbf16>
    %cst_9 = arith.constant 0.000000e+00 : bf16
    %23 = vector.broadcast %cst_9 : bf16 to vector<1x16x4xbf16>
    %24 = vector.extract_strided_slice %7 {offsets = [1, 0, 0], sizes = [15, 16, 4], strides = [1, 1, 1]} : vector<16x16x4xbf16> to vector<15x16x4xbf16>
    %25 = tpu.concatenate %24, %23 in 0 : vector<15x16x4xbf16>, vector<1x16x4xbf16> -> vector<16x16x4xbf16>
    %26 = tpu.concatenate %10, %13, %16, %4, %1, %7, %19, %22, %25 in 2 : vector<16x16x4xbf16>, vector<16x16x4xbf16>, vector<16x16x4xbf16>, vector<16x16x4xbf16>, vector<16x16x4xbf16>, vector<16x16x4xbf16>, vector<16x16x4xbf16>, vector<16x16x4xbf16>, vector<16x16x4xbf16> -> vector<16x16x36xbf16>
    %27 = vector.shape_cast %26 : vector<16x16x36xbf16> to vector<256x36xbf16>
    %c0_10 = arith.constant 0 : index
    %c0_11 = arith.constant 0 : index
    %28 = vector.load %arg2[%c0_10, %c0_11] : memref<36x8xbf16, #tpu.memory_space<vmem>>, vector<36x8xbf16>
    %cst_12 = arith.constant dense<0.000000e+00> : vector<256x8xf32>
    %29 = tpu.matmul %27, %28, %cst_12 {dimension_numbers = #tpu.dot_dimension_numbers<[1], [0], [0], [1], [0, 0, 1, 1], [], []>} : vector<256x36xbf16>, vector<36x8xbf16>, vector<256x8xf32> -> vector<256x8xf32>
    %c0_13 = arith.constant 0 : index
    %c0_14 = arith.constant 0 : index
    %30 = vector.load %arg3[%c0_13, %c0_14] : memref<1x8xf32, #tpu.memory_space<vmem>>, vector<1x8xf32>
    %31 = vector.broadcast %30 : vector<1x8xf32> to vector<256x8xf32>
    %32 = arith.addf %29, %31 : vector<256x8xf32>
    %cst_15 = arith.constant 0.000000e+00 : f32
    %33 = vector.broadcast %cst_15 : f32 to vector<256x8xf32>
    %34 = arith.maximumf %32, %33 : vector<256x8xf32>
    %35 = vector.shape_cast %34 : vector<256x8xf32> to vector<16x16x8xf32>
    %36 = arith.truncf %35 : vector<16x16x8xf32> to vector<16x16x8xbf16>
    %cst_16 = arith.constant 0.000000e+00 : bf16
    %37 = vector.broadcast %cst_16 : bf16 to vector<16x1x8xbf16>
    %38 = vector.extract_strided_slice %36 {offsets = [0, 0, 0], sizes = [16, 15, 8], strides = [1, 1, 1]} : vector<16x16x8xbf16> to vector<16x15x8xbf16>
    %39 = tpu.concatenate %37, %38 in 1 : vector<16x1x8xbf16>, vector<16x15x8xbf16> -> vector<16x16x8xbf16>
    %cst_17 = arith.constant 0.000000e+00 : bf16
    %40 = vector.broadcast %cst_17 : bf16 to vector<16x1x8xbf16>
    %41 = vector.extract_strided_slice %36 {offsets = [0, 1, 0], sizes = [16, 15, 8], strides = [1, 1, 1]} : vector<16x16x8xbf16> to vector<16x15x8xbf16>
    %42 = tpu.concatenate %41, %40 in 1 : vector<16x15x8xbf16>, vector<16x1x8xbf16> -> vector<16x16x8xbf16>
    %cst_18 = arith.constant 0.000000e+00 : bf16
    %43 = vector.broadcast %cst_18 : bf16 to vector<1x16x8xbf16>
    %44 = vector.extract_strided_slice %39 {offsets = [0, 0, 0], sizes = [15, 16, 8], strides = [1, 1, 1]} : vector<16x16x8xbf16> to vector<15x16x8xbf16>
    %45 = tpu.concatenate %43, %44 in 0 : vector<1x16x8xbf16>, vector<15x16x8xbf16> -> vector<16x16x8xbf16>
    %cst_19 = arith.constant 0.000000e+00 : bf16
    %46 = vector.broadcast %cst_19 : bf16 to vector<1x16x8xbf16>
    %47 = vector.extract_strided_slice %36 {offsets = [0, 0, 0], sizes = [15, 16, 8], strides = [1, 1, 1]} : vector<16x16x8xbf16> to vector<15x16x8xbf16>
    %48 = tpu.concatenate %46, %47 in 0 : vector<1x16x8xbf16>, vector<15x16x8xbf16> -> vector<16x16x8xbf16>
    %cst_20 = arith.constant 0.000000e+00 : bf16
    %49 = vector.broadcast %cst_20 : bf16 to vector<1x16x8xbf16>
    %50 = vector.extract_strided_slice %42 {offsets = [0, 0, 0], sizes = [15, 16, 8], strides = [1, 1, 1]} : vector<16x16x8xbf16> to vector<15x16x8xbf16>
    %51 = tpu.concatenate %49, %50 in 0 : vector<1x16x8xbf16>, vector<15x16x8xbf16> -> vector<16x16x8xbf16>
    %cst_21 = arith.constant 0.000000e+00 : bf16
    %52 = vector.broadcast %cst_21 : bf16 to vector<1x16x8xbf16>
    %53 = vector.extract_strided_slice %39 {offsets = [1, 0, 0], sizes = [15, 16, 8], strides = [1, 1, 1]} : vector<16x16x8xbf16> to vector<15x16x8xbf16>
    %54 = tpu.concatenate %53, %52 in 0 : vector<15x16x8xbf16>, vector<1x16x8xbf16> -> vector<16x16x8xbf16>
    %cst_22 = arith.constant 0.000000e+00 : bf16
    %55 = vector.broadcast %cst_22 : bf16 to vector<1x16x8xbf16>
    %56 = vector.extract_strided_slice %36 {offsets = [1, 0, 0], sizes = [15, 16, 8], strides = [1, 1, 1]} : vector<16x16x8xbf16> to vector<15x16x8xbf16>
    %57 = tpu.concatenate %56, %55 in 0 : vector<15x16x8xbf16>, vector<1x16x8xbf16> -> vector<16x16x8xbf16>
    %cst_23 = arith.constant 0.000000e+00 : bf16
    %58 = vector.broadcast %cst_23 : bf16 to vector<1x16x8xbf16>
    %59 = vector.extract_strided_slice %42 {offsets = [1, 0, 0], sizes = [15, 16, 8], strides = [1, 1, 1]} : vector<16x16x8xbf16> to vector<15x16x8xbf16>
    %60 = tpu.concatenate %59, %58 in 0 : vector<15x16x8xbf16>, vector<1x16x8xbf16> -> vector<16x16x8xbf16>
    %61 = tpu.concatenate %45, %48, %51, %39, %36, %42, %54, %57, %60 in 2 : vector<16x16x8xbf16>, vector<16x16x8xbf16>, vector<16x16x8xbf16>, vector<16x16x8xbf16>, vector<16x16x8xbf16>, vector<16x16x8xbf16>, vector<16x16x8xbf16>, vector<16x16x8xbf16>, vector<16x16x8xbf16> -> vector<16x16x72xbf16>
    %62 = vector.shape_cast %61 : vector<16x16x72xbf16> to vector<256x72xbf16>
    %c0_24 = arith.constant 0 : index
    %c0_25 = arith.constant 0 : index
    %63 = vector.load %arg4[%c0_24, %c0_25] : memref<72x8xbf16, #tpu.memory_space<vmem>>, vector<72x8xbf16>
    %cst_26 = arith.constant dense<0.000000e+00> : vector<256x8xf32>
    %64 = tpu.matmul %62, %63, %cst_26 {dimension_numbers = #tpu.dot_dimension_numbers<[1], [0], [0], [1], [0, 0, 1, 1], [], []>} : vector<256x72xbf16>, vector<72x8xbf16>, vector<256x8xf32> -> vector<256x8xf32>
    %c0_27 = arith.constant 0 : index
    %c0_28 = arith.constant 0 : index
    %65 = vector.load %arg5[%c0_27, %c0_28] : memref<1x8xf32, #tpu.memory_space<vmem>>, vector<1x8xf32>
    %66 = vector.broadcast %65 : vector<1x8xf32> to vector<256x8xf32>
    %67 = arith.addf %64, %66 : vector<256x8xf32>
    %cst_29 = arith.constant 0.000000e+00 : f32
    %68 = vector.broadcast %cst_29 : f32 to vector<256x8xf32>
    %69 = arith.maximumf %67, %68 : vector<256x8xf32>
    %70 = vector.shape_cast %69 : vector<256x8xf32> to vector<16x16x8xf32>
    %71 = arith.truncf %70 : vector<16x16x8xf32> to vector<16x16x8xbf16>
    %cst_30 = arith.constant 0.000000e+00 : bf16
    %72 = vector.broadcast %cst_30 : bf16 to vector<16x1x8xbf16>
    %73 = vector.extract_strided_slice %71 {offsets = [0, 0, 0], sizes = [16, 15, 8], strides = [1, 1, 1]} : vector<16x16x8xbf16> to vector<16x15x8xbf16>
    %74 = tpu.concatenate %72, %73 in 1 : vector<16x1x8xbf16>, vector<16x15x8xbf16> -> vector<16x16x8xbf16>
    %cst_31 = arith.constant 0.000000e+00 : bf16
    %75 = vector.broadcast %cst_31 : bf16 to vector<16x1x8xbf16>
    %76 = vector.extract_strided_slice %71 {offsets = [0, 1, 0], sizes = [16, 15, 8], strides = [1, 1, 1]} : vector<16x16x8xbf16> to vector<16x15x8xbf16>
    %77 = tpu.concatenate %76, %75 in 1 : vector<16x15x8xbf16>, vector<16x1x8xbf16> -> vector<16x16x8xbf16>
    %cst_32 = arith.constant 0.000000e+00 : bf16
    %78 = vector.broadcast %cst_32 : bf16 to vector<1x16x8xbf16>
    %79 = vector.extract_strided_slice %74 {offsets = [0, 0, 0], sizes = [15, 16, 8], strides = [1, 1, 1]} : vector<16x16x8xbf16> to vector<15x16x8xbf16>
    %80 = tpu.concatenate %78, %79 in 0 : vector<1x16x8xbf16>, vector<15x16x8xbf16> -> vector<16x16x8xbf16>
    %cst_33 = arith.constant 0.000000e+00 : bf16
    %81 = vector.broadcast %cst_33 : bf16 to vector<1x16x8xbf16>
    %82 = vector.extract_strided_slice %71 {offsets = [0, 0, 0], sizes = [15, 16, 8], strides = [1, 1, 1]} : vector<16x16x8xbf16> to vector<15x16x8xbf16>
    %83 = tpu.concatenate %81, %82 in 0 : vector<1x16x8xbf16>, vector<15x16x8xbf16> -> vector<16x16x8xbf16>
    %cst_34 = arith.constant 0.000000e+00 : bf16
    %84 = vector.broadcast %cst_34 : bf16 to vector<1x16x8xbf16>
    %85 = vector.extract_strided_slice %77 {offsets = [0, 0, 0], sizes = [15, 16, 8], strides = [1, 1, 1]} : vector<16x16x8xbf16> to vector<15x16x8xbf16>
    %86 = tpu.concatenate %84, %85 in 0 : vector<1x16x8xbf16>, vector<15x16x8xbf16> -> vector<16x16x8xbf16>
    %cst_35 = arith.constant 0.000000e+00 : bf16
    %87 = vector.broadcast %cst_35 : bf16 to vector<1x16x8xbf16>
    %88 = vector.extract_strided_slice %74 {offsets = [1, 0, 0], sizes = [15, 16, 8], strides = [1, 1, 1]} : vector<16x16x8xbf16> to vector<15x16x8xbf16>
    %89 = tpu.concatenate %88, %87 in 0 : vector<15x16x8xbf16>, vector<1x16x8xbf16> -> vector<16x16x8xbf16>
    %cst_36 = arith.constant 0.000000e+00 : bf16
    %90 = vector.broadcast %cst_36 : bf16 to vector<1x16x8xbf16>
    %91 = vector.extract_strided_slice %71 {offsets = [1, 0, 0], sizes = [15, 16, 8], strides = [1, 1, 1]} : vector<16x16x8xbf16> to vector<15x16x8xbf16>
    %92 = tpu.concatenate %91, %90 in 0 : vector<15x16x8xbf16>, vector<1x16x8xbf16> -> vector<16x16x8xbf16>
    %cst_37 = arith.constant 0.000000e+00 : bf16
    %93 = vector.broadcast %cst_37 : bf16 to vector<1x16x8xbf16>
    %94 = vector.extract_strided_slice %77 {offsets = [1, 0, 0], sizes = [15, 16, 8], strides = [1, 1, 1]} : vector<16x16x8xbf16> to vector<15x16x8xbf16>
    %95 = tpu.concatenate %94, %93 in 0 : vector<15x16x8xbf16>, vector<1x16x8xbf16> -> vector<16x16x8xbf16>
    %96 = tpu.concatenate %80, %83, %86, %74, %71, %77, %89, %92, %95 in 2 : vector<16x16x8xbf16>, vector<16x16x8xbf16>, vector<16x16x8xbf16>, vector<16x16x8xbf16>, vector<16x16x8xbf16>, vector<16x16x8xbf16>, vector<16x16x8xbf16>, vector<16x16x8xbf16>, vector<16x16x8xbf16> -> vector<16x16x72xbf16>
    %97 = vector.shape_cast %96 : vector<16x16x72xbf16> to vector<256x72xbf16>
    %c0_38 = arith.constant 0 : index
    %c0_39 = arith.constant 0 : index
    %98 = vector.load %arg6[%c0_38, %c0_39] : memref<72x8xbf16, #tpu.memory_space<vmem>>, vector<72x8xbf16>
    %cst_40 = arith.constant dense<0.000000e+00> : vector<256x8xf32>
    %99 = tpu.matmul %97, %98, %cst_40 {dimension_numbers = #tpu.dot_dimension_numbers<[1], [0], [0], [1], [0, 0, 1, 1], [], []>} : vector<256x72xbf16>, vector<72x8xbf16>, vector<256x8xf32> -> vector<256x8xf32>
    %c0_41 = arith.constant 0 : index
    %c0_42 = arith.constant 0 : index
    %100 = vector.load %arg7[%c0_41, %c0_42] : memref<1x8xf32, #tpu.memory_space<vmem>>, vector<1x8xf32>
    %101 = vector.broadcast %100 : vector<1x8xf32> to vector<256x8xf32>
    %102 = arith.addf %99, %101 : vector<256x8xf32>
    %cst_43 = arith.constant 0.000000e+00 : f32
    %103 = vector.broadcast %cst_43 : f32 to vector<256x8xf32>
    %104 = arith.maximumf %102, %103 : vector<256x8xf32>
    %105 = vector.shape_cast %104 : vector<256x8xf32> to vector<8x2x8x2x8xf32>
    %cst_44 = arith.constant dense<0xFF800000> : vector<8x2x8x8xf32>
    %106 = vector.multi_reduction <maximumf>, %105, %cst_44 [3] : vector<8x2x8x2x8xf32> to vector<8x2x8x8xf32>
    %cst_45 = arith.constant dense<0xFF800000> : vector<8x8x8xf32>
    %107 = vector.multi_reduction <maximumf>, %106, %cst_45 [1] : vector<8x2x8x8xf32> to vector<8x8x8xf32>
    %108 = vector.shape_cast %107 : vector<8x8x8xf32> to vector<8x64xf32>
    %c0_46 = arith.constant 0 : index
    %c0_47 = arith.constant 0 : index
    %c0_48 = arith.constant 0 : index
    %109 = vector.load %arg8[%c0_46, %c0_47, %c0_48] : memref<1x8x64xf32, #tpu.memory_space<vmem>>, vector<1x8x64xf32>
    %110 = vector.shape_cast %109 : vector<1x8x64xf32> to vector<8x64xf32>
    %111 = vector.shape_cast %108 : vector<8x64xf32> to vector<1x8x64xf32>
    tpu.vector_store %arg8[%c0_46, %c0_47, %c0_48], %111 {strides = array<i32>} : memref<1x8x64xf32, #tpu.memory_space<vmem>>, vector<1x8x64xf32>,
    return
  }
  func.func @transform_0(%arg0: i32) -> (i32, i32, i32, i32) {
    %c0_i32 = arith.constant 0 : i32
    %c0_i32_0 = arith.constant 0 : i32
    %c0_i32_1 = arith.constant 0 : i32
    %c0_i32_2 = arith.constant 0 : i32
    return %arg0, %c0_i32, %c0_i32_0, %c0_i32_1 : i32, i32, i32, i32
  }
  func.func @transform_1(%arg0: i32) -> (i32, i32) {
    %c0_i32 = arith.constant 0 : i32
    %c0_i32_0 = arith.constant 0 : i32
    %c0_i32_1 = arith.constant 0 : i32
    return %c0_i32, %c0_i32_0 : i32, i32
  }
  func.func @transform_2(%arg0: i32) -> (i32, i32) {
    %c0_i32 = arith.constant 0 : i32
    %c0_i32_0 = arith.constant 0 : i32
    %c0_i32_1 = arith.constant 0 : i32
    return %c0_i32, %c0_i32_0 : i32, i32
  }
  func.func @transform_3(%arg0: i32) -> (i32, i32) {
    %c0_i32 = arith.constant 0 : i32
    %c0_i32_0 = arith.constant 0 : i32
    %c0_i32_1 = arith.constant 0 : i32
    return %c0_i32, %c0_i32_0 : i32, i32
  }
  func.func @transform_4(%arg0: i32) -> (i32, i32) {
    %c0_i32 = arith.constant 0 : i32
    %c0_i32_0 = arith.constant 0 : i32
    %c0_i32_1 = arith.constant 0 : i32
    return %c0_i32, %c0_i32_0 : i32, i32
  }
  func.func @transform_5(%arg0: i32) -> (i32, i32) {
    %c0_i32 = arith.constant 0 : i32
    %c0_i32_0 = arith.constant 0 : i32
    %c0_i32_1 = arith.constant 0 : i32
    return %c0_i32, %c0_i32_0 : i32, i32
  }
  func.func @transform_6(%arg0: i32) -> (i32, i32) {
    %c0_i32 = arith.constant 0 : i32
    %c0_i32_0 = arith.constant 0 : i32
    %c0_i32_1 = arith.constant 0 : i32
    return %c0_i32, %c0_i32_0 : i32, i32
  }
  func.func @transform_7(%arg0: i32) -> (i32, i32, i32) {
    %c0_i32 = arith.constant 0 : i32
    %c0_i32_0 = arith.constant 0 : i32
    %c0_i32_1 = arith.constant 0 : i32
    return %arg0, %c0_i32, %c0_i32_0 : i32, i32, i32
  }
}

</mosaic_0001>

<bundles_post_ra>
// kernel: tpu_custom_call.1
= control target key start
LH: loop header
LB: loop body
LE: loop exit
PB: predicated region body
PF: predicated region fallthrough
CT: control target
= control target key end

     0   :  { %12 = vsyncpa [#allocation3], 0  ;;  %s8954_s0 = inlined_call_operand.vmem [shape: bf16[2,16,16,4], index: 0, kind: input, shape index: {}]   ;;  %s8955_s1 = inlined_call_operand.vmem [shape: bf16[36,8], index: 1, kind: input, shape index: {}]   ;;  %s8956_s2 = inlined_call_operand.vmem [shape: f32[1,8], index: 2, kind: input, shape index: {}]   ;;  %s8957_s3 = inlined_call_operand.vmem [shape: bf16[72,8], index: 3, kind: input, shape index: {}]   ;;  %s8958_s4 = inlined_call_operand.vmem [shape: f32[1,8], index: 4, kind: input, shape index: {}]   ;;  %s8959_s5 = inlined_call_operand.vmem [shape: bf16[72,8], index: 5, kind: input, shape index: {}]   ;;  %s8960_s6 = inlined_call_operand.vmem [shape: f32[1,8], index: 6, kind: input, shape index: {}]   ;;  %s8961_s7 = inlined_call_operand.hbm [shape: f32[2,8,64], index: 7, kind: output, shape index: {}]  }
   0x1   :  { %14 = vsyncpa [#allocation3 + $0x1], 0  ;;  %s6222_s24 = smov 0   ;;  %s6224_s25 = smov 0  }
   0x2   :  { %s6226_s26 = smov 0   ;;  %s6228_s27 = smov 0  }
   0x3 LB: > { %s6243_s28 = sadd.s32 4294967295, %s6164_s27   ;;  %s5731_s29 = sadd.s32 4294967294, %s6164_s27   ;;  %s6164_s27 = sphi %s6228_s27, %s9010_s27   ;;  %s6160_s26 = sphi %s6226_s26, %s9009_s26   ;;  %s6156_s25 = sphi %s6224_s25, %s9008_s25   ;;  %s6152_s24 = sphi %s6222_s24, %s9007_s24  }
   0x4   : > { %s6247_s30 = sadd.s32 1, %s6164_s27   ;;  %s179_s8 = sadd.s32 1, %s6160_s26 }
   0x5   : > { %s176_s9 = ssub.s32 %s6164_s27, %s6247_s30  ;;  %p189_p0 = scmp.ne.s32.totalorder %s6160_s26, %s6156_s25 }
   0x6   : > { %p177_p1 = scmp.eq.s32.totalorder %s176_s9, 0  ;;  %p190_p2 = scmp.eq.s32.totalorder %s6243_s28, 1 }
   0x7   : > { %p195_p3 = scmp.ne.s32.totalorder %s6156_s25, %s6152_s24  ;;  %p196_p4 = scmp.eq.s32.totalorder %s5731_s29, 1 }
   0x8   : > { %s6258_s10 = scalar_select %p177_p1, %s6160_s26, %s179_s8  }
   0x9   : > { %p6260_p5 = por %p190_p2, %p189_p0  ;;  %p6264_p6 = por %p196_p4, %p195_p3 }
   0xa   : > { %p5734_p7 = scmp.ge.s32.totalorder %s6164_s27, 1  ;;  %p240_p8 = scmp.lt.s32.totalorder %s6164_s27, 3 }
   0xc   : > { %p241_p9 = pnand %p5734_p7, %p240_p8 }
   0xe   : > { %244 = sbr.rel (%p241_p9) target bundleno = 1800 (0x708), region = 48 }
  0x15   : > { %v6166_v0 = vmov 0   ;;  %s6167_s13 = smov 4   ;;  %s6168_s14 = smov 8   ;;  %vm586_vm0 = vsmask.f32 7424  ;;  %vm585_vm2 = vcmask 1047552  }
  0x16   : > { %605 = vrot.lane.b32.xlu0 %v6166_v0, %s6167_s13  ;;  %652 = vrot.lane.b32.xlu1 %v6166_v0, %s6168_s14  ;;  %p272_p10 = scmp.lt.s32.totalorder %s6243_s28, 1  ;;  %vm519_vm1 = vsmask.f32 256  ;;  %vm518_vm3 = vcmask 1040384   ;;  %s6169_s20 = smov 16   ;;  %vm6294_vm4 = vmand %vm585_vm2, %vm586_vm0  ;;  %v6080_v24 = vld [vmem:[%s8955_s1] sm:$0xff]  }
  0x17   : > { %vm6299_vm5 = vmand %vm518_vm3, %vm519_vm1  ;;  %s6170_s21 = smov 12   ;;  %s6171_s29 = smov 20   ;;  %5885 = vmatprep.subr.bf16.mxu0 %v6080_v24  ;;  %v6082_v27 = vld [vmem:[%s8955_s1 + $0x8] sm:$0xff]   ;;  %6007 = vmatprep.subr.bf16.mxu1 %v6080_v24  ;;  %v6083_v28 = vld [vmem:[%s8955_s1 + $0x10] ss:$0 sps:$4 sm:$0x33]  }
  0x18   : > { %s273_s15 = scalar_select %p272_p10, %s6243_s28, 1  ;;  %5886 = vmatpush3.bf16.msra.mxu0 %v6080_v24  ;;  %6010 = vmatpush3.bf16.msra.mxu1 %v6080_v24  ;;  %vm1235_vm6 = vcmask 1041408   ;;  %vm895_vm7 = vcmask 31744   ;;  %vm944_vm8 = vcmask 64512   ;;  %vm977_vm9 = vcmask 97280  }
  0x19   : > { %5887 = vmatprep.subr.bf16.mxu0 %v6082_v27  ;;  %6008 = vmatprep.subr.bf16.mxu1 %v6082_v27  ;;  %s6172_s17 = smov 24   ;;  %s6173_s18 = smov 28   ;;  %v1237_v32 = vsel %vm1235_vm6, %v6083_v28, 0  ;;  %vm1010_vm10 = vcmask 130048   ;;  %vm1043_vm11 = vcmask 162816   ;;  %vm1076_vm12 = vcmask 195584  }
  0x1a   : > { %s5823_s16 = sshll.u32 %s273_s15, 7  ;;  %s6174_s22 = smov 32   ;;  %vm1109_vm13 = vcmask 228352   ;;  %vm1142_vm14 = vcmask 261120   ;;  %vm1202_vm15 = vcmask 293888   ;;  %vm2100_vm0 = vcmask 326656  }
  0x1b   : > { %s6279_s19 = scalar_lea.vmem %s8954_s0, %s5823_s16  ;;  %s6176_s23 = smov 48   ;;  %vm2133_vm1 = vcmask 392192   ;;  %vm2166_vm2 = vcmask 457728   ;;  %vm2199_vm3 = vcmask 523264  }
  0x1c   : > { %v6071_v1 = vld [vmem:[%s6279_s19] sm:$0xff]   ;;  %v6283_v2 = vld [vmem:[%s6279_s19 + $0x8] sm:$0xff]   ;;  %v6291_v7 = vld [vmem:[%s6279_s19 + $0x10] sm:$0xff]   ;;  %5888 = vmatpush3.bf16.msra.mxu0 %v6082_v27  ;;  %6011 = vmatpush3.bf16.msra.mxu1 %v6082_v27  ;;  %s6178_s8 = smov 40  }
  0x1d   : > { %607 = vrot.lane.b32.xlu0 %v6071_v1, %s6167_s13  ;;  %v391_v3 = vshrl.u32 %v6071_v1, 16  ;;  %v394_v4 = vshll.u32 %v6071_v1, 16  ;;  %734 = vrot.lane.b32.xlu1 %v6283_v2, %s6169_s20  ;;  %v398_v5 = vshrl.u32 %v6283_v2, 16  ;;  %v401_v6 = vshll.u32 %v6283_v2, 16  ;;  %v6074_v31 = vld [vmem:[%s6279_s19 + $0x18] sm:$0xff]   ;;  %v6075_v39 = vld [vmem:[%s6279_s19 + $0x20] sm:$0xff]  }
  0x1e   : > { %v405_v16 = vshrl.u32 %v6291_v7, 16  ;;  %v408_v20 = vshll.u32 %v6291_v7, 16  ;;  %6013 = vmatprep.subr.msk.bf16.mxu0 %vm1235_vm6, %v6083_v28  ;;  %6014 = vmatprep.subr.msk.bf16.mxu1 %vm1235_vm6, %v6083_v28  ;;  %v412_v34 = vshrl.u32 %v6074_v31, 16  ;;  %v415_v37 = vshll.u32 %v6074_v31, 16  ;;  %v6076_v50 = vld [vmem:[%s6279_s19 + $0x28] sm:$0xff]   ;;  %v6077_v57 = vld [vmem:[%s6279_s19 + $0x30] sm:$0xff]  }
  0x1f   : > { %v537_v8 = vrot.slane %v394_v4, 1  ;;  %v393_v10 = vrot.slane %v391_v3, 7  ;;  %v400_v12 = vrot.slane %v398_v5, 7  ;;  %v539_v15 = vrot.slane %v401_v6, 1 }
  0x20   : > { %v407_v23 = vrot.slane %v405_v16, 7  ;;  %v541_v30 = vrot.slane %v408_v20, 1  ;;  %5890 = vmatpush3.bf16.msra.mxu0 %v1237_v32  ;;  %6012 = vmatpush3.bf16.msra.mxu1 %v1237_v32  ;;  %v414_v36 = vrot.slane %v412_v34, 7  ;;  %v543_v41 = vrot.slane %v415_v37, 1  ;;  %v6457_v32 = vld [vmem:[%s6279_s19 + $0x48] sm:$0xff]  }
  0x21   : > { %732 = vrot.lane.b32.xlu0 %v6071_v1, %s6169_s20  ;;  %v538_v13 = vor.u32 %v537_v8, %v391_v3  ;;  %v396_v14 = vor.u32 %v394_v4, %v393_v10  ;;  %v403_v17 = vor.u32 %v401_v6, %v400_v12  ;;  %v540_v22 = vor.u32 %v539_v15, %v398_v5  ;;  %v6078_v5 = vld [vmem:[%s6279_s19 + $0x38] sm:$0xff]  }
  0x22   : > { %v410_v26 = vor.u32 %v408_v20, %v407_v23  ;;  %v542_v33 = vor.u32 %v541_v30, %v405_v16  ;;  %v417_v38 = vor.u32 %v415_v37, %v414_v36  ;;  %v419_v42 = vshrl.u32 %v6075_v39, 16 }
  0x23   : > { %v588_v18 = vsel %vm6294_vm4, %v538_v13, 0  ;;  %v6309_v19 = vsel %vm6299_vm5, 0, %v396_v14  ;;  %v6317_v21 = vsel %vm6299_vm5, 0, %v403_v17  ;;  %v589_v25 = vsel %vm6294_vm4, %v540_v22, 0  ;;  %v6426_v14 = vld [vmem:[%s6279_s19 + $0x40] sm:$0xff]  }
  0x24   : > { %654 = vrot.lane.b32.xlu1 %v588_v18, %s6168_s14  ;;  %v6338_v29 = vsel %vm6299_vm5, 0, %v410_v26  ;;  %v590_v35 = vsel %vm6294_vm4, %v542_v33, 0  ;;  %v6362_v40 = vsel %vm6299_vm5, 0, %v417_v38  ;;  %v544_v43 = vor.u32 %v543_v41, %v412_v34 }
  0x25   : > { %700 = vrot.lane.b32.xlu0 %v6309_v19, %s6170_s21  ;;  %v421_v44 = vrot.slane %v419_v42, 7  ;;  %v422_v45 = vshll.u32 %v6075_v39, 16  ;;  %v426_v52 = vshrl.u32 %v6076_v50, 16  ;;  %v429_v55 = vshll.u32 %v6076_v50, 16 }
  0x26   : > { %v591_v46 = vsel %vm6294_vm4, %v544_v43, 0  ;;  %v433_v60 = vshrl.u32 %v6077_v57, 16  ;;  %v436_v63 = vshll.u32 %v6077_v57, 16  ;;  %v443_v12 = vshll.u32 %v6078_v5, 16 }
  0x27   : > { %v424_v47 = vor.u32 %v422_v45, %v421_v44  ;;  %v545_v49 = vrot.slane %v422_v45, 1  ;;  %v428_v54 = vrot.slane %v426_v52, 7  ;;  %v547_v59 = vrot.slane %v429_v55, 1 }
  0x28   : > { %702 = vrot.lane.b32.xlu1 %v6317_v21, %s6170_s21  ;;  %v435_v62 = vrot.slane %v433_v60, 7  ;;  %v549_v4 = vrot.slane %v436_v63, 1  ;;  %v551_v16 = vrot.slane %v443_v12, 1  ;;  %v447_v17 = vshrl.u32 %v6426_v14, 16 }
  0x29   : > { %765 = vrot.lane.b32.xlu0 %v588_v18, %s6171_s29  ;;  %v6377_v48 = vsel %vm6299_vm5, 0, %v424_v47  ;;  %v546_v51 = vor.u32 %v545_v49, %v419_v42  ;;  %v431_v56 = vor.u32 %v429_v55, %v428_v54  ;;  %v548_v61 = vor.u32 %v547_v59, %v426_v52 }
  0x2a   : > { %v550_v6 = vor.u32 %v549_v4, %v433_v60  ;;  %v449_v20 = vrot.slane %v447_v17, 7  ;;  %v450_v22 = vshll.u32 %v6426_v14, 16  ;;  %v457_v41 = vshll.u32 %v6457_v32, 16 }
  0x2b   : > { %v592_v53 = vsel %vm6294_vm4, %v546_v51, 0  ;;  %v6397_v58 = vsel %vm6299_vm5, 0, %v431_v56  ;;  %v593_v1 = vsel %vm6294_vm4, %v548_v61, 0  ;;  %vm2275_vm6 = vcmask 588800  }
  0x2c   : > { %767 = vrot.lane.b32.xlu1 %v589_v25, %s6171_s29  ;;  %v594_v8 = vsel %vm6294_vm4, %v550_v6, 0  ;;  %v553_v28 = vrot.slane %v450_v22, 1 }
  0x2d   : > { %797 = vrot.lane.b32.xlu0 %v6317_v21, %s6172_s17 }
  0x2e   : > { %v554_v33 = vor.u32 %v553_v28, %v447_v17  ;;  %v6524_v28 = vld [vmem:[%s6279_s19 + $0x58] sm:$0xff]  }
  0x30   : > { %799 = vrot.lane.b32.xlu1 %v6338_v29, %s6172_s17  ;;  %v596_v37 = vsel %vm6294_vm4, %v554_v33, 0 }
  0x31   : > { %831 = vrot.lane.b32.xlu0 %v6283_v2, %s6173_s18 }
  0x34   : > { %833 = vrot.lane.b32.xlu1 %v6291_v7, %s6173_s18 }
  0x35   : > { %863 = vrot.lane.b32.xlu0 %v589_v25, %s6174_s22 }
  0x38   : > { %609 = vrot.lane.b32.xlu1 %v6283_v2, %s6167_s13  ;;  %v438_v2 = vor.u32 %v436_v63, %v435_v62 }
  0x39   : > { %865 = vrot.lane.b32.xlu0 %v590_v35, %s6174_s22 }
  0x3a   : > { %v6411_v3 = vsel %vm6299_vm5, 0, %v438_v2 }
  0x3c   : > { %611 = vrot.lane.b32.xlu1 %v6291_v7, %s6167_s13 }
  0x3d   : > { %656 = vrot.lane.b32.xlu0 %v589_v25, %s6168_s14  ;;  %v452_v25 = vor.u32 %v450_v22, %v449_v20 }
  0x3f   : > { %v6451_v27 = vsel %vm6299_vm5, 0, %v452_v25 }
  0x40   : > { %658 = vrot.lane.b32.xlu1 %v590_v35, %s6168_s14 }
  0x41   : > { %704 = vrot.lane.b32.xlu0 %v6338_v29, %s6170_s21 }
  0x44   : > { %706 = vrot.lane.b32.xlu1 %v6362_v40, %s6170_s21 }
  0x45   : > { %736 = vrot.lane.b32.xlu0 %v6291_v7, %s6169_s20  ;;  %v440_v7 = vshrl.u32 %v6078_v5, 16 }
  0x47   : > { %v442_v10 = vrot.slane %v440_v7, 7  ;;  %v552_v18 = vor.u32 %v551_v16, %v440_v7 }
  0x48   : > { %738 = vrot.lane.b32.xlu1 %v6074_v31, %s6169_s20 }
  0x49   : > { %769 = vrot.lane.b32.xlu0 %v590_v35, %s6171_s29  ;;  %v445_v13 = vor.u32 %v443_v12, %v442_v10  ;;  %v595_v24 = vsel %vm6294_vm4, %v552_v18, 0  ;;  %v454_v35 = vshrl.u32 %v6457_v32, 16 }
  0x4b   : > { %v6433_v15 = vsel %vm6299_vm5, 0, %v445_v13 }
  0x4c   : > { %771 = vrot.lane.b32.xlu1 %v591_v46, %s6171_s29 }
  0x4d   : > { %801 = vrot.lane.b32.xlu0 %v6362_v40, %s6172_s17 }
  0x50   : > { %803 = vrot.lane.b32.xlu1 %v6377_v48, %s6172_s17 }
  0x51   : > { %835 = vrot.lane.b32.xlu0 %v6074_v31, %s6173_s18 }
  0x54   : > { %837 = vrot.lane.b32.xlu1 %v6075_v39, %s6173_s18 }
  0x55   : > { %867 = vrot.lane.b32.xlu0 %v591_v46, %s6174_s22 }
  0x58   : > { %613 = vrot.lane.b32.xlu1 %v6074_v31, %s6167_s13 }
  0x59   : > { %869 = vrot.lane.b32.xlu0 %v592_v53, %s6174_s22 }
  0x5c   : > { %615 = vrot.lane.b32.xlu1 %v6075_v39, %s6167_s13 }
  0x5d   : > { %660 = vrot.lane.b32.xlu0 %v591_v46, %s6168_s14  ;;  %v6473_v46 = vld [vmem:[%s6279_s19 + $0x50] sm:$0xff]  }
  0x5e   : > { %v461_v54 = vshrl.u32 %v6473_v46, 16  ;;  %v464_v61 = vshll.u32 %v6473_v46, 16 }
  0x60   : > { %662 = vrot.lane.b32.xlu1 %v592_v53, %s6168_s14 }
  0x61   : > { %708 = vrot.lane.b32.xlu0 %v6377_v48, %s6170_s21 }
  0x64   : > { %710 = vrot.lane.b32.xlu1 %v6397_v58, %s6170_s21 }
  0x65   : > { %740 = vrot.lane.b32.xlu0 %v6075_v39, %s6169_s20  ;;  %v456_v39 = vrot.slane %v454_v35, 7 }
  0x67   : > { %v459_v45 = vor.u32 %v457_v41, %v456_v39  ;;  %v471_v39 = vshll.u32 %v6524_v28, 16 }
  0x68   : > { %742 = vrot.lane.b32.xlu1 %v6076_v50, %s6169_s20 }
  0x69   : > { %773 = vrot.lane.b32.xlu0 %v592_v53, %s6171_s29  ;;  %v6483_v52 = vsel %vm6299_vm5, 0, %v459_v45  ;;  %v555_v53 = vrot.slane %v457_v41, 1 }
  0x6c   : > { %775 = vrot.lane.b32.xlu1 %v593_v1, %s6171_s29 }
  0x6d   : > { %805 = vrot.lane.b32.xlu0 %v6397_v58, %s6172_s17 }
  0x70   : > { %807 = vrot.lane.b32.xlu1 %v6411_v3, %s6172_s17 }
  0x71   : > { %839 = vrot.lane.b32.xlu0 %v6076_v50, %s6173_s18 }
  0x74   : > { %841 = vrot.lane.b32.xlu1 %v6077_v57, %s6173_s18 }
  0x75   : > { %871 = vrot.lane.b32.xlu0 %v593_v1, %s6174_s22 }
  0x78   : > { %617 = vrot.lane.b32.xlu1 %v6076_v50, %s6167_s13 }
  0x79   : > { %873 = vrot.lane.b32.xlu0 %v594_v8, %s6174_s22 }
  0x7c   : > { %619 = vrot.lane.b32.xlu1 %v6077_v57, %s6167_s13 }
  0x7d   : > { %664 = vrot.lane.b32.xlu0 %v593_v1, %s6168_s14  ;;  %v463_v1 = vrot.slane %v461_v54, 7 }
  0x7f   : > { %v466_v13 = vor.u32 %v464_v61, %v463_v1 }
  0x80   : > { %666 = vrot.lane.b32.xlu1 %v594_v8, %s6168_s14 }
  0x81   : > { %712 = vrot.lane.b32.xlu0 %v6411_v3, %s6170_s21  ;;  %v6517_v22 = vsel %vm6299_vm5, 0, %v466_v13 }
  0x84   : > { %714 = vrot.lane.b32.xlu1 %v6433_v15, %s6170_s21 }
  0x85   : > { %744 = vrot.lane.b32.xlu0 %v6077_v57, %s6169_s20 }
  0x88   : > { %746 = vrot.lane.b32.xlu1 %v6078_v5, %s6169_s20  ;;  %v606_v23 = vpop.permute.xlu0 %605  ;;  %v6444_v26 = vpop.permute.xlu1 %652 }
  0x89   : > { %777 = vrot.lane.b32.xlu0 %v594_v8, %s6171_s29  ;;  %v898_v44 = vsel %vm895_vm7, 0, %v606_v23 }
  0x8a   : > { %v946_v50 = vsel %vm944_vm8, %v898_v44, %v6444_v26  ;;  %v6539_v44 = vld [vmem:[%s6279_s19 + $0x60] sm:$0xff]  }
  0x8c   : > { %779 = vrot.lane.b32.xlu1 %v595_v24, %s6171_s29 }
  0x8d   : > { %809 = vrot.lane.b32.xlu0 %v6433_v15, %s6172_s17 }
  0x8f   : > { %v608_v30 = vpop.permute.xlu0 %607  ;;  %v735_v31 = vpop.permute.xlu1 %734 }
  0x90   : > { %811 = vrot.lane.b32.xlu1 %v6451_v27, %s6172_s17  ;;  %v901_v56 = vsel %vm895_vm7, %v6309_v19, %v608_v30  ;;  %v556_v19 = vor.u32 %v555_v53, %v454_v35 }
  0x91   : > { %843 = vrot.lane.b32.xlu0 %v6078_v5, %s6173_s18 }
  0x92   : > { %v597_v12 = vsel %vm6294_vm4, %v556_v19, 0 }
  0x93   : > { %v733_v34 = vpop.permute.xlu0 %732 }
  0x94   : > { %845 = vrot.lane.b32.xlu1 %v6426_v14, %s6173_s18 }
  0x95   : > { %875 = vrot.lane.b32.xlu0 %v595_v24, %s6174_s22 }
  0x96   : > { %v655_v36 = vpop.permute.xlu1 %654 }
  0x97   : > { %v701_v38 = vpop.permute.xlu0 %700  ;;  %v948_v59 = vsel %vm944_vm8, %v901_v56, %v655_v36 }
  0x98   : > { %621 = vrot.lane.b32.xlu1 %v6078_v5, %s6167_s13  ;;  %v979_v51 = vsel %vm977_vm9, %v946_v50, %v701_v38  ;;  %v559_v50 = vrot.slane %v471_v39, 1 }
  0x99   : > { %877 = vrot.lane.b32.xlu0 %v596_v37, %s6174_s22  ;;  %v1012_v60 = vsel %vm1010_vm10, %v979_v51, %v733_v34  ;;  %v468_v34 = vshrl.u32 %v6524_v28, 16  ;;  %v475_v51 = vshrl.u32 %v6539_v44, 16 }
  0x9a   : > { %v703_v42 = vpop.permute.xlu1 %702 }
  0x9b   : > { %v766_v43 = vpop.permute.xlu0 %765  ;;  %v981_v62 = vsel %vm977_vm9, %v948_v59, %v703_v42  ;;  %v470_v38 = vrot.slane %v468_v34, 7 }
  0x9c   : > { %623 = vrot.lane.b32.xlu1 %v6426_v14, %s6167_s13  ;;  %v1045_v63 = vsel %vm1043_vm11, %v1012_v60, %v766_v43  ;;  %v1014_v7 = vsel %vm1010_vm10, %v981_v62, %v735_v31  ;;  %v560_v60 = vor.u32 %v559_v50, %v468_v34  ;;  %v478_v62 = vshll.u32 %v6539_v44, 16 }
  0x9d   : > { %668 = vrot.lane.b32.xlu0 %v595_v24, %s6168_s14  ;;  %v557_v24 = vrot.slane %v464_v61, 1  ;;  %v473_v43 = vor.u32 %v471_v39, %v470_v38  ;;  %v477_v61 = vrot.slane %v475_v51, 7 }
  0x9e   : > { %v768_v47 = vpop.permute.xlu1 %767 }
  0x9f   : > { %v798_v49 = vpop.permute.xlu0 %797  ;;  %v1047_v10 = vsel %vm1043_vm11, %v1014_v7, %v768_v47  ;;  %v558_v31 = vor.u32 %v557_v24, %v461_v54  ;;  %v6590_v24 = vld [vmem:[%s6279_s19 + $0x68] sm:$0xff]  }
  0xa0   : > { %670 = vrot.lane.b32.xlu1 %v596_v37, %s6168_s14  ;;  %v1078_v2 = vsel %vm1076_vm12, %v1045_v63, %v798_v49  ;;  %v6547_v49 = vsel %vm6299_vm5, 0, %v473_v43  ;;  %v485_v38 = vshll.u32 %v6590_v24, 16  ;;  %v6607_v43 = vld [vmem:[%s6279_s19 + $0x70] sm:$0xff]  }
  0xa1   : > { %716 = vrot.lane.b32.xlu0 %v6451_v27, %s6170_s21  ;;  %v598_v36 = vsel %vm6294_vm4, %v558_v31, 0 }
  0xa2   : > { %v800_v55 = vpop.permute.xlu1 %799  ;;  %v563_v50 = vrot.slane %v485_v38, 1 }
  0xa3   : > { %v832_v57 = vpop.permute.xlu0 %831 }
  0xa4   : > { %718 = vrot.lane.b32.xlu1 %v6483_v52, %s6170_s21  ;;  %v1111_v5 = vsel %vm1109_vm13, %v1078_v2, %v832_v57 }
  0xa5   : > { %748 = vrot.lane.b32.xlu0 %v6426_v14, %s6169_s20  ;;  %v1080_v14 = vsel %vm1076_vm12, %v1047_v10, %v800_v55 }
  0xa6   : > { %v834_v4 = vpop.permute.xlu1 %833 }
  0xa7   : > { %v864_v6 = vpop.permute.xlu0 %863  ;;  %v1113_v17 = vsel %vm1109_vm13, %v1080_v14, %v834_v4 }
  0xa8   : > { %750 = vrot.lane.b32.xlu1 %v6457_v32, %s6169_s20  ;;  %v1144_v8 = vsel %vm1142_vm14, %v1111_v5, %v864_v6 }
  0xa9   : > { %781 = vrot.lane.b32.xlu0 %v596_v37, %s6171_s29  ;;  %5891 = vmatprep.mubr.msk.bf16.mxu0 %vm1202_vm15, %v1144_v8  ;;  %v480_v8 = vor.u32 %v478_v62, %v477_v61  ;;  %v492_v61 = vshll.u32 %v6607_v43, 16 }
  0xaa   : > { %v610_v16 = vpop.permute.xlu1 %609 }
  0xab   : > { %v866_v18 = vpop.permute.xlu0 %865  ;;  %v904_v47 = vsel %vm895_vm7, %v6317_v21, %v610_v16 }
  0xac   : > { %v1146_v20 = vsel %vm1142_vm14, %v1113_v17, %v866_v18  ;;  %783 = vrot.lane.b32.xlu1 %v597_v12, %s6171_s29  ;;  %v6583_v17 = vsel %vm6299_vm5, 0, %v480_v8 }
  0xad   : > { %813 = vrot.lane.b32.xlu0 %v6483_v52, %s6172_s17  ;;  %5892 = vmatmul.mubr.msk.bf16.vlgmr.msra.gmra.mrb[0].mxu0 %vm1202_vm15, %v1146_v20 }
  0xae   : > { %v612_v23 = vpop.permute.xlu1 %611 }
  0xaf   : > { %v657_v25 = vpop.permute.xlu0 %656  ;;  %v907_v55 = vsel %vm895_vm7, %v6338_v29, %v612_v23  ;;  %v561_v23 = vrot.slane %v478_v62, 1 }
  0xb0   : > { %815 = vrot.lane.b32.xlu1 %v6517_v22, %s6172_s17  ;;  %v950_v53 = vsel %vm944_vm8, %v904_v47, %v657_v25 }
  0xb1   : > { %847 = vrot.lane.b32.xlu0 %v6457_v32, %s6173_s18  ;;  %v562_v31 = vor.u32 %v561_v23, %v475_v51  ;;  %v489_v51 = vshrl.u32 %v6607_v43, 16 }
  0xb2   : > { %v659_v30 = vpop.permute.xlu1 %658 }
  0xb3   : > { %v705_v33 = vpop.permute.xlu0 %704  ;;  %v952_v63 = vsel %vm944_vm8, %v907_v55, %v659_v30 }
  0xb4   : > { %849 = vrot.lane.b32.xlu1 %v6473_v46, %s6173_s18  ;;  %v983_v21 = vsel %vm977_vm9, %v950_v53, %v705_v33  ;;  %v482_v33 = vshrl.u32 %v6590_v24, 16 }
  0xb5   : > { %879 = vrot.lane.b32.xlu0 %v597_v12, %s6174_s22 }
  0xb6   : > { %v707_v35 = vpop.permute.xlu1 %706 }
  0xb7   : > { %v737_v37 = vpop.permute.xlu0 %736  ;;  %v985_v1 = vsel %vm977_vm9, %v952_v63, %v707_v35 }
  0xb8   : > { %625 = vrot.lane.b32.xlu1 %v6457_v32, %s6167_s13  ;;  %v1016_v57 = vsel %vm1010_vm10, %v983_v21, %v737_v37  ;;  %v484_v37 = vrot.slane %v482_v33, 7 }
  0xb9   : > { %881 = vrot.lane.b32.xlu0 %v598_v36, %s6174_s22 }
  0xba   : > { %v739_v41 = vpop.permute.xlu1 %738 }
  0xbb   : > { %v770_v42 = vpop.permute.xlu0 %769  ;;  %v1018_v5 = vsel %vm1010_vm10, %v985_v1, %v739_v41 }
  0xbc   : > { %627 = vrot.lane.b32.xlu1 %v6473_v46, %s6167_s13  ;;  %v1049_v59 = vsel %vm1043_vm11, %v1016_v57, %v770_v42  ;;  %v487_v42 = vor.u32 %v485_v38, %v484_v37 }
  0xbd   : > { %672 = vrot.lane.b32.xlu0 %v597_v12, %s6168_s14 }
  0xbe   : > { %v772_v45 = vpop.permute.xlu1 %771 }
  0xbf   : > { %v802_v32 = vpop.permute.xlu0 %801  ;;  %v1051_v7 = vsel %vm1043_vm11, %v1018_v5, %v772_v45 }
  0xc0   : > { %674 = vrot.lane.b32.xlu1 %v598_v36, %s6168_s14  ;;  %v1082_v29 = vsel %vm1076_vm12, %v1049_v59, %v802_v32  ;;  %v6615_v32 = vsel %vm6299_vm5, 0, %v487_v42  ;;  %v564_v59 = vor.u32 %v563_v50, %v482_v33 }
  0xc1   : > { %720 = vrot.lane.b32.xlu0 %v6517_v22, %s6170_s21 }
  0xc2   : > { %v804_v54 = vpop.permute.xlu1 %803 }
  0xc3   : > { %v836_v56 = vpop.permute.xlu0 %835  ;;  %v1084_v10 = vsel %vm1076_vm12, %v1051_v7, %v804_v54 }
  0xc4   : > { %722 = vrot.lane.b32.xlu1 %v6547_v49, %s6170_s21  ;;  %v1115_v2 = vsel %vm1109_vm13, %v1082_v29, %v836_v56 }
  0xc5   : > { %752 = vrot.lane.b32.xlu0 %v6473_v46, %s6169_s20  ;;  %v599_v46 = vsel %vm6294_vm4, %v560_v60, 0  ;;  %v491_v60 = vrot.slane %v489_v51, 7 }
  0xc6   : > { %v838_v19 = vpop.permute.xlu1 %837 }
  0xc7   : > { %v868_v4 = vpop.permute.xlu0 %867  ;;  %v1117_v13 = vsel %vm1109_vm13, %v1084_v10, %v838_v19 }
  0xc8   : > { %v1148_v6 = vsel %vm1142_vm14, %v1115_v2, %v868_v4  ;;  %754 = vrot.lane.b32.xlu1 %v6524_v28, %s6169_s20 }
  0xc9   : > { %5895 = vmatprep.mubr.msk.bf16.mxu0 %vm1202_vm15, %v1148_v6  ;;  %785 = vrot.lane.b32.xlu0 %v598_v36, %s6171_s29  ;;  %v600_v36 = vsel %vm6294_vm4, %v562_v31, 0  ;;  %v494_v6 = vor.u32 %v492_v61, %v491_v60 }
  0xca   : > { %v614_v12 = vpop.permute.xlu1 %613 }
  0xcb   : > { %v870_v14 = vpop.permute.xlu0 %869 }
  0xcc   : > { %v1150_v16 = vsel %vm1142_vm14, %v1117_v13, %v870_v14  ;;  %787 = vrot.lane.b32.xlu1 %v599_v46, %s6171_s29  ;;  %v6651_v13 = vsel %vm6299_vm5, 0, %v494_v6  ;;  %v5754_v6 = vcombine.low %v6166_v0, %v6166_v0 }
  0xcd   : > { %5896 = vmatmul.mubr.msk.bf16.gmra.mrb[4].mxu0 %vm1202_vm15, %v1150_v16  ;;  %817 = vrot.lane.b32.xlu0 %v6547_v49, %s6172_s17 }
  0xce   : > { %v616_v18 = vpop.permute.xlu1 %615 }
  0xcf   : > { %v661_v20 = vpop.permute.xlu0 %660  ;;  %v913_v55 = vsel %vm895_vm7, %v6377_v48, %v616_v18  ;;  %v565_v18 = vrot.slane %v492_v61, 1 }
  0xd0   : > { %819 = vrot.lane.b32.xlu1 %v6583_v17, %s6172_s17 }
  0xd1   : > { %851 = vrot.lane.b32.xlu0 %v6524_v28, %s6173_s18 }
  0xd2   : > { %v663_v25 = vpop.permute.xlu1 %662 }
  0xd3   : > { %v709_v30 = vpop.permute.xlu0 %708  ;;  %v956_v62 = vsel %vm944_vm8, %v913_v55, %v663_v25 }
  0xd4   : > { %853 = vrot.lane.b32.xlu1 %v6539_v44, %s6173_s18 }
  0xd5   : > { %883 = vrot.lane.b32.xlu0 %v599_v46, %s6174_s22 }
  0xd6   : > { %v711_v34 = vpop.permute.xlu1 %710 }
  0xd7   : > { %v741_v35 = vpop.permute.xlu0 %740  ;;  %v989_v29 = vsel %vm977_vm9, %v956_v62, %v711_v34 }
  0xd8   : > { %629 = vrot.lane.b32.xlu1 %v6524_v28, %s6167_s13  ;;  %v910_v28 = vsel %vm895_vm7, %v6362_v40, %v614_v12 }
  0xd9   : > { %885 = vrot.lane.b32.xlu0 %v600_v36, %s6174_s22  ;;  %v954_v53 = vsel %vm944_vm8, %v910_v28, %v661_v20  ;;  %v6089_v20 = vld [vmem:[%s6279_s19 + $0x78] sm:$0xff]  }
  0xda   : > { %v743_v39 = vpop.permute.xlu1 %742  ;;  %v987_v40 = vsel %vm977_vm9, %v954_v53, %v709_v30  ;;  %v566_v30 = vor.u32 %v565_v18, %v489_v51  ;;  %v496_v31 = vshrl.u32 %v6089_v20, 16  ;;  %v499_v37 = vshll.u32 %v6089_v20, 16 }
  0xdb   : > { %v774_v41 = vpop.permute.xlu0 %773  ;;  %v1020_v56 = vsel %vm1010_vm10, %v987_v40, %v741_v35  ;;  %v1022_v2 = vsel %vm1010_vm10, %v989_v29, %v743_v39 }
  0xdc   : > { %631 = vrot.lane.b32.xlu1 %v6539_v44, %s6167_s13  ;;  %v1053_v57 = vsel %vm1043_vm11, %v1020_v56, %v774_v41  ;;  %v602_v35 = vsel %vm6294_vm4, %v566_v30, 0 }
  0xdd   : > { %676 = vrot.lane.b32.xlu0 %v599_v46, %s6168_s14 }
  0xde   : > { %v776_v45 = vpop.permute.xlu1 %775 }
  0xdf   : > { %v806_v47 = vpop.permute.xlu0 %805  ;;  %v1055_v5 = vsel %vm1043_vm11, %v1022_v2, %v776_v45 }
  0xe0   : > { %678 = vrot.lane.b32.xlu1 %v600_v36, %s6168_s14  ;;  %v1086_v48 = vsel %vm1076_vm12, %v1053_v57, %v806_v47  ;;  %v567_v47 = vrot.slane %v499_v37, 1 }
  0xe1   : > { %724 = vrot.lane.b32.xlu0 %v6583_v17, %s6170_s21 }
  0xe2   : > { %v808_v54 = vpop.permute.xlu1 %807 }
  0xe3   : > { %v840_v21 = vpop.permute.xlu0 %839  ;;  %v1088_v7 = vsel %vm1076_vm12, %v1055_v5, %v808_v54 }
  0xe4   : > { %726 = vrot.lane.b32.xlu1 %v6615_v32, %s6170_s21  ;;  %v1119_v19 = vsel %vm1109_vm13, %v1086_v48, %v840_v21  ;;  %v568_v21 = vor.u32 %v567_v47, %v496_v31 }
  0xe5   : > { %756 = vrot.lane.b32.xlu0 %v6539_v44, %s6169_s20  ;;  %v601_v44 = vsel %vm6294_vm4, %v564_v59, 0 }
  0xe6   : > { %v842_v63 = vpop.permute.xlu1 %841 }
  0xe7   : > { %v872_v1 = vpop.permute.xlu0 %871  ;;  %v1121_v8 = vsel %vm1109_vm13, %v1088_v7, %v842_v63 }
  0xe8   : > { %v1152_v4 = vsel %vm1142_vm14, %v1119_v19, %v872_v1  ;;  %758 = vrot.lane.b32.xlu1 %v6590_v24, %s6169_s20 }
  0xe9   : > { %5899 = vmatprep.mubr.msk.bf16.mxu0 %vm1202_vm15, %v1152_v4  ;;  %789 = vrot.lane.b32.xlu0 %v600_v36, %s6171_s29  ;;  %v498_v36 = vrot.slane %v496_v31, 7 }
  0xea   : > { %v618_v46 = vpop.permute.xlu1 %617 }
  0xeb   : > { %v874_v10 = vpop.permute.xlu0 %873  ;;  %v501_v41 = vor.u32 %v499_v37, %v498_v36  ;;  %v916_v45 = vsel %vm895_vm7, %v6397_v58, %v618_v46 }
  0xec   : > { %v1154_v12 = vsel %vm1142_vm14, %v1121_v8, %v874_v10  ;;  %791 = vrot.lane.b32.xlu1 %v601_v44, %s6171_s29 }
  0xed   : > { %5900 = vmatmul.mubr.msk.bf16.gmra.mrb[8].mxu0 %vm1202_vm15, %v1154_v12  ;;  %821 = vrot.lane.b32.xlu0 %v6615_v32, %s6172_s17  ;;  %v536_v28 = vsel %vm6299_vm5, 0, %v501_v41 }
  0xee   : > { %v620_v14 = vpop.permute.xlu1 %619 }
  0xef   : > { %v665_v16 = vpop.permute.xlu0 %664  ;;  %v919_v53 = vsel %vm895_vm7, %v6411_v3, %v620_v14 }
  0xf0   : > { %823 = vrot.lane.b32.xlu1 %v6651_v13, %s6172_s17  ;;  %v958_v50 = vsel %vm944_vm8, %v916_v45, %v665_v16 }
  0xf1   : > { %855 = vrot.lane.b32.xlu0 %v6590_v24, %s6173_s18 }
  0xf2   : > { %v667_v23 = vpop.permute.xlu1 %666 }
  0xf3   : > { %v713_v25 = vpop.permute.xlu0 %712  ;;  %v960_v56 = vsel %vm944_vm8, %v919_v53, %v667_v23 }
  0xf4   : > { %857 = vrot.lane.b32.xlu1 %v6607_v43, %s6173_s18  ;;  %v991_v54 = vsel %vm977_vm9, %v958_v50, %v713_v25 }
  0xf5   : > { %887 = vrot.lane.b32.xlu0 %v601_v44, %s6174_s22 }
  0xf6   : > { %v715_v33 = vpop.permute.xlu1 %714 }
  0xf7   : > { %v745_v34 = vpop.permute.xlu0 %744  ;;  %v993_v3 = vsel %vm977_vm9, %v960_v56, %v715_v33 }
  0xf8   : > { %633 = vrot.lane.b32.xlu1 %v6590_v24, %s6167_s13  ;;  %v1024_v58 = vsel %vm1010_vm10, %v991_v54, %v745_v34 }
  0xf9   : > { %889 = vrot.lane.b32.xlu0 %v602_v35, %s6174_s22 }
  0xfa   : > { %v747_v38 = vpop.permute.xlu1 %746 }
  0xfb   : > { %v778_v39 = vpop.permute.xlu0 %777  ;;  %v1026_v62 = vsel %vm1010_vm10, %v993_v3, %v747_v38 }
  0xfc   : > { %635 = vrot.lane.b32.xlu1 %v6607_v43, %s6167_s13  ;;  %v1057_v40 = vsel %vm1043_vm11, %v1024_v58, %v778_v39  ;;  %s6181_s13 = smov [#allocation2]  }
  0xfd   : > { %680 = vrot.lane.b32.xlu0 %v601_v44, %s6168_s14  ;;  %s6106_s19 = sshll.u32 %s6181_s13, 4  ;;  %s6107_s19 = int_to_ptr.vmem [resolvable:$false] %s6106_s19 }
  0xfe   : > { %v780_v42 = vpop.permute.xlu1 %779  ;;  %s6108_s9 = scalar_lea.vmem %s6107_s19, 256 }
  0xff   : > { %v810_v24 = vpop.permute.xlu0 %809  ;;  %v1059_v63 = vsel %vm1043_vm11, %v1026_v62, %v780_v42 }
 0x100   : > { %682 = vrot.lane.b32.xlu1 %v602_v35, %s6168_s14  ;;  %v1090_v57 = vsel %vm1076_vm12, %v1057_v40, %v810_v24 }
 0x101   : > { %728 = vrot.lane.b32.xlu0 %v6651_v13, %s6170_s21 }
 0x102   : > { %v812_v51 = vpop.permute.xlu1 %811 }
 0x103   : > { %v844_v55 = vpop.permute.xlu0 %843  ;;  %v1092_v29 = vsel %vm1076_vm12, %v1059_v63, %v812_v51 }
 0x104   : > { %730 = vrot.lane.b32.xlu1 %v536_v28, %s6170_s21  ;;  %v1123_v60 = vsel %vm1109_vm13, %v1090_v57, %v844_v55  ;;  %s6175_s21 = smov 56  }
 0x105   : > { %760 = vrot.lane.b32.xlu0 %v6607_v43, %s6169_s20  ;;  %v603_v43 = vsel %vm6294_vm4, %v568_v21, 0 }
 0x106   : > { %v846_v59 = vpop.permute.xlu1 %845 }
 0x107   : > { %v876_v61 = vpop.permute.xlu0 %875  ;;  %v1125_v1 = vsel %vm1109_vm13, %v1092_v29, %v846_v59 }
 0x108   : > { %v1156_v48 = vsel %vm1142_vm14, %v1123_v60, %v876_v61  ;;  %762 = vrot.lane.b32.xlu1 %v6089_v20, %s6169_s20 }
 0x109   : > { %5903 = vmatprep.mubr.msk.bf16.mxu0 %vm1202_vm15, %v1156_v48  ;;  %793 = vrot.lane.b32.xlu0 %v602_v35, %s6171_s29 }
 0x10a   : > { %v622_v19 = vpop.permute.xlu1 %621 }
 0x10b   : > { %v878_v2 = vpop.permute.xlu0 %877  ;;  %v922_v18 = vsel %vm895_vm7, %v6433_v15, %v622_v19 }
 0x10c   : > { %v1158_v4 = vsel %vm1142_vm14, %v1125_v1, %v878_v2  ;;  %795 = vrot.lane.b32.xlu1 %v603_v43, %s6171_s29  ;;  %s6177_s29 = smov 64  }
 0x10d   : > { %5904 = vmatmul.mubr.msk.bf16.gmra.mrb[12].mxu0 %vm1202_vm15, %v1158_v4  ;;  %825 = vrot.lane.b32.xlu0 %v536_v28, %s6172_s17 }
 0x10e   : > { %v624_v5 = vpop.permute.xlu1 %623 }
 0x10f   : > { %v669_v44 = vpop.permute.xlu0 %668  ;;  %v925_v30 = vsel %vm895_vm7, %v6451_v27, %v624_v5 }
 0x110   : > { %827 = vrot.lane.b32.xlu1 %v6166_v0, %s6172_s17  ;;  %v962_v23 = vsel %vm944_vm8, %v922_v18, %v669_v44 }
 0x111   : > { %859 = vrot.lane.b32.xlu0 %v6089_v20, %s6173_s18 }
 0x112   : > { %v671_v7 = vpop.permute.xlu1 %670 }
 0x113   : > { %v717_v46 = vpop.permute.xlu0 %716  ;;  %v964_v36 = vsel %vm944_vm8, %v925_v30, %v671_v7 }
 0x114   : > { %861 = vrot.lane.b32.xlu1 %v5754_v6, %s6173_s18  ;;  %v995_v31 = vsel %vm977_vm9, %v962_v23, %v717_v46  ;;  %s269_s18 = sand.u32 1, %s6156_s25  }
 0x115   : > { %891 = vrot.lane.b32.xlu0 %v603_v43, %s6174_s22 }
 0x116   : > { %v719_v8 = vpop.permute.xlu1 %718 }
 0x117   : > { %v749_v10 = vpop.permute.xlu0 %748  ;;  %v997_v15 = vsel %vm977_vm9, %v964_v36, %v719_v8 }
 0x118   : > { %893 = vrot.lane.b32.xlu1 %v6166_v0, %s6174_s22  ;;  %v1028_v34 = vsel %vm1010_vm10, %v995_v31, %v749_v10 }
 0x11a   : > { %v751_v12 = vpop.permute.xlu1 %750 }
 0x11b   : > { %v782_v14 = vpop.permute.xlu0 %781  ;;  %v1030_v42 = vsel %vm1010_vm10, %v997_v15, %v751_v12 }
 0x11c   : > { %1716 = vrot.lane.b32.xlu1 %v6166_v0, %s6169_s20  ;;  %v1061_v35 = vsel %vm1043_vm11, %v1028_v34, %v782_v14 }
 0x11e   : > { %v784_v16 = vpop.permute.xlu1 %783 }
 0x11f   : > { %v814_v20 = vpop.permute.xlu0 %813  ;;  %v1063_v45 = vsel %vm1043_vm11, %v1030_v42, %v784_v16 }
 0x120   : > { %v1094_v37 = vsel %vm1076_vm12, %v1061_v35, %v814_v20 }
 0x122   : > { %v816_v25 = vpop.permute.xlu1 %815 }
 0x123   : > { %v848_v33 = vpop.permute.xlu0 %847  ;;  %v1096_v24 = vsel %vm1076_vm12, %v1063_v45, %v816_v25 }
 0x124   : > { %v1127_v39 = vsel %vm1109_vm13, %v1094_v37, %v848_v33 }
 0x126   : > { %v850_v38 = vpop.permute.xlu1 %849 }
 0x127   : > { %v880_v41 = vpop.permute.xlu0 %879  ;;  %v1129_v47 = vsel %vm1109_vm13, %v1096_v24, %v850_v38 }
 0x128   : > { %v1160_v27 = vsel %vm1142_vm14, %v1127_v39, %v880_v41 }
 0x129   : > { %5907 = vmatprep.mubr.msk.bf16.mxu1 %vm1202_vm15, %v1160_v27 }
 0x12a   : > { %v626_v28 = vpop.permute.xlu1 %625 }
 0x12b   : > { %v882_v50 = vpop.permute.xlu0 %881  ;;  %v928_v58 = vsel %vm895_vm7, %v6483_v52, %v626_v28 }
 0x12c   : > { %v1162_v51 = vsel %vm1142_vm14, %v1129_v47, %v882_v50 }
 0x12d   : > { %5908 = vmatmul.mubr.msk.bf16.vlgmr.msra.gmra.mrb[0].mxu1 %vm1202_vm15, %v1162_v51 }
 0x12e   : > { %v628_v53 = vpop.permute.xlu1 %627 }
 0x12f   : > { %v673_v54 = vpop.permute.xlu0 %672  ;;  %v931_v57 = vsel %vm895_vm7, %v6517_v22, %v628_v53 }
 0x130   : > { %v966_v56 = vsel %vm944_vm8, %v928_v58, %v673_v54 }
 0x132   : > { %v675_v55 = vpop.permute.xlu1 %674 }
 0x133   : > { %v721_v40 = vpop.permute.xlu0 %720  ;;  %v968_v60 = vsel %vm944_vm8, %v931_v57, %v675_v55 }
 0x134   : > { %v999_v3 = vsel %vm977_vm9, %v966_v56, %v721_v40 }
 0x136   : > { %v723_v21 = vpop.permute.xlu1 %722 }
 0x137   : > { %v753_v59 = vpop.permute.xlu0 %752  ;;  %v1001_v63 = vsel %vm977_vm9, %v968_v60, %v723_v21 }
 0x138   : > { %v1032_v48 = vsel %vm1010_vm10, %v999_v3, %v753_v59 }
 0x13a   : > { %v755_v61 = vpop.permute.xlu1 %754 }
 0x13b   : > { %v786_v62 = vpop.permute.xlu0 %785  ;;  %v1034_v19 = vsel %vm1010_vm10, %v1001_v63, %v755_v61 }
 0x13c   : > { %v1065_v52 = vsel %vm1043_vm11, %v1032_v48, %v786_v62 }
 0x13e   : > { %v788_v43 = vpop.permute.xlu1 %787 }
 0x13f   : > { %v818_v29 = vpop.permute.xlu0 %817  ;;  %v1067_v2 = vsel %vm1043_vm11, %v1034_v19, %v788_v43 }
 0x140   : > { %v1098_v22 = vsel %vm1076_vm12, %v1065_v52, %v818_v29 }
 0x142   : > { %v820_v1 = vpop.permute.xlu1 %819 }
 0x143   : > { %v852_v4 = vpop.permute.xlu0 %851  ;;  %v1100_v44 = vsel %vm1076_vm12, %v1067_v2, %v820_v1 }
 0x144   : > { %v1131_v5 = vsel %vm1109_vm13, %v1098_v22, %v852_v4 }
 0x146   : > { %v854_v6 = vpop.permute.xlu1 %853 }
 0x147   : > { %v884_v7 = vpop.permute.xlu0 %883  ;;  %v1133_v8 = vsel %vm1109_vm13, %v1100_v44, %v854_v6 }
 0x148   : > { %v1164_v46 = vsel %vm1142_vm14, %v1131_v5, %v884_v7 }
 0x149   : > { %5911 = vmatprep.mubr.msk.bf16.mxu1 %vm1202_vm15, %v1164_v46 }
 0x14a   : > { %v630_v10 = vpop.permute.xlu1 %629 }
 0x14b   : > { %v886_v12 = vpop.permute.xlu0 %885  ;;  %v934_v23 = vsel %vm895_vm7, %v6547_v49, %v630_v10 }
 0x14c   : > { %v1166_v14 = vsel %vm1142_vm14, %v1133_v8, %v886_v12 }
 0x14d   : > { %5912 = vmatmul.mubr.msk.bf16.gmra.mrb[4].mxu1 %vm1202_vm15, %v1166_v14 }
 0x14e   : > { %v632_v16 = vpop.permute.xlu1 %631 }
 0x14f   : > { %v677_v18 = vpop.permute.xlu0 %676  ;;  %v937_v33 = vsel %vm895_vm7, %v6583_v17, %v632_v16 }
 0x150   : > { %v970_v31 = vsel %vm944_vm8, %v934_v23, %v677_v18 }
 0x152   : > { %v679_v20 = vpop.permute.xlu1 %678 }
 0x153   : > { %v725_v25 = vpop.permute.xlu0 %724  ;;  %v972_v36 = vsel %vm944_vm8, %v937_v33, %v679_v20 }
 0x154   : > { %v1003_v35 = vsel %vm977_vm9, %v970_v31, %v725_v25 }
 0x156   : > { %v727_v30 = vpop.permute.xlu1 %726 }
 0x157   : > { %v757_v34 = vpop.permute.xlu0 %756  ;;  %v1005_v39 = vsel %vm977_vm9, %v972_v36, %v727_v30 }
 0x158   : > { %v1036_v15 = vsel %vm1010_vm10, %v1003_v35, %v757_v34 }
 0x15a   : > { %v759_v37 = vpop.permute.xlu1 %758 }
 0x15b   : > { %v790_v38 = vpop.permute.xlu0 %789  ;;  %v1038_v27 = vsel %vm1010_vm10, %v1005_v39, %v759_v37 }
 0x15c   : > { %v1069_v49 = vsel %vm1043_vm11, %v1036_v15, %v790_v38 }
 0x15e   : > { %v792_v41 = vpop.permute.xlu1 %791 }
 0x15f   : > { %v822_v42 = vpop.permute.xlu0 %821  ;;  %v1071_v24 = vsel %vm1043_vm11, %v1038_v27, %v792_v41 }
 0x160   : > { %v1102_v17 = vsel %vm1076_vm12, %v1069_v49, %v822_v42 }
 0x162   : > { %v824_v45 = vpop.permute.xlu1 %823 }
 0x163   : > { %v856_v28 = vpop.permute.xlu0 %855  ;;  %v1104_v50 = vsel %vm1076_vm12, %v1071_v24, %v824_v45 }
 0x164   : > { %v1135_v47 = vsel %vm1109_vm13, %v1102_v17, %v856_v28 }
 0x166   : > { %v858_v51 = vpop.permute.xlu1 %857 }
 0x167   : > { %v888_v53 = vpop.permute.xlu0 %887  ;;  %v1137_v55 = vsel %vm1109_vm13, %v1104_v50, %v858_v51 }
 0x168   : > { %v1168_v54 = vsel %vm1142_vm14, %v1135_v47, %v888_v53 }
 0x169   : > { %5915 = vmatprep.mubr.msk.bf16.mxu1 %vm1202_vm15, %v1168_v54 }
 0x16a   : > { %v634_v58 = vpop.permute.xlu1 %633 }
 0x16b   : > { %v890_v40 = vpop.permute.xlu0 %889  ;;  %v940_v3 = vsel %vm895_vm7, %v6615_v32, %v634_v58  ;;  %v6788_v32 = vld [vmem:[%s8956_s2] ss:$0 sm:$0xff] }
 0x16c   : > { %v1170_v21 = vsel %vm1142_vm14, %v1137_v55, %v890_v40 }
 0x16d   : > { %5916 = vmatmul.mubr.msk.bf16.gmra.mrb[8].mxu1 %vm1202_vm15, %v1170_v21 }
 0x16e   : > { %v636_v56 = vpop.permute.xlu1 %635 }
 0x16f   : > { %v681_v57 = vpop.permute.xlu0 %680  ;;  %v943_v61 = vsel %vm895_vm7, %v6651_v13, %v636_v56  ;;  %vm2308_vm7 = vcmask 1043456  }
 0x170   : > { %v974_v48 = vsel %vm944_vm8, %v940_v3, %v681_v57 }
 0x172   : > { %v683_v59 = vpop.permute.xlu1 %682 }
 0x173   : > { %v729_v60 = vpop.permute.xlu0 %728  ;;  %v976_v43 = vsel %vm944_vm8, %v943_v61, %v683_v59 }
 0x174   : > { %v1007_v52 = vsel %vm977_vm9, %v974_v48, %v729_v60 }
 0x176   : > { %v731_v62 = vpop.permute.xlu1 %730 }
 0x177   : > { %v761_v63 = vpop.permute.xlu0 %760  ;;  %v1009_v1 = vsel %vm977_vm9, %v976_v43, %v731_v62  ;;  %vm5417_vm9 = vcmask 1042434  }
 0x178   : > { %v1040_v22 = vsel %vm1010_vm10, %v1007_v52, %v761_v63 }
 0x17a   : > { %v763_v29 = vpop.permute.xlu1 %762 }
 0x17b   : > { %v794_v19 = vpop.permute.xlu0 %793  ;;  %v1042_v13 = vsel %vm1010_vm10, %v1009_v1, %v763_v29 }
 0x17c   : > { %v1073_v4 = vsel %vm1043_vm11, %v1040_v22, %v794_v19 }
 0x17e   : > { %v796_v2 = vpop.permute.xlu1 %795 }
 0x17f   : > { %v826_v5 = vpop.permute.xlu0 %825  ;;  %v1075_v46 = vsel %vm1043_vm11, %v1042_v13, %v796_v2  ;;  %vm5419_vm11 = vcmask 1043459  }
 0x180   : > { %v5893_v44 = vpop.f32.mrb[0].mxu0  ;;  %v1106_v14 = vsel %vm1076_vm12, %v1073_v4, %v826_v5 }
 0x181   : > { %v1282_v6 = vadd.f32 %v5893_v44, %v6788_v32  ;;  %v1273_v7 = vpop.f32.mrb[1].mxu0 }
 0x182   : > { %v1274_v8 = vadd.f32 %v6788_v32, %v1273_v7  ;;  %v828_v10 = vpop.permute.xlu1 %827  ;;  %v5894_v12 = vpop.f32.mrb[2].mxu0 }
 0x183   : > { %v1285_v16 = vadd.f32 %v5894_v12, %v6788_v32  ;;  %v1276_v18 = vpop.f32.mrb[3].mxu0  ;;  %v860_v20 = vpop.permute.xlu0 %859  ;;  %v1402_v25 = vmax.f32 %v1282_v6, 0.0  ;;  %v1108_v30 = vsel %vm1076_vm12, %v1075_v46, %v828_v10 }
 0x184   : > { %v1277_v23 = vadd.f32 %v6788_v32, %v1276_v18  ;;  %v1139_v33 = vsel %vm1109_vm13, %v1106_v14, %v860_v20  ;;  %v1400_v34 = vmax.f32 %v1274_v8, 0.0 }
 0x185   : > { %v1403_v31 = vmax.f32 %v1285_v16, 0.0 }
 0x186   : > { %v1401_v35 = vmax.f32 %v1277_v23, 0.0  ;;  %v862_v36 = vpop.permute.xlu1 %861 }
 0x187   : > { %v1433_v37 = vpack.c.bf16 %v1403_v31, %v1402_v25  ;;  %v892_v38 = vpop.permute.xlu0 %891  ;;  %v1141_v39 = vsel %vm1109_vm13, %v1108_v30, %v862_v36  ;;  %vm5421_vm13 = vcmask 1044484  }
 0x188   : > { %v1432_v15 = vpack.c.bf16 %v1401_v35, %v1400_v34  ;;  %v1172_v41 = vsel %vm1142_vm14, %v1139_v33, %v892_v38 }
 0x189   : > { %1894 = vrot.lane.b32.xlu1 %v1433_v37, %s6175_s21  ;;  %1799 = vrot.lane.b32.xlu0 %v1433_v37, %s6174_s22  ;;  %v1456_v49 = vshrl.u32 %v1433_v37, 16  ;;  %v1459_v42 = vshll.u32 %v1433_v37, 16 }
 0x18a   : > { %v894_v27 = vpop.permute.xlu1 %893  ;;  %5919 = vmatprep.mubr.msk.bf16.mxu1 %vm1202_vm15, %v1172_v41  ;;  %v1449_v51 = vshrl.u32 %v1432_v15, 16  ;;  %v1452_v55 = vshll.u32 %v1432_v15, 16 }
 0x18b   : > { %v1174_v45 = vsel %vm1142_vm14, %v1141_v39, %v894_v27  ;;  %v1458_v17 = vrot.slane %v1456_v49, 7  ;;  %v1594_v24 = vrot.slane %v1459_v42, 1 }
 0x18c   : > { %5920 = vmatmul.mubr.msk.bf16.gmra.mrb[12].mxu1 %vm1202_vm15, %v1174_v45  ;;  %v1451_v54 = vrot.slane %v1449_v51, 7  ;;  %v1592_v40 = vrot.slane %v1452_v55, 1  ;;  %vm5423_vm15 = vcmask 1045509  }
 0x18d   : > { %1673 = vrot.lane.b32.xlu0 %v1433_v37, %s6168_s14  ;;  %1797 = vrot.lane.b32.xlu1 %v1432_v15, %s6174_s22  ;;  %v1461_v28 = vor.u32 %v1459_v42, %v1458_v17  ;;  %v1595_v50 = vor.u32 %v1594_v24, %v1456_v49 }
 0x18e   : > { %v1454_v58 = vor.u32 %v1452_v55, %v1451_v54  ;;  %v1593_v56 = vor.u32 %v1592_v40, %v1449_v51  ;;  %v1717_v42 = vpop.permute.xlu1 %1716 }
 0x18f   : > { %v6811_v47 = vsel %vm6299_vm5, 0, %v1461_v28  ;;  %v6818_v53 = vsel %vm6294_vm4, %v1595_v50, 0 }
 0x190   : > { %v6826_v21 = vsel %vm6299_vm5, 0, %v1454_v58  ;;  %v6832_v59 = vsel %vm6294_vm4, %v1593_v56, 0 }
 0x191   : > { %1862 = vrot.lane.b32.xlu1 %v6811_v47, %s6176_s23  ;;  %1671 = vrot.lane.b32.xlu0 %v1432_v15, %s6168_s14 }
 0x195   : > { %1926 = vrot.lane.b32.xlu1 %v6818_v53, %s6177_s29 }
 0x199   : > { %1720 = vrot.lane.b32.xlu1 %v6818_v53, %s6169_s20 }
 0x19d   : > { %1764 = vrot.lane.b32.xlu1 %v6826_v21, %s6172_s17 }
 0x1a0   : > { %v5897_v57 = vpop.f32.mrb[4].mxu0 }
 0x1a1   : > { %v1298_v3 = vadd.f32 %v5897_v57, %v6788_v32  ;;  %v1289_v60 = vpop.f32.mrb[5].mxu0  ;;  %1830 = vrot.lane.b32.xlu1 %v6832_v59, %s6178_s8 }
 0x1a2   : > { %v1290_v61 = vadd.f32 %v6788_v32, %v1289_v60  ;;  %v5898_v62 = vpop.f32.mrb[6].mxu0 }
 0x1a3   : > { %v1301_v48 = vadd.f32 %v5898_v62, %v6788_v32  ;;  %v1292_v63 = vpop.f32.mrb[7].mxu0  ;;  %v1406_v52 = vmax.f32 %v1298_v3, 0.0 }
 0x1a4   : > { %v1293_v43 = vadd.f32 %v6788_v32, %v1292_v63  ;;  %v1404_v19 = vmax.f32 %v1290_v61, 0.0 }
 0x1a5   : > { %v1407_v29 = vmax.f32 %v1301_v48, 0.0 }
 0x1a6   : > { %v1405_v1 = vmax.f32 %v1293_v43, 0.0 }
 0x1a7   : > { %v6840_v22 = vpack.c.bf16 %v1407_v29, %v1406_v52 }
 0x1a8   : > { %v6842_v2 = vpack.c.bf16 %v1405_v1, %v1404_v19 }
 0x1a9   : > { %1898 = vrot.lane.b32.xlu1 %v6840_v22, %s6175_s21  ;;  %v1470_v1 = vshrl.u32 %v6840_v22, 16 }
 0x1ad   : > { %1801 = vrot.lane.b32.xlu1 %v6842_v2, %s6174_s22 }
 0x1c0   : > { %v5901_v13 = vpop.f32.mrb[8].mxu0 }
 0x1c1   : > { %v1314_v4 = vadd.f32 %v5901_v13, %v6788_v32  ;;  %v1305_v5 = vpop.f32.mrb[9].mxu0  ;;  %v1958_v13 = vsel %vm944_vm8, 0, %v6444_v26 }
 0x1c2   : > { %v1306_v44 = vadd.f32 %v6788_v32, %v1305_v5  ;;  %v5902_v6 = vpop.f32.mrb[10].mxu0  ;;  %v6884_v5 = vsel %vm1010_vm10, %v1958_v13, %v1717_v42 }
 0x1c3   : > { %v1317_v7 = vadd.f32 %v5902_v6, %v6788_v32  ;;  %v1308_v46 = vpop.f32.mrb[11].mxu0  ;;  %v1410_v10 = vmax.f32 %v1314_v4, 0.0  ;;  %v1473_v6 = vshll.u32 %v6840_v22, 16 }
 0x1c4   : > { %v1309_v8 = vadd.f32 %v6788_v32, %v1308_v46  ;;  %v1408_v14 = vmax.f32 %v1306_v44, 0.0 }
 0x1c5   : > { %v1411_v12 = vmax.f32 %v1317_v7, 0.0 }
 0x1c6   : > { %v1409_v16 = vmax.f32 %v1309_v8, 0.0 }
 0x1c7   : > { %v6852_v18 = vpack.c.bf16 %v1411_v12, %v1410_v10  ;;  %v1472_v10 = vrot.slane %v1470_v1, 7 }
 0x1c8   : > { %v6854_v20 = vpack.c.bf16 %v1409_v16, %v1408_v14 }
 0x1e0   : > { %v5905_v23 = vpop.f32.mrb[12].mxu0 }
 0x1e1   : > { %v1330_v25 = vadd.f32 %v5905_v23, %v6788_v32  ;;  %v1321_v30 = vpop.f32.mrb[13].mxu0  ;;  %v1475_v23 = vor.u32 %v1473_v6, %v1472_v10 }
 0x1e2   : > { %v1322_v31 = vadd.f32 %v6788_v32, %v1321_v30  ;;  %v5906_v33 = vpop.f32.mrb[14].mxu0 }
 0x1e3   : > { %v1333_v34 = vadd.f32 %v5906_v33, %v6788_v32  ;;  %v1324_v35 = vpop.f32.mrb[15].mxu0  ;;  %v1414_v37 = vmax.f32 %v1330_v25, 0.0  ;;  %v1598_v25 = vrot.slane %v1473_v6, 1 }
 0x1e4   : > { %v1325_v36 = vadd.f32 %v6788_v32, %v1324_v35  ;;  %v1412_v15 = vmax.f32 %v1322_v31, 0.0 }
 0x1e5   : > { %v1415_v38 = vmax.f32 %v1333_v34, 0.0  ;;  %v6913_v34 = vsel %vm6299_vm5, 0, %v1475_v23  ;;  %v1599_v35 = vor.u32 %v1598_v25, %v1470_v1  ;;  %v1487_v1 = vshll.u32 %v6852_v18, 16 }
 0x1e6   : > { %v1413_v39 = vmax.f32 %v1325_v36, 0.0  ;;  %v1466_v36 = vshll.u32 %v6842_v2, 16 }
 0x1e7   : > { %v6860_v41 = vpack.c.bf16 %v1415_v38, %v1414_v37  ;;  %v1463_v37 = vshrl.u32 %v6842_v2, 16 }
 0x1e8   : > { %v6862_v49 = vpack.c.bf16 %v1413_v39, %v1412_v15  ;;  %v1596_v38 = vrot.slane %v1466_v36, 1  ;;  %v6090_v15 = vld [vmem:[%s8957_s3] sm:$0xff]  }
 0x1e9   : > { %5923 = vmatprep.subr.bf16.mxu1 %v6090_v15  ;;  %v1465_v42 = vrot.slane %v1463_v37, 7 }
 0x1ea   : > { %5924 = vmatpush3.bf16.msra.mxu1 %v6090_v15  ;;  %v1597_v39 = vor.u32 %v1596_v38, %v1463_v37 }
 0x1fb   : > { %v1895_v27 = vpop.permute.xlu1 %1894 }
 0x1ff   : > { %v1798_v45 = vpop.permute.xlu1 %1797 }
 0x200   : > { %v5909_v17 = vpop.f32.mrb[0].mxu1 }
 0x201   : > { %v1346_v24 = vadd.f32 %v5909_v17, %v6788_v32  ;;  %v1337_v28 = vpop.f32.mrb[1].mxu1 }
 0x202   : > { %v1338_v50 = vadd.f32 %v6788_v32, %v1337_v28  ;;  %v5910_v51 = vpop.f32.mrb[2].mxu1  ;;  %v6091_v28 = vld [vmem:[%s8957_s3 + $0x8] sm:$0xff]  }
 0x203   : > { %v1349_v54 = vadd.f32 %v5910_v51, %v6788_v32  ;;  %v1340_v55 = vpop.f32.mrb[3].mxu1  ;;  %v1863_v58 = vpop.permute.xlu1 %1862  ;;  %v1418_v56 = vmax.f32 %v1346_v24, 0.0  ;;  %5925 = vmatprep.subr.bf16.mxu1 %v6091_v28 }
 0x204   : > { %v1341_v40 = vadd.f32 %v6788_v32, %v1340_v55  ;;  %v1416_v3 = vmax.f32 %v1338_v50, 0.0  ;;  %v1642_v55 = vsel %vm6294_vm4, %v1597_v39, 0  ;;  %5926 = vmatpush3.bf16.msra.mxu1 %v6091_v28  ;;  %v1498_v28 = vshrl.u32 %v6860_v41, 16 }
 0x205   : > { %v1419_v57 = vmax.f32 %v1349_v54, 0.0 }
 0x206   : > { %v1417_v60 = vmax.f32 %v1341_v40, 0.0 }
 0x207   : > { %v6868_v61 = vpack.c.bf16 %v1419_v57, %v1418_v56  ;;  %v1927_v62 = vpop.permute.xlu1 %1926 }
 0x208   : > { %v6870_v48 = vpack.c.bf16 %v1417_v60, %v1416_v3  ;;  %v6092_v60 = vld [vmem:[%s8957_s3 + $0x10] sm:$0xff]  }
 0x209   : > { %5927 = vmatprep.subr.bf16.mxu1 %v6092_v60 }
 0x20a   : > { %1908 = vrot.lane.b32.xlu0 %v6870_v48, %s6175_s21  ;;  %v1505_v63 = vshrl.u32 %v6870_v48, 16  ;;  %v1508_v43 = vshll.u32 %v6870_v48, 16  ;;  %5928 = vmatpush3.bf16.msra.mxu1 %v6092_v60 }
 0x20b   : > { %v6876_v52 = vpop.permute.xlu1 %1720 }
 0x20c   : > { %v1608_v29 = vrot.slane %v1508_v43, 1  ;;  %v1507_v19 = vrot.slane %v1505_v63, 7 }
 0x20e   : > { %1687 = vrot.lane.b32.xlu0 %v6870_v48, %s6168_s14  ;;  %v1609_v4 = vor.u32 %v1608_v29, %v1505_v63  ;;  %v1510_v8 = vor.u32 %v1508_v43, %v1507_v19  ;;  %v6093_v43 = vld [vmem:[%s8957_s3 + $0x18] sm:$0xff]   ;;  %v1484_v29 = vshrl.u32 %v6852_v18, 16  ;;  %v6094_v19 = vld [vmem:[%s8957_s3 + $0x20] ss:$0 sps:$4 sm:$0xff]  }
 0x20f   : > { %v1765_v44 = vpop.permute.xlu1 %1764  ;;  %5929 = vmatprep.subr.bf16.mxu1 %v6093_v43  ;;  %v2310_v13 = vsel %vm2308_vm7, %v6094_v19, 0 }
 0x210   : > { %v2037_v7 = vsel %vm1076_vm12, %v6884_v5, %v1765_v44  ;;  %v6891_v46 = vsel %vm6294_vm4, %v1609_v4, 0  ;;  %v6901_v16 = vsel %vm6299_vm5, 0, %v1510_v8  ;;  %5930 = vmatpush3.bf16.msra.mxu1 %v6093_v43  ;;  %v1602_v44 = vrot.slane %v1487_v1, 1 }
 0x211   : > { %1940 = vrot.lane.b32.xlu1 %v6891_v46, %s6177_s29  ;;  %v2069_v26 = vsel %vm1142_vm14, %v2037_v7, %v1798_v45  ;;  %6015 = vmatprep.subr.msk.bf16.mxu1 %vm2308_vm7, %v6094_v19  ;;  %v1480_v8 = vshll.u32 %v6854_v20, 16 }
 0x212   : > { %1766 = vrot.lane.b32.xlu0 %v6811_v47, %s6172_s17  ;;  %v1603_v7 = vor.u32 %v1602_v44, %v1484_v29 }
 0x213   : > { %v1831_v12 = vpop.permute.xlu1 %1830 }
 0x214   : > { %v2102_v14 = vsel %vm2100_vm0, %v2069_v26, %v1831_v12  ;;  %5932 = vmatpush3.bf16.msra.mxu1 %v2310_v13  ;;  %v1645_v10 = vsel %vm6294_vm4, %v1603_v7, 0  ;;  %v1477_v26 = vshrl.u32 %v6854_v20, 16  ;;  %v1600_v12 = vrot.slane %v1480_v8, 1 }
 0x215   : > { %v2135_v30 = vsel %vm2133_vm1, %v2102_v14, %v1863_v58  ;;  %1780 = vrot.lane.b32.xlu1 %v6901_v16, %s6172_s17  ;;  %v1468_v58 = vor.u32 %v1466_v36, %v1465_v42 }
 0x216   : > { %1832 = vrot.lane.b32.xlu0 %v6818_v53, %s6178_s8  ;;  %v2168_v31 = vsel %vm2166_vm2, %v2135_v30, %v1895_v27  ;;  %v1643_v53 = vsel %vm6294_vm4, %v1599_v35, 0  ;;  %v1601_v14 = vor.u32 %v1600_v12, %v1477_v26  ;;  %v1479_v23 = vrot.slane %v1477_v26, 7 }
 0x217   : > { %v2201_v33 = vsel %vm2199_vm3, %v2168_v31, %v1927_v62  ;;  %v6951_v62 = vsel %vm6299_vm5, 0, %v1468_v58 }
 0x218   : > { %5933 = vmatprep.mubr.msk.bf16.mxu1 %vm2275_vm6, %v2201_v33  ;;  %v1644_v38 = vsel %vm6294_vm4, %v1601_v14, 0  ;;  %v1482_v15 = vor.u32 %v1480_v8, %v1479_v23 }
 0x219   : > { %1866 = vrot.lane.b32.xlu1 %v6913_v34, %s6176_s23 }
 0x21a   : > { %1718 = vrot.lane.b32.xlu0 %v6832_v59, %s6169_s20 }
 0x21d   : > { %1930 = vrot.lane.b32.xlu1 %v1643_v53, %s6177_s29 }
 0x21e   : > { %1803 = vrot.lane.b32.xlu0 %v6840_v22, %s6174_s22 }
 0x220   : > { %v5913_v59 = vpop.f32.mrb[4].mxu1 }
 0x221   : > { %1724 = vrot.lane.b32.xlu1 %v1643_v53, %s6169_s20  ;;  %v1362_v27 = vadd.f32 %v5913_v59, %v6788_v32  ;;  %v1353_v45 = vpop.f32.mrb[5].mxu1 }
 0x222   : > { %1677 = vrot.lane.b32.xlu0 %v6840_v22, %s6168_s14  ;;  %v1354_v17 = vadd.f32 %v6788_v32, %v1353_v45  ;;  %v5914_v24 = vpop.f32.mrb[6].mxu1 }
 0x223   : > { %v1422_v50 = vmax.f32 %v1362_v27, 0.0  ;;  %v1365_v51 = vadd.f32 %v5914_v24, %v6788_v32  ;;  %v1356_v54 = vpop.f32.mrb[7].mxu1 }
 0x224   : > { %v1420_v40 = vmax.f32 %v1354_v17, 0.0  ;;  %v1357_v56 = vadd.f32 %v6788_v32, %v1356_v54  ;;  %v7009_v17 = vsel %vm6299_vm5, 0, %v1482_v15  ;;  %v7091_v15 = vpop.permute.xlu1 %1898 }
 0x225   : > { %1928 = vrot.lane.b32.xlu1 %v1642_v55, %s6177_s29  ;;  %v1423_v22 = vmax.f32 %v1365_v51, 0.0  ;;  %v1501_v51 = vshll.u32 %v6860_v41, 16 }
 0x226   : > { %1896 = vrot.lane.b32.xlu0 %v6842_v2, %s6175_s21  ;;  %v1421_v57 = vmax.f32 %v1357_v56, 0.0  ;;  %v1491_v56 = vshrl.u32 %v6862_v49, 16 }
 0x227   : > { %v6944_v3 = vpack.c.bf16 %v1423_v22, %v1422_v50  ;;  %v1500_v50 = vrot.slane %v1498_v28, 7 }
 0x228   : > { %v6953_v63 = vpack.c.bf16 %v1421_v57, %v1420_v40  ;;  %v1494_v40 = vshll.u32 %v6862_v49, 16  ;;  %v1493_v43 = vrot.slane %v1491_v56, 7 }
 0x229   : > { %1768 = vrot.lane.b32.xlu1 %v6951_v62, %s6172_s17  ;;  %v1503_v54 = vor.u32 %v1501_v51, %v1500_v50 }
 0x22a   : > { %1675 = vrot.lane.b32.xlu0 %v6842_v2, %s6168_s14  ;;  %v1486_v2 = vrot.slane %v1484_v29, 7  ;;  %v1604_v22 = vrot.slane %v1494_v40, 1  ;;  %v1496_v26 = vor.u32 %v1494_v40, %v1493_v43 }
 0x22c   : > { %v1489_v4 = vor.u32 %v1487_v1, %v1486_v2  ;;  %v1605_v60 = vor.u32 %v1604_v22, %v1491_v56 }
 0x22d   : > { %1834 = vrot.lane.b32.xlu1 %v1642_v55, %s6178_s8 }
 0x22e   : > { %1876 = vrot.lane.b32.xlu0 %v6901_v16, %s6176_s23  ;;  %v6982_v6 = vsel %vm6299_vm5, 0, %v1489_v4 }
 0x231   : > { %1902 = vrot.lane.b32.xlu1 %v6852_v18, %s6175_s21 }
 0x232   : > { %1734 = vrot.lane.b32.xlu0 %v6891_v46, %s6169_s20 }
 0x235   : > { %1805 = vrot.lane.b32.xlu1 %v6854_v20, %s6174_s22 }
 0x236   : > { %1770 = vrot.lane.b32.xlu0 %v6913_v34, %s6172_s17 }
 0x239   : > { %1870 = vrot.lane.b32.xlu1 %v6982_v6, %s6176_s23 }
 0x23a   : > { %1836 = vrot.lane.b32.xlu0 %v1643_v53, %s6178_s8 }
 0x23d   : > { %1934 = vrot.lane.b32.xlu1 %v1645_v10, %s6177_s29 }
 0x23e   : > { %1864 = vrot.lane.b32.xlu0 %v6951_v62, %s6176_s23 }
 0x240   : > { %v5917_v25 = vpop.f32.mrb[8].mxu1 }
 0x241   : > { %1728 = vrot.lane.b32.xlu1 %v1645_v10, %s6169_s20  ;;  %v1378_v30 = vadd.f32 %v5917_v25, %v6788_v32  ;;  %v1369_v31 = vpop.f32.mrb[9].mxu1 }
 0x242   : > { %1722 = vrot.lane.b32.xlu0 %v1642_v55, %s6169_s20  ;;  %v1370_v33 = vadd.f32 %v6788_v32, %v1369_v31  ;;  %v5918_v35 = vpop.f32.mrb[10].mxu1  ;;  %v1606_v55 = vrot.slane %v1501_v51, 1  ;;  %v1512_v31 = vshrl.u32 %v6868_v61, 16 }
 0x243   : > { %v1426_v36 = vmax.f32 %v1378_v30, 0.0  ;;  %v1381_v53 = vadd.f32 %v5918_v35, %v6788_v32  ;;  %v1372_v37 = vpop.f32.mrb[11].mxu1  ;;  %v7061_v30 = vsel %vm6299_vm5, 0, %v1496_v26 }
 0x244   : > { %v1424_v39 = vmax.f32 %v1370_v33, 0.0  ;;  %v1373_v42 = vadd.f32 %v6788_v32, %v1372_v37  ;;  %v1607_v58 = vor.u32 %v1606_v55, %v1498_v28  ;;  %v1514_v33 = vrot.slane %v1512_v31, 7 }
 0x245   : > { %1932 = vrot.lane.b32.xlu1 %v1644_v38, %s6177_s29  ;;  %v1427_v59 = vmax.f32 %v1381_v53, 0.0  ;;  %v1522_v53 = vshll.u32 %v6953_v63, 16 }
 0x246   : > { %1807 = vrot.lane.b32.xlu0 %v6852_v18, %s6174_s22  ;;  %v1425_v27 = vmax.f32 %v1373_v42, 0.0 }
 0x247   : > { %v7005_v45 = vpack.c.bf16 %v1427_v59, %v1426_v36 }
 0x248   : > { %v7011_v24 = vpack.c.bf16 %v1425_v27, %v1424_v39  ;;  %v7103_v27 = vpop.permute.xlu1 %1801 }
 0x249   : > { %1772 = vrot.lane.b32.xlu1 %v7009_v17, %s6172_s17 }
 0x24a   : > { %1681 = vrot.lane.b32.xlu0 %v6852_v18, %s6168_s14  ;;  %v7032_v18 = vsel %vm6299_vm5, 0, %v1503_v54 }
 0x24d   : > { %1838 = vrot.lane.b32.xlu1 %v1644_v38, %s6178_s8 }
 0x24e   : > { %1900 = vrot.lane.b32.xlu0 %v6854_v20, %s6175_s21 }
 0x251   : > { %1906 = vrot.lane.b32.xlu1 %v6860_v41, %s6175_s21 }
 0x252   : > { %1679 = vrot.lane.b32.xlu0 %v6854_v20, %s6168_s14  ;;  %v1647_v20 = vsel %vm6294_vm4, %v1607_v58, 0 }
 0x255   : > { %1809 = vrot.lane.b32.xlu1 %v6862_v49, %s6174_s22 }
 0x256   : > { %1774 = vrot.lane.b32.xlu0 %v6982_v6, %s6172_s17 }
 0x259   : > { %1874 = vrot.lane.b32.xlu1 %v7032_v18, %s6176_s23 }
 0x25a   : > { %1840 = vrot.lane.b32.xlu0 %v1645_v10, %s6178_s8  ;;  %v1646_v10 = vsel %vm6294_vm4, %v1605_v60, 0 }
 0x25d   : > { %1938 = vrot.lane.b32.xlu1 %v1647_v20, %s6177_s29 }
 0x25e   : > { %1868 = vrot.lane.b32.xlu0 %v7009_v17, %s6176_s23 }
 0x25f   : > { %v5921_v57 = vpop.f32.mrb[12].mxu1 }
 0x260   : > { %v1394_v29 = vadd.f32 %v5921_v57, %v6788_v32  ;;  %v1385_v19 = vpop.f32.mrb[13].mxu1  ;;  %v1526_v57 = vshrl.u32 %v6944_v3, 16 }
 0x261   : > { %1732 = vrot.lane.b32.xlu1 %v1647_v20, %s6169_s20  ;;  %v1386_v2 = vadd.f32 %v6788_v32, %v1385_v19  ;;  %v5922_v1 = vpop.f32.mrb[14].mxu1  ;;  %v1529_v19 = vshll.u32 %v6944_v3, 16 }
 0x262   : > { %1726 = vrot.lane.b32.xlu0 %v1644_v38, %s6169_s20  ;;  %v1430_v13 = vmax.f32 %v1394_v29, 0.0  ;;  %v1397_v4 = vadd.f32 %v5922_v1, %v6788_v32  ;;  %v1388_v44 = vpop.f32.mrb[15].mxu1  ;;  %v1528_v29 = vrot.slane %v1526_v57, 7 }
 0x263   : > { %v1428_v7 = vmax.f32 %v1386_v2, 0.0  ;;  %v1389_v8 = vadd.f32 %v6788_v32, %v1388_v44  ;;  %v7067_v32 = vpop.permute.xlu0 %1799 }
 0x264   : > { %v1431_v12 = vmax.f32 %v1397_v4, 0.0 }
 0x265   : > { %1936 = vrot.lane.b32.xlu1 %v1646_v10, %s6177_s29  ;;  %v1429_v14 = vmax.f32 %v1389_v8, 0.0  ;;  %v1536_v8 = vshll.u32 %v7011_v24, 16 }
 0x266   : > { %1811 = vrot.lane.b32.xlu0 %v6860_v41, %s6174_s22  ;;  %v7055_v23 = vpack.c.bf16 %v1431_v12, %v1430_v13  ;;  %v1531_v13 = vor.u32 %v1529_v19, %v1528_v29  ;;  %v1614_v12 = vrot.slane %v1529_v19, 1 }
 0x267   : > { %v7057_v25 = vpack.c.bf16 %v1429_v14, %v1428_v7  ;;  %v7075_v35 = vpop.permute.xlu0 %1673  ;;  %v1533_v14 = vshrl.u32 %v7011_v24, 16 }
 0x268   : > { %v7151_v7 = vsel %vm6299_vm5, 0, %v1531_v13 }
 0x269   : > { %1776 = vrot.lane.b32.xlu1 %v7061_v30, %s6172_s17 }
 0x26a   : > { %1685 = vrot.lane.b32.xlu0 %v6860_v41, %s6168_s14  ;;  %v1515_v41 = vshll.u32 %v6868_v61, 16 }
 0x26b   : > { %v7085_v37 = vpop.permute.xlu0 %1671 }
 0x26c   : > { %v1517_v36 = vor.u32 %v1515_v41, %v1514_v33  ;;  %v1610_v38 = vrot.slane %v1515_v41, 1 }
 0x26d   : > { %1842 = vrot.lane.b32.xlu1 %v1646_v10, %s6178_s8 }
 0x26e   : > { %1904 = vrot.lane.b32.xlu0 %v6862_v49, %s6175_s21  ;;  %v1611_v42 = vor.u32 %v1610_v38, %v1512_v31  ;;  %v1616_v31 = vrot.slane %v1536_v8, 1 }
 0x270   : > { %v1649_v50 = vsel %vm6294_vm4, %v1611_v42, 0  ;;  %v1535_v42 = vrot.slane %v1533_v14, 7 }
 0x271   : > { %1813 = vrot.lane.b32.xlu1 %v6870_v48, %s6174_s22  ;;  %v7089_v48 = vsel %vm6299_vm5, 0, %v1517_v36  ;;  %v1615_v36 = vor.u32 %v1614_v12, %v1526_v57 }
 0x272   : > { %1683 = vrot.lane.b32.xlu0 %v6862_v49, %s6168_s14  ;;  %v1519_v49 = vshrl.u32 %v6953_v63, 16 }
 0x274   : > { %v1521_v54 = vrot.slane %v1519_v49, 7 }
 0x275   : > { %1846 = vrot.lane.b32.xlu1 %v6891_v46, %s6178_s8  ;;  %v1612_v46 = vrot.slane %v1522_v53, 1 }
 0x276   : > { %1778 = vrot.lane.b32.xlu0 %v7032_v18, %s6172_s17  ;;  %v1524_v40 = vor.u32 %v1522_v53, %v1521_v54  ;;  %v1617_v53 = vor.u32 %v1616_v31, %v1533_v14  ;;  %v1543_v14 = vshll.u32 %v7005_v45, 16 }
 0x277   : > { %v1613_v59 = vor.u32 %v1612_v46, %v1519_v49 }
 0x278   : > { %v7127_v22 = vsel %vm6299_vm5, 0, %v1524_v40  ;;  %v7173_v46 = vsel %vm6294_vm4, %v1617_v53, 0  ;;  %v1538_v40 = vor.u32 %v1536_v8, %v1535_v42 }
 0x279   : > { %1878 = vrot.lane.b32.xlu1 %v7089_v48, %s6176_s23  ;;  %v1650_v51 = vsel %vm6294_vm4, %v1613_v59, 0 }
 0x27a   : > { %1844 = vrot.lane.b32.xlu0 %v1647_v20, %s6178_s8 }
 0x27c   : > { %v7097_v39 = vpop.permute.xlu0 %1908 }
 0x27d   : > { %1910 = vrot.lane.b32.xlu1 %v6868_v61, %s6175_s21 }
 0x27e   : > { %1872 = vrot.lane.b32.xlu0 %v7061_v30, %s6176_s23 }
 0x280   : > { %v7105_v28 = vpop.permute.xlu0 %1687 }
 0x281   : > { %1942 = vrot.lane.b32.xlu1 %v1649_v50, %s6177_s29 }
 0x282   : > { %1730 = vrot.lane.b32.xlu0 %v1646_v10, %s6169_s20 }
 0x283   : > { %v7113_v55 = vpop.permute.xlu1 %1940 }
 0x284   : > { %v1767_v58 = vpop.permute.xlu0 %1766 }
 0x285   : > { %1944 = vrot.lane.b32.xlu1 %v1650_v51, %s6177_s29 }
 0x286   : > { %1782 = vrot.lane.b32.xlu0 %v7089_v48, %s6172_s17 }
 0x287   : > { %v7118_v20 = vpop.permute.xlu1 %1780 }
 0x288   : > { %v7120_v56 = vpop.permute.xlu0 %1832 }
 0x289   : > { %1736 = vrot.lane.b32.xlu1 %v1649_v50, %s6169_s20 }
 0x28a   : > { %1815 = vrot.lane.b32.xlu0 %v6868_v61, %s6174_s22 }
 0x28b   : > { %v1867_v60 = vpop.permute.xlu1 %1866 }
 0x28c   : > { %v1719_v43 = vpop.permute.xlu0 %1718 }
 0x28d   : > { %1784 = vrot.lane.b32.xlu1 %v7127_v22, %s6172_s17 }
 0x28e   : > { %1848 = vrot.lane.b32.xlu0 %v1649_v50, %s6178_s8 }
 0x28f   : > { %v7134_v2 = vpop.permute.xlu1 %1930 }
 0x290   : > { %v7136_v1 = vpop.permute.xlu0 %1803 }
 0x291   : > { %1817 = vrot.lane.b32.xlu1 %v6953_v63, %s6174_s22 }
 0x292   : > { %1880 = vrot.lane.b32.xlu0 %v7127_v22, %s6176_s23 }
 0x293   : > { %v7142_v4 = vpop.permute.xlu1 %1724 }
 0x294   : > { %v7144_v44 = vpop.permute.xlu0 %1677 }
 0x295   : > { %1850 = vrot.lane.b32.xlu1 %v1650_v51, %s6178_s8 }
 0x296   : > { %1912 = vrot.lane.b32.xlu0 %v6953_v63, %s6175_s21 }
 0x297   : > { %v1929_v10 = vpop.permute.xlu1 %1928 }
 0x298   : > { %v1897_v26 = vpop.permute.xlu0 %1896 }
 0x299   : > { %1882 = vrot.lane.b32.xlu1 %v7151_v7, %s6176_s23 }
 0x29a   : > { %1689 = vrot.lane.b32.xlu0 %v6868_v61, %s6168_s14  ;;  %v1651_v61 = vsel %vm6294_vm4, %v1615_v36, 0 }
 0x29b   : > { %v1769_v33 = vpop.permute.xlu1 %1768 }
 0x29c   : > { %v7159_v41 = vpop.permute.xlu0 %1675 }
 0x29d   : > { %1914 = vrot.lane.b32.xlu1 %v6944_v3, %s6175_s21 }
 0x29e   : > { %1691 = vrot.lane.b32.xlu0 %v6953_v63, %s6168_s14  ;;  %v1964_v63 = vsel %vm944_vm8, %v6811_v47, %v7075_v35 }
 0x29f   : > { %v1835_v38 = vpop.permute.xlu1 %1834  ;;  %v2009_v54 = vsel %vm1010_vm10, %v1964_v63, %v6876_v52  ;;  %v7205_v52 = vsel %vm6299_vm5, 0, %v1538_v40 }
 0x2a0   : > { %v7165_v49 = vpop.permute.xlu0 %1876  ;;  %v2041_v29 = vsel %vm1076_vm12, %v2009_v54, %v1769_v33  ;;  %v1618_v54 = vrot.slane %v1543_v14, 1 }
 0x2a1   : > { %1946 = vrot.lane.b32.xlu1 %v1651_v61, %s6177_s29 }
 0x2a2   : > { %1738 = vrot.lane.b32.xlu0 %v1650_v51, %s6169_s20  ;;  %v1961_v51 = vsel %vm944_vm8, %v6826_v21, %v7085_v37  ;;  %v2073_v21 = vsel %vm1142_vm14, %v2041_v29, %v7103_v27  ;;  %v1540_v37 = vshrl.u32 %v7005_v45, 16 }
 0x2a3   : > { %v7175_v59 = vpop.permute.xlu1 %1902  ;;  %v2007_v57 = vsel %vm1010_vm10, %v1961_v51, %v1719_v43  ;;  %v2106_v43 = vsel %vm2100_vm0, %v2073_v21, %v1835_v38 }
 0x2a4   : > { %v7177_v50 = vpop.permute.xlu0 %1734  ;;  %v2039_v35 = vsel %vm1076_vm12, %v2007_v57, %v1767_v58  ;;  %v2139_v58 = vsel %vm2133_vm1, %v2106_v43, %v1867_v60  ;;  %v1542_v12 = vrot.slane %v1540_v37, 7 }
 0x2a5   : > { %1948 = vrot.lane.b32.xlu1 %v7173_v46, %s6177_s29  ;;  %v2071_v27 = vsel %vm1142_vm14, %v2039_v35, %v7067_v32  ;;  %v2172_v32 = vsel %vm2166_vm2, %v2139_v58, %v7091_v15  ;;  %v1619_v35 = vor.u32 %v1618_v54, %v1540_v37 }
 0x2a6   : > { %1786 = vrot.lane.b32.xlu0 %v7151_v7, %s6172_s17  ;;  %v2104_v36 = vsel %vm2100_vm0, %v2071_v27, %v7120_v56  ;;  %v1545_v38 = vor.u32 %v1543_v14, %v1542_v12  ;;  %v2205_v56 = vsel %vm2199_vm3, %v2172_v32, %v7134_v2  ;;  %v1547_v2 = vshrl.u32 %v7057_v25, 16 }
 0x2a7   : > { %v7193_v19 = vpop.permute.xlu1 %1805  ;;  %v1653_v58 = vsel %vm6294_vm4, %v1619_v35, 0  ;;  %v1970_v12 = vsel %vm944_vm8, %v6913_v34, %v7144_v44 }
 0x2a8   : > { %v7195_v47 = vpop.permute.xlu0 %1770  ;;  %v7245_v15 = vsel %vm6299_vm5, 0, %v1545_v38  ;;  %v1549_v37 = vrot.slane %v1547_v2, 7 }
 0x2a9   : > { %1740 = vrot.lane.b32.xlu1 %v1651_v61, %s6169_s20 }
 0x2aa   : > { %1819 = vrot.lane.b32.xlu0 %v6944_v3, %s6174_s22 }
 0x2ab   : > { %v7209_v13 = vpop.permute.xlu1 %1870 }
 0x2ac   : > { %v7211_v8 = vpop.permute.xlu0 %1836 }
 0x2ad   : > { %1788 = vrot.lane.b32.xlu1 %v7205_v52, %s6172_s17 }
 0x2ae   : > { %1852 = vrot.lane.b32.xlu0 %v1651_v61, %s6178_s8 }
 0x2af   : > { %v7220_v31 = vpop.permute.xlu1 %1934 }
 0x2b0   : > { %v1865_v33 = vpop.permute.xlu0 %1864 }
 0x2b1   : > { %v2137_v53 = vsel %vm2133_vm1, %v2104_v36, %v1865_v33  ;;  %1821 = vrot.lane.b32.xlu1 %v7011_v24, %s6174_s22  ;;  %v1967_v33 = vsel %vm944_vm8, %v6951_v62, %v7159_v41  ;;  %v1554_v41 = vshrl.u32 %v7055_v23, 16 }
 0x2b2   : > { %v2170_v60 = vsel %vm2166_vm2, %v2137_v53, %v1897_v26  ;;  %1884 = vrot.lane.b32.xlu0 %v7205_v52, %s6176_s23 }
 0x2b3   : > { %v2203_v61 = vsel %vm2199_vm3, %v2170_v60, %v1929_v10  ;;  %v7233_v42 = vpop.permute.xlu1 %1728  ;;  %v1550_v10 = vshll.u32 %v7057_v25, 16 }
 0x2b4   : > { %v1723_v63 = vpop.permute.xlu0 %1722  ;;  %5934 = vmatmul.mubr.msk.bf16.vlgmr.msra.gmra.mrb[16].mxu1 %vm2275_vm6, %v2203_v61 }
 0x2b5   : > { %1854 = vrot.lane.b32.xlu1 %v7173_v46, %s6178_s8  ;;  %5937 = vmatprep.mubr.msk.bf16.mxu1 %vm2275_vm6, %v2205_v56  ;;  %v1620_v40 = vrot.slane %v1550_v10, 1  ;;  %v1552_v36 = vor.u32 %v1550_v10, %v1549_v37  ;;  %v2011_v53 = vsel %vm1010_vm10, %v1967_v33, %v1723_v63  ;;  %v1556_v56 = vrot.slane %v1554_v41, 7 }
 0x2b6   : > { %1916 = vrot.lane.b32.xlu0 %v7011_v24, %s6175_s21  ;;  %v2043_v60 = vsel %vm1076_vm12, %v2011_v53, %v7195_v47  ;;  %v1557_v10 = vshll.u32 %v7055_v23, 16 }
 0x2b7   : > { %v1933_v26 = vpop.permute.xlu1 %1932  ;;  %v1621_v21 = vor.u32 %v1620_v40, %v1547_v2  ;;  %v2075_v47 = vsel %vm1142_vm14, %v2043_v60, %v7136_v1 }
 0x2b8   : > { %v7248_v51 = vpop.permute.xlu0 %1807  ;;  %v2108_v2 = vsel %vm2100_vm0, %v2075_v47, %v7211_v8  ;;  %v1559_v35 = vor.u32 %v1557_v10, %v1556_v56 }
 0x2b9   : > { %1886 = vrot.lane.b32.xlu1 %v7245_v15, %s6176_s23 }
 0x2ba   : > { %1693 = vrot.lane.b32.xlu0 %v6944_v3, %s6168_s14  ;;  %v1654_v3 = vsel %vm6294_vm4, %v1621_v21, 0 }
 0x2bb   : > { %v1773_v57 = vpop.permute.xlu1 %1772 }
 0x2bc   : > { %v7255_v29 = vpop.permute.xlu0 %1681 }
 0x2bd   : > { %1918 = vrot.lane.b32.xlu1 %v7005_v45, %s6175_s21 }
 0x2be   : > { %1695 = vrot.lane.b32.xlu0 %v7011_v24, %s6168_s14 }
 0x2bf   : > { %v1839_v43 = vpop.permute.xlu1 %1838 }
 0x2c0   : > { %v1901_v27 = vpop.permute.xlu0 %1900 }
 0x2c1   : > { %1950 = vrot.lane.b32.xlu1 %v1653_v58, %s6177_s29 }
 0x2c2   : > { %1742 = vrot.lane.b32.xlu0 %v7173_v46, %s6169_s20  ;;  %v2013_v46 = vsel %vm1010_vm10, %v1970_v12, %v7142_v4  ;;  %v7292_v4 = vsel %vm6299_vm5, 0, %v1552_v36  ;;  %v1622_v12 = vrot.slane %v1557_v10, 1 }
 0x2c3   : > { %v7271_v24 = vpop.permute.xlu1 %1906  ;;  %v2045_v34 = vsel %vm1076_vm12, %v2013_v46, %v1773_v57 }
 0x2c4   : > { %v1680_v14 = vpop.permute.xlu0 %1679  ;;  %v2077_v62 = vsel %vm1142_vm14, %v2045_v34, %v7193_v19  ;;  %v1623_v33 = vor.u32 %v1622_v12, %v1554_v41 }
 0x2c5   : > { %1952 = vrot.lane.b32.xlu1 %v1654_v3, %s6177_s29  ;;  %v2110_v38 = vsel %vm2100_vm0, %v2077_v62, %v1839_v43  ;;  %v1973_v62 = vsel %vm944_vm8, %v7009_v17, %v1680_v14 }
 0x2c6   : > { %1790 = vrot.lane.b32.xlu0 %v7245_v15, %s6172_s17  ;;  %v2143_v19 = vsel %vm2133_vm1, %v2110_v38, %v7209_v13  ;;  %v1655_v53 = vsel %vm6294_vm4, %v1623_v33, 0 }
 0x2c7   : > { %v1810_v44 = vpop.permute.xlu1 %1809  ;;  %v2176_v1 = vsel %vm2166_vm2, %v2143_v19, %v7175_v59  ;;  %v1591_v59 = vsel %vm6299_vm5, 0, %v1559_v35 }
 0x2c8   : > { %v1775_v32 = vpop.permute.xlu0 %1774  ;;  %v2209_v8 = vsel %vm2199_vm3, %v2176_v1, %v7220_v31 }
 0x2c9   : > { %1744 = vrot.lane.b32.xlu1 %v1653_v58, %s6169_s20 }
 0x2ca   : > { %1823 = vrot.lane.b32.xlu0 %v7005_v45, %s6174_s22 }
 0x2cb   : > { %v1875_v61 = vpop.permute.xlu1 %1874 }
 0x2cc   : > { %v1841_v63 = vpop.permute.xlu0 %1840 }
 0x2cd   : > { %1792 = vrot.lane.b32.xlu1 %v7292_v4, %s6172_s17 }
 0x2ce   : > { %1856 = vrot.lane.b32.xlu0 %v1653_v58, %s6178_s8 }
 0x2cf   : > { %v7304_v54 = vpop.permute.xlu1 %1938 }
 0x2d0   : > { %v1869_v40 = vpop.permute.xlu0 %1868 }
 0x2d1   : > { %v2141_v57 = vsel %vm2133_vm1, %v2108_v2, %v1869_v40  ;;  %1825 = vrot.lane.b32.xlu1 %v7057_v25, %s6174_s22 }
 0x2d2   : > { %v2174_v13 = vsel %vm2166_vm2, %v2141_v57, %v1901_v27  ;;  %1888 = vrot.lane.b32.xlu0 %v7292_v4, %s6176_s23 }
 0x2d3   : > { %v1733_v21 = vpop.permute.xlu1 %1732  ;;  %v2207_v43 = vsel %vm2199_vm3, %v2174_v13, %v1933_v26 }
 0x2d4   : > { %v1727_v58 = vpop.permute.xlu0 %1726  ;;  %5938 = vmatmul.mubr.msk.bf16.gmra.mrb[20].mxu1 %vm2275_vm6, %v2207_v43 }
 0x2d5   : > { %1858 = vrot.lane.b32.xlu1 %v1654_v3, %s6178_s8  ;;  %5941 = vmatprep.mubr.msk.bf16.mxu1 %vm2275_vm6, %v2209_v8  ;;  %v2015_v41 = vsel %vm1010_vm10, %v1973_v62, %v1727_v58 }
 0x2d6   : > { %1920 = vrot.lane.b32.xlu0 %v7057_v25, %s6175_s21  ;;  %v2047_v19 = vsel %vm1076_vm12, %v2015_v41, %v1775_v32 }
 0x2d7   : > { %v1937_v27 = vpop.permute.xlu1 %1936 }
 0x2d8   : > { %v1812_v37 = vpop.permute.xlu0 %1811 }
 0x2d9   : > { %1890 = vrot.lane.b32.xlu1 %v1591_v59, %s6176_s23 }
 0x2da   : > { %1697 = vrot.lane.b32.xlu0 %v7005_v45, %s6168_s14  ;;  %v1976_v45 = vsel %vm944_vm8, %v6982_v6, %v7255_v29 }
 0x2db   : > { %v1777_v26 = vpop.permute.xlu1 %1776 }
 0x2dc   : > { %v1686_v31 = vpop.permute.xlu0 %1685 }
 0x2dd   : > { %1922 = vrot.lane.b32.xlu1 %v7055_v23, %s6175_s21 }
 0x2de   : > { %1699 = vrot.lane.b32.xlu0 %v7057_v25, %s6168_s14  ;;  %v2017_v25 = vsel %vm1010_vm10, %v1976_v45, %v7233_v42  ;;  %v2079_v42 = vsel %vm1142_vm14, %v2047_v19, %v7248_v51 }
 0x2df   : > { %v1843_v46 = vpop.permute.xlu1 %1842  ;;  %v2049_v38 = vsel %vm1076_vm12, %v2017_v25, %v1777_v26  ;;  %v2112_v2 = vsel %vm2100_vm0, %v2079_v42, %v1841_v63 }
 0x2e0   : > { %v1905_v36 = vpop.permute.xlu0 %1904  ;;  %v2081_v6 = vsel %vm1142_vm14, %v2049_v38, %v1810_v44  ;;  %v1982_v44 = vsel %vm944_vm8, %v7032_v18, %v1686_v31 }
 0x2e1   : > { %1954 = vrot.lane.b32.xlu1 %v1655_v53, %s6177_s29  ;;  %v2114_v17 = vsel %vm2100_vm0, %v2081_v6, %v1843_v46  ;;  %v2021_v1 = vsel %vm1010_vm10, %v1982_v44, %v1733_v21 }
 0x2e2   : > { %1746 = vrot.lane.b32.xlu0 %v1654_v3, %s6169_s20  ;;  %v2147_v56 = vsel %vm2133_vm1, %v2114_v17, %v1875_v61  ;;  %v2053_v21 = vsel %vm1076_vm12, %v2021_v1, %v7118_v20 }
 0x2e3   : > { %v1814_v34 = vpop.permute.xlu1 %1813  ;;  %v2180_v40 = vsel %vm2166_vm2, %v2147_v56, %v7271_v24 }
 0x2e4   : > { %v1684_v60 = vpop.permute.xlu0 %1683  ;;  %v2213_v18 = vsel %vm2199_vm3, %v2180_v40, %v7304_v54  ;;  %v2085_v58 = vsel %vm1142_vm14, %v2053_v21, %v1814_v34 }
 0x2e5   : > { %v1979_v63 = vsel %vm944_vm8, %v7061_v30, %v1684_v60 }
 0x2e6   : > { %1794 = vrot.lane.b32.xlu0 %v1591_v59, %s6172_s17 }
 0x2e7   : > { %v1847_v47 = vpop.permute.xlu1 %1846 }
 0x2e8   : > { %v1779_v3 = vpop.permute.xlu0 %1778  ;;  %v2118_v59 = vsel %vm2100_vm0, %v2085_v58, %v1847_v47 }
 0x2ea   : > { %1827 = vrot.lane.b32.xlu0 %v7055_v23, %s6174_s22 }
 0x2eb   : > { %v1879_v29 = vpop.permute.xlu1 %1878 }
 0x2ec   : > { %v1845_v14 = vpop.permute.xlu0 %1844  ;;  %v2151_v12 = vsel %vm2133_vm1, %v2118_v59, %v1879_v29 }
 0x2ee   : > { %1860 = vrot.lane.b32.xlu0 %v1655_v53, %s6178_s8 }
 0x2ef   : > { %v1911_v10 = vpop.permute.xlu1 %1910 }
 0x2f0   : > { %v1873_v32 = vpop.permute.xlu0 %1872 }
 0x2f1   : > { %v2145_v23 = vsel %vm2133_vm1, %v2112_v2, %v1873_v32 }
 0x2f2   : > { %v2178_v57 = vsel %vm2166_vm2, %v2145_v23, %v1905_v36  ;;  %1892 = vrot.lane.b32.xlu0 %v6166_v0, %s6176_s23 }
 0x2f3   : > { %v1943_v51 = vpop.permute.xlu1 %1942  ;;  %v2211_v61 = vsel %vm2199_vm3, %v2178_v57, %v1937_v27 }
 0x2f4   : > { %v1731_v13 = vpop.permute.xlu0 %1730  ;;  %5942 = vmatmul.mubr.msk.bf16.gmra.mrb[24].mxu1 %vm2275_vm6, %v2211_v61 }
 0x2f5   : > { %v2019_v24 = vsel %vm1010_vm10, %v1979_v63, %v1731_v13  ;;  %5945 = vmatprep.mubr.msk.bf16.mxu1 %vm2275_vm6, %v2213_v18 }
 0x2f6   : > { %v2051_v35 = vsel %vm1076_vm12, %v2019_v24, %v1779_v3  ;;  %1924 = vrot.lane.b32.xlu0 %v6166_v0, %s6175_s21 }
 0x2f7   : > { %v2083_v30 = vsel %vm1142_vm14, %v2051_v35, %v1812_v37  ;;  %v1945_v43 = vpop.permute.xlu1 %1944  ;;  %v2184_v37 = vsel %vm2166_vm2, %v2151_v12, %v1911_v10 }
 0x2f8   : > { %v2116_v8 = vsel %vm2100_vm0, %v2083_v30, %v1845_v14  ;;  %v1783_v54 = vpop.permute.xlu0 %1782  ;;  %v2217_v33 = vsel %vm2199_vm3, %v2184_v37, %v1943_v51 }
 0x2f9   : > { %v2149_v27 = vsel %vm2133_vm1, %v2116_v8, %v7165_v49 }
 0x2fa   : > { %1956 = vrot.lane.b32.xlu0 %v6166_v0, %s6177_s29  ;;  %v2182_v20 = vsel %vm2166_vm2, %v2149_v27, %v7097_v39  ;;  %v1985_v0 = vsel %vm944_vm8, %v6901_v16, %v7105_v28 }
 0x2fb   : > { %v1737_v26 = vpop.permute.xlu1 %1736  ;;  %v2215_v31 = vsel %vm2199_vm3, %v2182_v20, %v7113_v55  ;;  %v2023_v53 = vsel %vm1010_vm10, %v1985_v0, %v7177_v50 }
 0x2fc   : > { %v1816_v46 = vpop.permute.xlu0 %1815  ;;  %5946 = vmatmul.mubr.msk.bf16.gmra.mrb[28].mxu1 %vm2275_vm6, %v2215_v31  ;;  %v2055_v55 = vsel %vm1076_vm12, %v2023_v53, %v1783_v54 }
 0x2fd   : > { %5949 = vmatprep.mubr.msk.bf16.mxu1 %vm2275_vm6, %v2217_v33  ;;  %v2087_v34 = vsel %vm1142_vm14, %v2055_v55, %v1816_v46 }
 0x2ff   : > { %v1785_v49 = vpop.permute.xlu1 %1784 }
 0x300   : > { %v1849_v36 = vpop.permute.xlu0 %1848 }
 0x301   : > { %v2120_v60 = vsel %vm2100_vm0, %v2087_v34, %v1849_v36 }
 0x303   : > { %v1818_v39 = vpop.permute.xlu1 %1817 }
 0x304   : > { %v1881_v45 = vpop.permute.xlu0 %1880 }
 0x305   : > { %v2153_v25 = vsel %vm2133_vm1, %v2120_v60, %v1881_v45 }
 0x307   : > { %v1851_v62 = vpop.permute.xlu1 %1850 }
 0x308   : > { %v1913_v41 = vpop.permute.xlu0 %1912 }
 0x309   : > { %v2186_v38 = vsel %vm2166_vm2, %v2153_v25, %v1913_v41 }
 0x30a   : > { %v2219_v47 = vsel %vm2199_vm3, %v2186_v38, %v1945_v43 }
 0x30b   : > { %v1883_v16 = vpop.permute.xlu1 %1882  ;;  %5950 = vmatmul.mubr.msk.bf16.gmra.mrb[32].mxu1 %vm2275_vm6, %v2219_v47 }
 0x30c   : > { %v1690_v28 = vpop.permute.xlu0 %1689 }
 0x30d   : > { %v1988_v50 = vsel %vm944_vm8, %v7089_v48, %v1690_v28 }
 0x30e   : > { %v2025_v3 = vsel %vm1010_vm10, %v1988_v50, %v1737_v26 }
 0x30f   : > { %v2057_v19 = vsel %vm1076_vm12, %v2025_v3, %v1785_v49  ;;  %v1915_v6 = vpop.permute.xlu1 %1914 }
 0x310   : > { %v2089_v17 = vsel %vm1142_vm14, %v2057_v19, %v1818_v39  ;;  %v1692_v29 = vpop.permute.xlu0 %1691 }
 0x311   : > { %v2122_v14 = vsel %vm2100_vm0, %v2089_v17, %v1851_v62  ;;  %v1991_v61 = vsel %vm944_vm8, %v7127_v22, %v1692_v29 }
 0x312   : > { %v2155_v42 = vsel %vm2133_vm1, %v2122_v14, %v1883_v16 }
 0x313   : > { %v2188_v56 = vsel %vm2166_vm2, %v2155_v42, %v1915_v6  ;;  %v1947_v10 = vpop.permute.xlu1 %1946 }
 0x314   : > { %v2221_v2 = vsel %vm2199_vm3, %v2188_v56, %v1947_v10  ;;  %v1739_v32 = vpop.permute.xlu0 %1738 }
 0x315   : > { %5953 = vmatprep.mubr.msk.bf16.mxu1 %vm2275_vm6, %v2221_v2  ;;  %v2027_v63 = vsel %vm1010_vm10, %v1991_v61, %v1739_v32 }
 0x317   : > { %v1949_v48 = vpop.permute.xlu1 %1948 }
 0x318   : > { %v1787_v44 = vpop.permute.xlu0 %1786 }
 0x319   : > { %v2059_v18 = vsel %vm1076_vm12, %v2027_v63, %v1787_v44 }
 0x31b   : > { %v1741_v23 = vpop.permute.xlu1 %1740 }
 0x31c   : > { %v1820_v40 = vpop.permute.xlu0 %1819 }
 0x31d   : > { %v2091_v24 = vsel %vm1142_vm14, %v2059_v18, %v1820_v40 }
 0x31f   : > { %v1789_v57 = vpop.permute.xlu1 %1788 }
 0x320   : > { %v1853_v51 = vpop.permute.xlu0 %1852 }
 0x321   : > { %v2124_v35 = vsel %vm2100_vm0, %v2091_v24, %v1853_v51 }
 0x323   : > { %v1822_v1 = vpop.permute.xlu1 %1821 }
 0x324   : > { %v1885_v13 = vpop.permute.xlu0 %1884 }
 0x325   : > { %v2157_v30 = vsel %vm2133_vm1, %v2124_v35, %v1885_v13 }
 0x327   : > { %v1855_v21 = vpop.permute.xlu1 %1854 }
 0x328   : > { %v1917_v43 = vpop.permute.xlu0 %1916 }
 0x329   : > { %v2190_v58 = vsel %vm2166_vm2, %v2157_v30, %v1917_v43 }
 0x32a   : > { %v2223_v8 = vsel %vm2199_vm3, %v2190_v58, %v1949_v48 }
 0x32b   : > { %v1887_v54 = vpop.permute.xlu1 %1886  ;;  %5954 = vmatmul.mubr.msk.bf16.gmra.mrb[36].mxu1 %vm2275_vm6, %v2223_v8  ;;  %v7480_v8 = vld [vmem:[%s8958_s4] ss:$0 sm:$0xff] }
 0x32c   : > { %v1694_v22 = vpop.permute.xlu0 %1693 }
 0x32d   : > { %v1994_v59 = vsel %vm944_vm8, %v7151_v7, %v1694_v22 }
 0x32e   : > { %v2029_v27 = vsel %vm1010_vm10, %v1994_v59, %v1741_v23 }
 0x32f   : > { %v2061_v12 = vsel %vm1076_vm12, %v2029_v27, %v1789_v57  ;;  %v1919_v20 = vpop.permute.xlu1 %1918 }
 0x330   : > { %v2093_v37 = vsel %vm1142_vm14, %v2061_v12, %v1822_v1  ;;  %v1696_v26 = vpop.permute.xlu0 %1695 }
 0x331   : > { %v2126_v31 = vsel %vm2100_vm0, %v2093_v37, %v1855_v21  ;;  %v1997_v60 = vsel %vm944_vm8, %v7205_v52, %v1696_v26 }
 0x332   : > { %v2159_v33 = vsel %vm2133_vm1, %v2126_v31, %v1887_v54 }
 0x333   : > { %v2192_v46 = vsel %vm2166_vm2, %v2159_v33, %v1919_v20  ;;  %v1951_v49 = vpop.permute.xlu1 %1950 }
 0x334   : > { %v2225_v36 = vsel %vm2199_vm3, %v2192_v46, %v1951_v49  ;;  %v1743_v0 = vpop.permute.xlu0 %1742 }
 0x335   : > { %5957 = vmatprep.mubr.msk.bf16.mxu1 %vm2275_vm6, %v2225_v36  ;;  %v2031_v25 = vsel %vm1010_vm10, %v1997_v60, %v1743_v0 }
 0x337   : > { %v1953_v7 = vpop.permute.xlu1 %1952 }
 0x338   : > { %v1791_v39 = vpop.permute.xlu0 %1790 }
 0x339   : > { %v2063_v38 = vsel %vm1076_vm12, %v2031_v25, %v1791_v39 }
 0x33b   : > { %v1745_v53 = vpop.permute.xlu1 %1744 }
 0x33c   : > { %v1824_v45 = vpop.permute.xlu0 %1823 }
 0x33d   : > { %v2095_v47 = vsel %vm1142_vm14, %v2063_v38, %v1824_v45 }
 0x33f   : > { %v1793_v55 = vpop.permute.xlu1 %1792 }
 0x340   : > { %v1857_v34 = vpop.permute.xlu0 %1856 }
 0x341   : > { %v2128_v16 = vsel %vm2100_vm0, %v2095_v47, %v1857_v34 }
 0x343   : > { %v1826_v62 = vpop.permute.xlu1 %1825 }
 0x344   : > { %v1889_v41 = vpop.permute.xlu0 %1888 }
 0x345   : > { %v2161_v50 = vsel %vm2133_vm1, %v2128_v16, %v1889_v41 }
 0x347   : > { %v1859_v28 = vpop.permute.xlu1 %1858 }
 0x348   : > { %v1921_v3 = vpop.permute.xlu0 %1920 }
 0x349   : > { %v2194_v19 = vsel %vm2166_vm2, %v2161_v50, %v1921_v3 }
 0x34a   : > { %v2227_v6 = vsel %vm2199_vm3, %v2194_v19, %v1953_v7 }
 0x34b   : > { %v1891_v17 = vpop.permute.xlu1 %1890  ;;  %5958 = vmatmul.mubr.msk.bf16.gmra.mrb[40].mxu1 %vm2275_vm6, %v2227_v6 }
 0x34c   : > { %v1698_v52 = vpop.permute.xlu0 %1697 }
 0x34d   : > { %v2000_v29 = vsel %vm944_vm8, %v7245_v15, %v1698_v52  ;;  %v6095_v52 = vld [vmem:[%s8959_s5] sm:$0xff]  }
 0x34e   : > { %v2033_v14 = vsel %vm1010_vm10, %v2000_v29, %v1745_v53  ;;  %5965 = vmatprep.subr.bf16.mxu0 %v6095_v52 }
 0x34f   : > { %v2065_v42 = vsel %vm1076_vm12, %v2033_v14, %v1793_v55  ;;  %v1923_v56 = vpop.permute.xlu1 %1922  ;;  %5966 = vmatpush3.bf16.msra.mxu0 %v6095_v52 }
 0x350   : > { %v2097_v10 = vsel %vm1142_vm14, %v2065_v42, %v1826_v62  ;;  %v1700_v2 = vpop.permute.xlu0 %1699 }
 0x351   : > { %v2130_v32 = vsel %vm2100_vm0, %v2097_v10, %v1859_v28  ;;  %v2003_v63 = vsel %vm944_vm8, %v7292_v4, %v1700_v2 }
 0x352   : > { %v2163_v48 = vsel %vm2133_vm1, %v2130_v32, %v1891_v17 }
 0x353   : > { %v2196_v44 = vsel %vm2166_vm2, %v2163_v48, %v1923_v56  ;;  %v1955_v23 = vpop.permute.xlu1 %1954  ;;  %v6096_v48 = vld [vmem:[%s8959_s5 + $0x8] sm:$0xff]  }
 0x354   : > { %v2229_v40 = vsel %vm2199_vm3, %v2196_v44, %v1955_v23  ;;  %v1747_v57 = vpop.permute.xlu0 %1746  ;;  %5967 = vmatprep.subr.bf16.mxu0 %v6096_v48 }
 0x355   : > { %5961 = vmatprep.mubr.msk.bf16.mxu1 %vm2275_vm6, %v2229_v40  ;;  %v2035_v13 = vsel %vm1010_vm10, %v2003_v63, %v1747_v57  ;;  %5968 = vmatpush3.bf16.msra.mxu0 %v6096_v48 }
 0x358   : > { %v1795_v15 = vpop.permute.xlu0 %1794 }
 0x359   : > { %v2067_v18 = vsel %vm1076_vm12, %v2035_v13, %v1795_v15 }
 0x35c   : > { %v1828_v51 = vpop.permute.xlu0 %1827 }
 0x35d   : > { %v2099_v35 = vsel %vm1142_vm14, %v2067_v18, %v1828_v51 }
 0x360   : > { %v1861_v61 = vpop.permute.xlu0 %1860 }
 0x361   : > { %v2132_v21 = vsel %vm2100_vm0, %v2099_v35, %v1861_v61  ;;  %v6097_v61 = vld [vmem:[%s8959_s5 + $0x10] sm:$0xff]   ;;  %v6098_v35 = vld [vmem:[%s8959_s5 + $0x18] sm:$0xff]  }
 0x362   : > { %5969 = vmatprep.subr.bf16.mxu0 %v6097_v61 }
 0x363   : > { %5970 = vmatpush3.bf16.msra.mxu0 %v6097_v61 }
 0x364   : > { %v7458_v1 = vpop.permute.xlu0 %1892  ;;  %5971 = vmatprep.subr.bf16.mxu0 %v6098_v35 }
 0x365   : > { %v2165_v30 = vsel %vm2133_vm1, %v2132_v21, %v7458_v1 }
 0x367   : > { %5972 = vmatpush3.bf16.msra.mxu0 %v6098_v35 }
 0x368   : > { %v7464_v24 = vpop.permute.xlu0 %1924 }
 0x369   : > { %v2198_v43 = vsel %vm2166_vm2, %v2165_v30, %v7464_v24 }
 0x36c   : > { %v7472_v58 = vpop.permute.xlu0 %1956 }
 0x36d   : > { %v2231_v4 = vsel %vm2199_vm3, %v2198_v43, %v7472_v58 }
 0x36e   : > { %5962 = vmatmul.mubr.msk.bf16.gmra.mrb[44].mxu1 %vm2275_vm6, %v2231_v4  ;;  %v6099_v4 = vld [vmem:[%s8959_s5 + $0x20] ss:$0 sps:$4 sm:$0xff]  }
 0x36f   : > { %6016 = vmatprep.subr.msk.bf16.mxu0 %vm2308_vm7, %v6099_v4 }
 0x387   : > { %v5935_v54 = vpop.f32.mrb[16].mxu1 }
 0x388   : > { %v2355_v22 = vadd.f32 %v5935_v54, %v7480_v8  ;;  %v2346_v59 = vpop.f32.mrb[17].mxu1 }
 0x389   : > { %v2347_v27 = vadd.f32 %v7480_v8, %v2346_v59  ;;  %v5936_v12 = vpop.f32.mrb[18].mxu1 }
 0x38a   : > { %v2358_v20 = vadd.f32 %v5936_v12, %v7480_v8  ;;  %v2349_v37 = vpop.f32.mrb[19].mxu1  ;;  %v2475_v31 = vmax.f32 %v2355_v22, 0.0 }
 0x38b   : > { %v2350_v26 = vadd.f32 %v7480_v8, %v2349_v37  ;;  %v2473_v46 = vmax.f32 %v2347_v27, 0.0  ;;  %v3363_v27 = vsel %vm2308_vm7, %v6099_v4, 0  ;;  %vm5427_vm7 = vcmask 1047559  }
 0x38c   : > { %v2476_v33 = vmax.f32 %v2358_v20, 0.0  ;;  %5974 = vmatpush3.bf16.msra.mxu0 %v3363_v27 }
 0x38d   : > { %v2474_v49 = vmax.f32 %v2350_v26, 0.0 }
 0x38e   : > { %v2506_v36 = vpack.c.bf16 %v2476_v33, %v2475_v31 }
 0x38f   : > { %v2505_v0 = vpack.c.bf16 %v2474_v49, %v2473_v46 }
 0x390   : > { %2963 = vrot.lane.b32.xlu1 %v2506_v36, %s6175_s21  ;;  %2870 = vrot.lane.b32.xlu0 %v2506_v36, %s6174_s22  ;;  %v2529_v7 = vshrl.u32 %v2506_v36, 16  ;;  %v2532_v39 = vshll.u32 %v2506_v36, 16 }
 0x391   : > { %v2525_v55 = vshll.u32 %v2505_v0, 16  ;;  %v2522_v41 = vshrl.u32 %v2505_v0, 16 }
 0x392   : > { %v2531_v53 = vrot.slane %v2529_v7, 7  ;;  %v2667_v45 = vrot.slane %v2532_v39, 1 }
 0x393   : > { %v2665_v25 = vrot.slane %v2525_v55, 1  ;;  %v2524_v28 = vrot.slane %v2522_v41, 7 }
 0x394   : > { %2746 = vrot.lane.b32.xlu0 %v2506_v36, %s6168_s14  ;;  %2744 = vrot.lane.b32.xlu1 %v2505_v0, %s6168_s14  ;;  %v2534_v34 = vor.u32 %v2532_v39, %v2531_v53  ;;  %v2668_v62 = vor.u32 %v2667_v45, %v2529_v7 }
 0x395   : > { %v2666_v47 = vor.u32 %v2665_v25, %v2522_v41  ;;  %v2527_v50 = vor.u32 %v2525_v55, %v2524_v28 }
 0x396   : > { %v7492_v60 = vsel %vm6299_vm5, 0, %v2534_v34  ;;  %v2714_v38 = vsel %vm6294_vm4, %v2668_v62, 0 }
 0x397   : > { %v2713_v16 = vsel %vm6294_vm4, %v2666_v47, 0  ;;  %v7509_v19 = vsel %vm6299_vm5, 0, %v2527_v50 }
 0x398   : > { %2837 = vrot.lane.b32.xlu0 %v7492_v60, %s6172_s17  ;;  %2868 = vrot.lane.b32.xlu1 %v2505_v0, %s6174_s22 }
 0x39c   : > { %2903 = vrot.lane.b32.xlu0 %v2714_v38, %s6178_s8  ;;  %2933 = vrot.lane.b32.xlu1 %v7492_v60, %s6176_s23 }
 0x3a0   : > { %2993 = vrot.lane.b32.xlu1 %v2714_v38, %s6177_s29  ;;  %2789 = vrot.lane.b32.xlu0 %v2713_v16, %s6169_s20 }
 0x3a4   : > { %2791 = vrot.lane.b32.xlu1 %v2714_v38, %s6169_s20 }
 0x3a7   : > { %v5939_v3 = vpop.f32.mrb[20].mxu1 }
 0x3a8   : > { %v2371_v6 = vadd.f32 %v5939_v3, %v7480_v8  ;;  %v2362_v17 = vpop.f32.mrb[21].mxu1  ;;  %2835 = vrot.lane.b32.xlu1 %v7509_v19, %s6172_s17 }
 0x3a9   : > { %v2363_v29 = vadd.f32 %v7480_v8, %v2362_v17  ;;  %v5940_v14 = vpop.f32.mrb[22].mxu1 }
 0x3aa   : > { %v2374_v42 = vadd.f32 %v5940_v14, %v7480_v8  ;;  %v2365_v56 = vpop.f32.mrb[23].mxu1  ;;  %v2479_v2 = vmax.f32 %v2371_v6, 0.0 }
 0x3ab   : > { %v2366_v10 = vadd.f32 %v7480_v8, %v2365_v56  ;;  %v2477_v44 = vmax.f32 %v2363_v29, 0.0 }
 0x3ac   : > { %v2480_v32 = vmax.f32 %v2374_v42, 0.0  ;;  %2901 = vrot.lane.b32.xlu1 %v2713_v16, %s6178_s8 }
 0x3ad   : > { %v2478_v23 = vmax.f32 %v2366_v10, 0.0 }
 0x3ae   : > { %v2508_v40 = vpack.c.bf16 %v2480_v32, %v2479_v2 }
 0x3af   : > { %v2507_v57 = vpack.c.bf16 %v2478_v23, %v2477_v44 }
 0x3b0   : > { %2874 = vrot.lane.b32.xlu0 %v2508_v40, %s6174_s22  ;;  %2967 = vrot.lane.b32.xlu1 %v2508_v40, %s6175_s21  ;;  %v2543_v15 = vshrl.u32 %v2508_v40, 16  ;;  %v2546_v51 = vshll.u32 %v2508_v40, 16 }
 0x3b1   : > { %v2539_v43 = vshll.u32 %v2507_v57, 16  ;;  %v2536_v22 = vshrl.u32 %v2507_v57, 16 }
 0x3b2   : > { %v2545_v63 = vrot.slane %v2543_v15, 7  ;;  %v2671_v13 = vrot.slane %v2546_v51, 1 }
 0x3b3   : > { %v2669_v59 = vrot.slane %v2539_v43, 1  ;;  %v2538_v20 = vrot.slane %v2536_v22, 7 }
 0x3b4   : > { %2750 = vrot.lane.b32.xlu0 %v2508_v40, %s6168_s14  ;;  %2872 = vrot.lane.b32.xlu1 %v2507_v57, %s6174_s22  ;;  %v2548_v18 = vor.u32 %v2546_v51, %v2545_v63  ;;  %v2672_v30 = vor.u32 %v2671_v13, %v2543_v15 }
 0x3b5   : > { %v2670_v12 = vor.u32 %v2669_v59, %v2536_v22  ;;  %v2541_v26 = vor.u32 %v2539_v43, %v2538_v20 }
 0x3b6   : > { %v7536_v21 = vsel %vm6299_vm5, 0, %v2548_v18  ;;  %v2716_v54 = vsel %vm6294_vm4, %v2672_v30, 0 }
 0x3b7   : > { %v2715_v37 = vsel %vm6294_vm4, %v2670_v12, 0  ;;  %v7559_v33 = vsel %vm6299_vm5, 0, %v2541_v26 }
 0x3b8   : > { %2965 = vrot.lane.b32.xlu0 %v2507_v57, %s6175_s21  ;;  %2937 = vrot.lane.b32.xlu1 %v7536_v21, %s6176_s23 }
 0x3bc   : > { %2748 = vrot.lane.b32.xlu0 %v2507_v57, %s6168_s14  ;;  %2997 = vrot.lane.b32.xlu1 %v2716_v54, %s6177_s29 }
 0x3c0   : > { %2841 = vrot.lane.b32.xlu0 %v7536_v21, %s6172_s17  ;;  %2795 = vrot.lane.b32.xlu1 %v2716_v54, %s6169_s20 }
 0x3c4   : > { %2907 = vrot.lane.b32.xlu0 %v2716_v54, %s6178_s8  ;;  %2995 = vrot.lane.b32.xlu1 %v2715_v37, %s6177_s29 }
 0x3c7   : > { %v5943_v31 = vpop.f32.mrb[24].mxu1 }
 0x3c8   : > { %v2387_v46 = vadd.f32 %v5943_v31, %v7480_v8  ;;  %v2378_v49 = vpop.f32.mrb[25].mxu1  ;;  %2935 = vrot.lane.b32.xlu0 %v7559_v33, %s6176_s23  ;;  %2839 = vrot.lane.b32.xlu1 %v7559_v33, %s6172_s17 }
 0x3c9   : > { %v2379_v36 = vadd.f32 %v7480_v8, %v2378_v49  ;;  %v5944_v0 = vpop.f32.mrb[26].mxu1 }
 0x3ca   : > { %v2390_v7 = vadd.f32 %v5944_v0, %v7480_v8  ;;  %v2381_v39 = vpop.f32.mrb[27].mxu1  ;;  %v2483_v45 = vmax.f32 %v2387_v46, 0.0 }
 0x3cb   : > { %v2382_v53 = vadd.f32 %v7480_v8, %v2381_v39  ;;  %v2481_v34 = vmax.f32 %v2379_v36, 0.0 }
 0x3cc   : > { %v2484_v55 = vmax.f32 %v2390_v7, 0.0  ;;  %2793 = vrot.lane.b32.xlu0 %v2715_v37, %s6169_s20  ;;  %2905 = vrot.lane.b32.xlu1 %v2715_v37, %s6178_s8 }
 0x3cd   : > { %v2482_v62 = vmax.f32 %v2382_v53, 0.0 }
 0x3ce   : > { %v2510_v25 = vpack.c.bf16 %v2484_v55, %v2483_v45 }
 0x3cf   : > { %v2509_v41 = vpack.c.bf16 %v2482_v62, %v2481_v34  ;;  %v5947_v38 = vpop.f32.mrb[28].mxu1 }
 0x3d0   : > { %v2403_v47 = vadd.f32 %v5947_v38, %v7480_v8  ;;  %v2394_v16 = vpop.f32.mrb[29].mxu1  ;;  %2878 = vrot.lane.b32.xlu0 %v2510_v25, %s6174_s22  ;;  %2971 = vrot.lane.b32.xlu1 %v2510_v25, %s6175_s21  ;;  %v2557_v28 = vshrl.u32 %v2510_v25, 16  ;;  %v2560_v50 = vshll.u32 %v2510_v25, 16 }
 0x3d1   : > { %v2395_v3 = vadd.f32 %v7480_v8, %v2394_v16  ;;  %v5948_v6 = vpop.f32.mrb[30].mxu1  ;;  %v2553_v15 = vshll.u32 %v2509_v41, 16  ;;  %v2550_v61 = vshrl.u32 %v2509_v41, 16 }
 0x3d2   : > { %v2406_v17 = vadd.f32 %v5948_v6, %v7480_v8  ;;  %v2397_v52 = vpop.f32.mrb[31].mxu1  ;;  %v2559_v29 = vrot.slane %v2557_v28, 7  ;;  %v2675_v42 = vrot.slane %v2560_v50, 1  ;;  %v2487_v56 = vmax.f32 %v2403_v47, 0.0 }
 0x3d3   : > { %v2398_v14 = vadd.f32 %v7480_v8, %v2397_v52  ;;  %v2485_v32 = vmax.f32 %v2395_v3, 0.0  ;;  %v2673_v63 = vrot.slane %v2553_v15, 1  ;;  %v2552_v43 = vrot.slane %v2550_v61, 7 }
 0x3d4   : > { %v2488_v10 = vmax.f32 %v2406_v17, 0.0  ;;  %2754 = vrot.lane.b32.xlu0 %v2510_v25, %s6168_s14  ;;  %2876 = vrot.lane.b32.xlu1 %v2509_v41, %s6174_s22  ;;  %v2562_v2 = vor.u32 %v2560_v50, %v2559_v29  ;;  %v2676_v57 = vor.u32 %v2675_v42, %v2557_v28 }
 0x3d5   : > { %v2486_v48 = vmax.f32 %v2398_v14, 0.0  ;;  %v2674_v30 = vor.u32 %v2673_v63, %v2550_v61  ;;  %v2555_v26 = vor.u32 %v2553_v15, %v2552_v43 }
 0x3d6   : > { %v2512_v44 = vpack.c.bf16 %v2488_v10, %v2487_v56  ;;  %v7581_v23 = vsel %vm6299_vm5, 0, %v2562_v2  ;;  %v2718_v51 = vsel %vm6294_vm4, %v2676_v57, 0 }
 0x3d7   : > { %v7583_v40 = vpack.c.bf16 %v2486_v48, %v2485_v32  ;;  %v2717_v37 = vsel %vm6294_vm4, %v2674_v30, 0  ;;  %v7609_v0 = vsel %vm6299_vm5, 0, %v2555_v26 }
 0x3d8   : > { %2969 = vrot.lane.b32.xlu0 %v2509_v41, %s6175_s21  ;;  %2941 = vrot.lane.b32.xlu1 %v7581_v23, %s6176_s23  ;;  %v2571_v7 = vshrl.u32 %v2512_v44, 16  ;;  %v2574_v53 = vshll.u32 %v2512_v44, 16 }
 0x3d9   : > { %v2567_v25 = vshll.u32 %v7583_v40, 16  ;;  %v2564_v38 = vshrl.u32 %v7583_v40, 16 }
 0x3da   : > { %v2573_v39 = vrot.slane %v2571_v7, 7  ;;  %v2679_v55 = vrot.slane %v2574_v53, 1 }
 0x3db   : > { %v2677_v47 = vrot.slane %v2567_v25, 1  ;;  %v2566_v6 = vrot.slane %v2564_v38, 7 }
 0x3dc   : > { %2752 = vrot.lane.b32.xlu0 %v2509_v41, %s6168_s14  ;;  %3001 = vrot.lane.b32.xlu1 %v2718_v51, %s6177_s29  ;;  %v2576_v45 = vor.u32 %v2574_v53, %v2573_v39  ;;  %v2680_v62 = vor.u32 %v2679_v55, %v2571_v7 }
 0x3dd   : > { %v2678_v3 = vor.u32 %v2677_v47, %v2564_v38  ;;  %v2569_v48 = vor.u32 %v2567_v25, %v2566_v6 }
 0x3de   : > { %v5951_v13 = vpop.f32.mrb[32].mxu1  ;;  %v7624_v34 = vsel %vm6299_vm5, 0, %v2576_v45  ;;  %v2720_v41 = vsel %vm6294_vm4, %v2680_v62, 0 }
 0x3df   : > { %v2419_v18 = vadd.f32 %v5951_v13, %v7480_v8  ;;  %v2410_v35 = vpop.f32.mrb[33].mxu1  ;;  %v2719_v32 = vsel %vm6294_vm4, %v2678_v3, 0  ;;  %v7660_v63 = vsel %vm6299_vm5, 0, %v2569_v48 }
 0x3e0   : > { %v2411_v4 = vadd.f32 %v7480_v8, %v2410_v35  ;;  %v5952_v54 = vpop.f32.mrb[34].mxu1  ;;  %2845 = vrot.lane.b32.xlu0 %v7581_v23, %s6172_s17  ;;  %2799 = vrot.lane.b32.xlu1 %v2718_v51, %s6169_s20 }
 0x3e1   : > { %v2422_v22 = vadd.f32 %v5952_v54, %v7480_v8  ;;  %v2413_v59 = vpop.f32.mrb[35].mxu1  ;;  %v2491_v12 = vmax.f32 %v2419_v18, 0.0 }
 0x3e2   : > { %v2414_v27 = vadd.f32 %v7480_v8, %v2413_v59  ;;  %v2489_v31 = vmax.f32 %v2411_v4, 0.0 }
 0x3e3   : > { %v2492_v20 = vmax.f32 %v2422_v22, 0.0 }
 0x3e4   : > { %v2490_v46 = vmax.f32 %v2414_v27, 0.0  ;;  %2911 = vrot.lane.b32.xlu0 %v2718_v51, %s6178_s8  ;;  %2999 = vrot.lane.b32.xlu1 %v2717_v37, %s6177_s29 }
 0x3e5   : > { %v7603_v49 = vpack.c.bf16 %v2492_v20, %v2491_v12 }
 0x3e6   : > { %v7605_v36 = vpack.c.bf16 %v2490_v46, %v2489_v31 }
 0x3e7   : > { %v2585_v35 = vshrl.u32 %v7603_v49, 16  ;;  %v2588_v4 = vshll.u32 %v7603_v49, 16 }
 0x3e8   : > { %2939 = vrot.lane.b32.xlu0 %v7609_v0, %s6176_s23  ;;  %2843 = vrot.lane.b32.xlu1 %v7609_v0, %s6172_s17  ;;  %v2581_v31 = vshll.u32 %v7605_v36, 16  ;;  %v2578_v39 = vshrl.u32 %v7605_v36, 16 }
 0x3e9   : > { %v2587_v43 = vrot.slane %v2585_v35, 7  ;;  %v2683_v27 = vrot.slane %v2588_v4, 1 }
 0x3ea   : > { %v2681_v53 = vrot.slane %v2581_v31, 1 }
 0x3eb   : > { %v2590_v59 = vor.u32 %v2588_v4, %v2587_v43  ;;  %v2684_v26 = vor.u32 %v2683_v27, %v2585_v35 }
 0x3ec   : > { %2797 = vrot.lane.b32.xlu0 %v2717_v37, %s6169_s20  ;;  %2909 = vrot.lane.b32.xlu1 %v2717_v37, %s6178_s8  ;;  %v2682_v47 = vor.u32 %v2681_v53, %v2578_v39 }
 0x3ed   : > { %v7688_v37 = vsel %vm6299_vm5, 0, %v2590_v59  ;;  %v2722_v7 = vsel %vm6294_vm4, %v2684_v26, 0 }
 0x3f0   : > { %2882 = vrot.lane.b32.xlu0 %v2512_v44, %s6174_s22  ;;  %2975 = vrot.lane.b32.xlu1 %v2512_v44, %s6175_s21 }
 0x3f4   : > { %2758 = vrot.lane.b32.xlu0 %v2512_v44, %s6168_s14  ;;  %2880 = vrot.lane.b32.xlu1 %v7583_v40, %s6174_s22 }
 0x3f8   : > { %2973 = vrot.lane.b32.xlu0 %v7583_v40, %s6175_s21  ;;  %2945 = vrot.lane.b32.xlu1 %v7624_v34, %s6176_s23 }
 0x3fc   : > { %2756 = vrot.lane.b32.xlu0 %v7583_v40, %s6168_s14  ;;  %3005 = vrot.lane.b32.xlu1 %v2720_v41, %s6177_s29 }
 0x3fe   : > { %v5955_v16 = vpop.f32.mrb[36].mxu1 }
 0x3ff   : > { %v2435_v28 = vadd.f32 %v5955_v16, %v7480_v8  ;;  %v2426_v50 = vpop.f32.mrb[37].mxu1  ;;  %v2580_v16 = vrot.slane %v2578_v39, 7 }
 0x400   : > { %v2427_v17 = vadd.f32 %v7480_v8, %v2426_v50  ;;  %v5956_v52 = vpop.f32.mrb[38].mxu1  ;;  %2849 = vrot.lane.b32.xlu0 %v7624_v34, %s6172_s17  ;;  %2803 = vrot.lane.b32.xlu1 %v2720_v41, %s6169_s20 }
 0x401   : > { %v2438_v29 = vadd.f32 %v5956_v52, %v7480_v8  ;;  %v2429_v14 = vpop.f32.mrb[39].mxu1  ;;  %v2495_v10 = vmax.f32 %v2435_v28, 0.0  ;;  %v2583_v48 = vor.u32 %v2581_v31, %v2580_v16 }
 0x402   : > { %v2430_v42 = vadd.f32 %v7480_v8, %v2429_v14  ;;  %v7644_v56 = vpop.permute.xlu1 %2963  ;;  %v2493_v44 = vmax.f32 %v2427_v17, 0.0  ;;  %v7652_v15 = vpop.permute.xlu0 %2870 }
 0x403   : > { %v2496_v2 = vmax.f32 %v2438_v29, 0.0  ;;  %v7733_v43 = vsel %vm6299_vm5, 0, %v2583_v48 }
 0x404   : > { %v2494_v40 = vmax.f32 %v2430_v42, 0.0  ;;  %2915 = vrot.lane.b32.xlu0 %v2720_v41, %s6178_s8  ;;  %3003 = vrot.lane.b32.xlu1 %v2719_v32, %s6177_s29 }
 0x405   : > { %v7650_v57 = vpack.c.bf16 %v2496_v2, %v2495_v10 }
 0x406   : > { %v7654_v51 = vpack.c.bf16 %v2494_v40, %v2493_v44  ;;  %v7656_v61 = vpop.permute.xlu1 %2744  ;;  %v7666_v18 = vpop.permute.xlu0 %2746 }
 0x407   : > { %v2599_v59 = vshrl.u32 %v7650_v57, 16 }
 0x408   : > { %2943 = vrot.lane.b32.xlu0 %v7660_v63, %s6176_s23  ;;  %2847 = vrot.lane.b32.xlu1 %v7660_v63, %s6172_s17 }
 0x409   : > { %v2601_v31 = vrot.slane %v2599_v59, 7 }
 0x40a   : > { %v2869_v13 = vpop.permute.xlu1 %2868  ;;  %v7676_v54 = vpop.permute.xlu0 %2837 }
 0x40c   : > { %2801 = vrot.lane.b32.xlu0 %v2719_v32, %s6169_s20  ;;  %2913 = vrot.lane.b32.xlu1 %v2719_v32, %s6178_s8  ;;  %v2721_v32 = vsel %vm6294_vm4, %v2682_v47, 0 }
 0x40e   : > { %v2934_v30 = vpop.permute.xlu1 %2933  ;;  %v7684_v20 = vpop.permute.xlu0 %2903 }
 0x410   : > { %2886 = vrot.lane.b32.xlu0 %v7603_v49, %s6174_s22  ;;  %2979 = vrot.lane.b32.xlu1 %v7603_v49, %s6175_s21 }
 0x412   : > { %v2994_v22 = vpop.permute.xlu1 %2993  ;;  %v2790_v45 = vpop.permute.xlu0 %2789 }
 0x414   : > { %2762 = vrot.lane.b32.xlu0 %v7603_v49, %s6168_s14  ;;  %2884 = vrot.lane.b32.xlu1 %v7605_v36, %s6174_s22 }
 0x416   : > { %v7682_v12 = vpop.permute.xlu1 %2791 }
 0x418   : > { %2977 = vrot.lane.b32.xlu0 %v7605_v36, %s6175_s21  ;;  %2949 = vrot.lane.b32.xlu1 %v7688_v37, %s6176_s23 }
 0x41a   : > { %v2836_v46 = vpop.permute.xlu1 %2835 }
 0x41b   : > { %v3099_v49 = vsel %vm1076_vm12, %v6884_v5, %v2836_v46  ;;  %v2602_v46 = vshll.u32 %v7650_v57, 16 }
 0x41c   : > { %2760 = vrot.lane.b32.xlu0 %v7605_v36, %s6168_s14  ;;  %3009 = vrot.lane.b32.xlu1 %v2722_v7, %s6177_s29  ;;  %v3131_v62 = vsel %vm1142_vm14, %v3099_v49, %v2869_v13  ;;  %v3025_v49 = vsel %vm944_vm8, %v7509_v19, %v7656_v61 }
 0x41e   : > { %v5959_v55 = vpop.f32.mrb[40].mxu1  ;;  %v2902_v25 = vpop.permute.xlu1 %2901 }
 0x41f   : > { %v2451_v41 = vadd.f32 %v5959_v55, %v7480_v8  ;;  %v3163_v5 = vsel %vm2100_vm0, %v3131_v62, %v2902_v25  ;;  %v2442_v38 = vpop.f32.mrb[41].mxu1  ;;  %v2604_v55 = vor.u32 %v2602_v46, %v2601_v31  ;;  %v2687_v62 = vrot.slane %v2602_v46, 1 }
 0x420   : > { %v3195_v28 = vsel %vm2133_vm1, %v3163_v5, %v2934_v30  ;;  %v2443_v50 = vadd.f32 %v7480_v8, %v2442_v38  ;;  %v5960_v3 = vpop.f32.mrb[42].mxu1  ;;  %2853 = vrot.lane.b32.xlu0 %v7688_v37, %s6172_s17  ;;  %2807 = vrot.lane.b32.xlu1 %v2722_v7, %s6169_s20  ;;  %v2595_v38 = vshll.u32 %v7654_v51, 16 }
 0x421   : > { %v2454_v36 = vadd.f32 %v5960_v3, %v7480_v8  ;;  %v2445_v6 = vpop.f32.mrb[43].mxu1  ;;  %v3226_v17 = vsel %vm2166_vm2, %v3195_v28, %v7644_v56  ;;  %v2499_v10 = vmax.f32 %v2451_v41, 0.0  ;;  %v2688_v5 = vor.u32 %v2687_v62, %v2599_v59 }
 0x422   : > { %v2446_v52 = vadd.f32 %v7480_v8, %v2445_v6  ;;  %v7715_v29 = vpop.permute.xlu0 %2874  ;;  %v7717_v14 = vpop.permute.xlu1 %2967  ;;  %v3257_v42 = vsel %vm2199_vm3, %v3226_v17, %v2994_v22  ;;  %v2497_v44 = vmax.f32 %v2443_v50, 0.0  ;;  %v2592_v28 = vshrl.u32 %v7654_v51, 16 }
 0x423   : > { %v2500_v2 = vmax.f32 %v2454_v36, 0.0  ;;  %5975 = vmatprep.mubr.msk.bf16.mxu0 %vm2275_vm6, %v3257_v42  ;;  %v2724_v36 = vsel %vm6294_vm4, %v2688_v5, 0  ;;  %v2685_v6 = vrot.slane %v2595_v38, 1 }
 0x424   : > { %v2498_v40 = vmax.f32 %v2446_v52, 0.0  ;;  %2919 = vrot.lane.b32.xlu0 %v2722_v7, %s6178_s8  ;;  %3007 = vrot.lane.b32.xlu1 %v2721_v32, %s6177_s29  ;;  %v3069_v7 = vsel %vm1010_vm10, %v3025_v49, %v2790_v45  ;;  %v7767_v45 = vsel %vm6299_vm5, 0, %v2604_v55 }
 0x425   : > { %v7725_v56 = vpack.c.bf16 %v2500_v2, %v2499_v10  ;;  %v3101_v25 = vsel %vm1076_vm12, %v3069_v7, %v7676_v54  ;;  %v2686_v42 = vor.u32 %v2685_v6, %v2592_v28  ;;  %v2594_v10 = vrot.slane %v2592_v28, 7 }
 0x426   : > { %v7727_v13 = vpack.c.bf16 %v2498_v40, %v2497_v44  ;;  %v7729_v35 = vpop.permute.xlu0 %2750  ;;  %v2873_v30 = vpop.permute.xlu1 %2872  ;;  %v3133_v41 = vsel %vm1142_vm14, %v3101_v25, %v7652_v15 }
 0x427   : > { %v3165_v15 = vsel %vm2100_vm0, %v3133_v41, %v7684_v20  ;;  %v2723_v31 = vsel %vm6294_vm4, %v2686_v42, 0  ;;  %v2597_v46 = vor.u32 %v2595_v38, %v2594_v10 }
 0x428   : > { %2947 = vrot.lane.b32.xlu0 %v7733_v43, %s6176_s23  ;;  %2851 = vrot.lane.b32.xlu1 %v7733_v43, %s6172_s17 }
 0x429   : > { %v7820_v5 = vsel %vm6299_vm5, 0, %v2597_v46 }
 0x42a   : > { %v2966_v4 = vpop.permute.xlu0 %2965  ;;  %v2938_v22 = vpop.permute.xlu1 %2937 }
 0x42c   : > { %2805 = vrot.lane.b32.xlu0 %v2721_v32, %s6169_s20  ;;  %2917 = vrot.lane.b32.xlu1 %v2721_v32, %s6178_s8 }
 0x42e   : > { %v7742_v27 = vpop.permute.xlu0 %2748  ;;  %v2998_v26 = vpop.permute.xlu1 %2997 }
 0x430   : > { %2890 = vrot.lane.b32.xlu0 %v7650_v57, %s6174_s22  ;;  %2983 = vrot.lane.b32.xlu1 %v7650_v57, %s6175_s21 }
 0x432   : > { %v7753_v39 = vpop.permute.xlu0 %2841  ;;  %v7755_v53 = vpop.permute.xlu1 %2795 }
 0x434   : > { %2766 = vrot.lane.b32.xlu0 %v7650_v57, %s6168_s14  ;;  %2888 = vrot.lane.b32.xlu1 %v7654_v51, %s6174_s22  ;;  %v3028_v57 = vsel %vm944_vm8, %v7492_v60, %v7666_v18 }
 0x435   : > { %v3071_v54 = vsel %vm1010_vm10, %v3028_v57, %v7682_v12 }
 0x436   : > { %v7763_v19 = vpop.permute.xlu0 %2907  ;;  %v2996_v61 = vpop.permute.xlu1 %2995 }
 0x438   : > { %2981 = vrot.lane.b32.xlu0 %v7654_v51, %s6175_s21  ;;  %2953 = vrot.lane.b32.xlu1 %v7767_v45, %s6176_s23 }
 0x43a   : > { %v2936_v47 = vpop.permute.xlu0 %2935  ;;  %v2840_v16 = vpop.permute.xlu1 %2839 }
 0x43b   : > { %v3197_v50 = vsel %vm2133_vm1, %v3165_v15, %v2936_v47  ;;  %v3103_v3 = vsel %vm1076_vm12, %v3071_v54, %v2840_v16  ;;  %v2613_v47 = vshrl.u32 %v7725_v56, 16 }
 0x43c   : > { %v3228_v60 = vsel %vm2166_vm2, %v3197_v50, %v2966_v4  ;;  %2764 = vrot.lane.b32.xlu0 %v7654_v51, %s6168_s14  ;;  %3013 = vrot.lane.b32.xlu1 %v2724_v36, %s6177_s29  ;;  %v3135_v20 = vsel %vm1142_vm14, %v3103_v3, %v2873_v30  ;;  %v2616_v50 = vshll.u32 %v7725_v56, 16  ;;  %v3031_v3 = vsel %vm944_vm8, %v7559_v33, %v7742_v27 }
 0x43d   : > { %v3259_v18 = vsel %vm2199_vm3, %v3228_v60, %v2996_v61  ;;  %v2615_v28 = vrot.slane %v2613_v47, 7 }
 0x43e   : > { %v2794_v12 = vpop.permute.xlu0 %2793  ;;  %v2906_v17 = vpop.permute.xlu1 %2905  ;;  %5976 = vmatmul.mubr.msk.bf16.vlgmr.msra.gmra.mrb[16].mxu0 %vm2275_vm6, %v3259_v18 }
 0x43f   : > { %v3167_v52 = vsel %vm2100_vm0, %v3135_v20, %v2906_v17  ;;  %v2618_v18 = vor.u32 %v2616_v50, %v2615_v28  ;;  %v2691_v20 = vrot.slane %v2616_v50, 1 }
 0x440   : > { %v3199_v2 = vsel %vm2133_vm1, %v3167_v52, %v2938_v22  ;;  %2857 = vrot.lane.b32.xlu0 %v7767_v45, %s6172_s17  ;;  %2811 = vrot.lane.b32.xlu1 %v2724_v36, %s6169_s20 }
 0x441   : > { %v5963_v51 = vpop.f32.mrb[44].mxu1  ;;  %v3230_v32 = vsel %vm2166_vm2, %v3199_v2, %v7717_v14  ;;  %v2692_v42 = vor.u32 %v2691_v20, %v2613_v47 }
 0x442   : > { %v2467_v48 = vadd.f32 %v5963_v51, %v7480_v8  ;;  %v2458_v44 = vpop.f32.mrb[45].mxu1  ;;  %v7803_v40 = vpop.permute.xlu0 %2878  ;;  %v3261_v30 = vsel %vm2199_vm3, %v3230_v32, %v2998_v26 }
 0x443   : > { %v2459_v4 = vadd.f32 %v7480_v8, %v2458_v44  ;;  %v7807_v59 = vpop.permute.xlu1 %2971  ;;  %v5964_v22 = vpop.f32.mrb[46].mxu1  ;;  %5979 = vmatprep.mubr.msk.bf16.mxu0 %vm2275_vm6, %v3261_v30  ;;  %v2606_v44 = vshrl.u32 %v7727_v13, 16 }
 0x444   : > { %v2470_v14 = vadd.f32 %v5964_v22, %v7480_v8  ;;  %v2461_v49 = vpop.f32.mrb[47].mxu1  ;;  %2923 = vrot.lane.b32.xlu0 %v2724_v36, %s6178_s8  ;;  %3011 = vrot.lane.b32.xlu1 %v2723_v31, %s6177_s29  ;;  %v2503_v7 = vmax.f32 %v2467_v48, 0.0  ;;  %v3073_v36 = vsel %vm1010_vm10, %v3031_v3, %v2794_v12  ;;  %v7858_v12 = vsel %vm6299_vm5, 0, %v2618_v18 }
 0x445   : > { %v2462_v26 = vadd.f32 %v7480_v8, %v2461_v49  ;;  %v2501_v25 = vmax.f32 %v2459_v4, 0.0  ;;  %v3105_v17 = vsel %vm1076_vm12, %v3073_v36, %v7753_v39  ;;  %v3034_v39 = vsel %vm944_vm8, %v7536_v21, %v7729_v35 }
 0x446   : > { %v2504_v55 = vmax.f32 %v2470_v14, 0.0  ;;  %v7816_v62 = vpop.permute.xlu0 %2754  ;;  %v3137_v52 = vsel %vm1142_vm14, %v3105_v17, %v7715_v29  ;;  %v3075_v29 = vsel %vm1010_vm10, %v3034_v39, %v7755_v53  ;;  %v2726_v48 = vsel %vm6294_vm4, %v2692_v42, 0 }
 0x447   : > { %v2502_v61 = vmax.f32 %v2462_v26, 0.0  ;;  %v2877_v41 = vpop.permute.xlu1 %2876  ;;  %v3169_v10 = vsel %vm2100_vm0, %v3137_v52, %v7763_v19 }
 0x448   : > { %v7822_v38 = vpack.c.bf16 %v2504_v55, %v2503_v7  ;;  %2951 = vrot.lane.b32.xlu0 %v7820_v5, %s6176_s23  ;;  %2855 = vrot.lane.b32.xlu1 %v7820_v5, %s6172_s17 }
 0x449   : > { %v7828_v8 = vpack.c.bf16 %v2502_v61, %v2501_v25 }
 0x44a   : > { %v2970_v57 = vpop.permute.xlu0 %2969  ;;  %v2630_v36 = vshll.u32 %v7822_v38, 16 }
 0x44b   : > { %v2942_v54 = vpop.permute.xlu1 %2941  ;;  %v2623_v50 = vshll.u32 %v7828_v8, 16 }
 0x44c   : > { %2809 = vrot.lane.b32.xlu0 %v2723_v31, %s6169_s20  ;;  %2921 = vrot.lane.b32.xlu1 %v2723_v31, %s6178_s8  ;;  %v2608_v31 = vrot.slane %v2606_v44, 7 }
 0x44d   : > { %v2693_v52 = vrot.slane %v2623_v50, 1 }
 0x44e   : > { %v7833_v15 = vpop.permute.xlu0 %2752 }
 0x44f   : > { %v3002_v16 = vpop.permute.xlu1 %3001  ;;  %v3037_v20 = vsel %vm944_vm8, %v7609_v0, %v7833_v15 }
 0x450   : > { %2894 = vrot.lane.b32.xlu0 %v7725_v56, %s6174_s22  ;;  %2987 = vrot.lane.b32.xlu1 %v7725_v56, %s6175_s21 }
 0x452   : > { %v7844_v6 = vpop.permute.xlu0 %2845 }
 0x453   : > { %v7846_v60 = vpop.permute.xlu1 %2799 }
 0x454   : > { %2770 = vrot.lane.b32.xlu0 %v7725_v56, %s6168_s14  ;;  %2892 = vrot.lane.b32.xlu1 %v7727_v13, %s6174_s22  ;;  %v2609_v56 = vshll.u32 %v7727_v13, 16 }
 0x456   : > { %v7854_v33 = vpop.permute.xlu0 %2911  ;;  %v2689_v21 = vrot.slane %v2609_v56, 1  ;;  %v2611_v25 = vor.u32 %v2609_v56, %v2608_v31 }
 0x457   : > { %v3000_v27 = vpop.permute.xlu1 %2999 }
 0x458   : > { %2985 = vrot.lane.b32.xlu0 %v7727_v13, %s6175_s21  ;;  %2957 = vrot.lane.b32.xlu1 %v7858_v12, %s6176_s23 }
 0x45a   : > { %v2940_v2 = vpop.permute.xlu0 %2939 }
 0x45b   : > { %v3201_v51 = vsel %vm2133_vm1, %v3169_v10, %v2940_v2  ;;  %v2844_v32 = vpop.permute.xlu1 %2843 }
 0x45c   : > { %v3232_v30 = vsel %vm2166_vm2, %v3201_v51, %v2970_v57  ;;  %v3107_v4 = vsel %vm1076_vm12, %v3075_v29, %v2844_v32  ;;  %2768 = vrot.lane.b32.xlu0 %v7727_v13, %s6168_s14  ;;  %3017 = vrot.lane.b32.xlu1 %v2726_v48, %s6177_s29  ;;  %v2690_v13 = vor.u32 %v2689_v21, %v2606_v44 }
 0x45d   : > { %v3263_v35 = vsel %vm2199_vm3, %v3232_v30, %v3000_v27  ;;  %v3139_v19 = vsel %vm1142_vm14, %v3107_v4, %v2877_v41  ;;  %v2620_v27 = vshrl.u32 %v7828_v8, 16  ;;  %v3040_v30 = vsel %vm944_vm8, %v7581_v23, %v7816_v62 }
 0x45e   : > { %v2798_v53 = vpop.permute.xlu0 %2797  ;;  %5980 = vmatmul.mubr.msk.bf16.gmra.mrb[20].mxu0 %vm2275_vm6, %v3263_v35  ;;  %v2725_v61 = vsel %vm6294_vm4, %v2690_v13, 0 }
 0x45f   : > { %v2910_v22 = vpop.permute.xlu1 %2909  ;;  %v3077_v42 = vsel %vm1010_vm10, %v3037_v20, %v2798_v53  ;;  %v2694_v15 = vor.u32 %v2693_v52, %v2620_v27  ;;  %v2622_v2 = vrot.slane %v2620_v27, 7 }
 0x460   : > { %v3171_v46 = vsel %vm2100_vm0, %v3139_v19, %v2910_v22  ;;  %2861 = vrot.lane.b32.xlu0 %v7858_v12, %s6172_s17  ;;  %2815 = vrot.lane.b32.xlu1 %v2726_v48, %s6169_s20  ;;  %v3109_v10 = vsel %vm1076_vm12, %v3077_v42, %v7844_v6 }
 0x461   : > { %v3203_v14 = vsel %vm2133_vm1, %v3171_v46, %v2942_v54  ;;  %v2627_v54 = vshrl.u32 %v7822_v38, 16  ;;  %v3141_v32 = vsel %vm1142_vm14, %v3109_v10, %v7803_v40  ;;  %v2727_v6 = vsel %vm6294_vm4, %v2694_v15, 0 }
 0x462   : > { %v7891_v49 = vpop.permute.xlu0 %2882  ;;  %v3234_v26 = vsel %vm2166_vm2, %v3203_v14, %v7807_v59  ;;  %v7907_v59 = vsel %vm6299_vm5, 0, %v2611_v25  ;;  %v2625_v44 = vor.u32 %v2623_v50, %v2622_v2  ;;  %v3173_v4 = vsel %vm2100_vm0, %v3141_v32, %v7854_v33 }
 0x463   : > { %v7895_v7 = vpop.permute.xlu1 %2975  ;;  %v3265_v55 = vsel %vm2199_vm3, %v3234_v26, %v3002_v16  ;;  %v2629_v28 = vrot.slane %v2627_v54, 7  ;;  %v3079_v40 = vsel %vm1010_vm10, %v3040_v30, %v7846_v60 }
 0x464   : > { %5983 = vmatprep.mubr.msk.bf16.mxu0 %vm2275_vm6, %v3265_v55  ;;  %2927 = vrot.lane.b32.xlu0 %v2726_v48, %s6178_s8  ;;  %v2695_v48 = vrot.slane %v2630_v36, 1  ;;  %v7958_v23 = vsel %vm6299_vm5, 0, %v2625_v44 }
 0x465   : > { %3015 = vrot.lane.b32.xlu1 %v2725_v61, %s6177_s29  ;;  %v2632_v17 = vor.u32 %v2630_v36, %v2629_v28 }
 0x466   : > { %v7903_v41 = vpop.permute.xlu0 %2758  ;;  %v2696_v53 = vor.u32 %v2695_v48, %v2627_v54 }
 0x467   : > { %v2881_v57 = vpop.permute.xlu1 %2880  ;;  %v2664_v0 = vsel %vm6299_vm5, 0, %v2632_v17  ;;  %vm5415_vm5 = vcmask 1041409  }
 0x468   : > { %2955 = vrot.lane.b32.xlu0 %v7907_v59, %s6176_s23  ;;  %v2728_v46 = vsel %vm6294_vm4, %v2696_v53, 0  ;;  %vm4262_vm4 = vcmask 58368  }
 0x469   : > { %2859 = vrot.lane.b32.xlu1 %v7907_v59, %s6172_s17 }
 0x46a   : > { %v2974_v47 = vpop.permute.xlu0 %2973 }
 0x46b   : > { %v2946_v16 = vpop.permute.xlu1 %2945 }
 0x46c   : > { %2813 = vrot.lane.b32.xlu0 %v2725_v61, %s6169_s20 }
 0x46d   : > { %2925 = vrot.lane.b32.xlu1 %v2725_v61, %s6178_s8 }
 0x46e   : > { %v7917_v3 = vpop.permute.xlu0 %2756 }
 0x46f   : > { %v3006_v18 = vpop.permute.xlu1 %3005 }
 0x470   : > { %2898 = vrot.lane.b32.xlu0 %v7822_v38, %s6174_s22 }
 0x471   : > { %2896 = vrot.lane.b32.xlu1 %v7828_v8, %s6174_s22 }
 0x472   : > { %v2850_v56 = vpop.permute.xlu0 %2849 }
 0x473   : > { %v7929_v39 = vpop.permute.xlu1 %2803 }
 0x474   : > { %2989 = vrot.lane.b32.xlu0 %v7828_v8, %s6175_s21 }
 0x475   : > { %2961 = vrot.lane.b32.xlu1 %v2664_v0, %s6176_s23 }
 0x476   : > { %v2916_v29 = vpop.permute.xlu0 %2915 }
 0x477   : > { %v3004_v51 = vpop.permute.xlu1 %3003 }
 0x478   : > { %2772 = vrot.lane.b32.xlu0 %v7828_v8, %s6168_s14 }
 0x479   : > { %3019 = vrot.lane.b32.xlu1 %v2727_v6, %s6177_s29 }
 0x47a   : > { %v2944_v21 = vpop.permute.xlu0 %2943 }
 0x47b   : > { %v3205_v35 = vsel %vm2133_vm1, %v3173_v4, %v2944_v21  ;;  %v2848_v8 = vpop.permute.xlu1 %2847 }
 0x47c   : > { %v3236_v19 = vsel %vm2166_vm2, %v3205_v35, %v2974_v47  ;;  %v3111_v22 = vsel %vm1076_vm12, %v3079_v40, %v2848_v8  ;;  %2865 = vrot.lane.b32.xlu0 %v2664_v0, %s6172_s17 }
 0x47d   : > { %2863 = vrot.lane.b32.xlu1 %v7958_v23, %s6172_s17  ;;  %v3267_v62 = vsel %vm2199_vm3, %v3236_v19, %v3004_v51  ;;  %v3143_v33 = vsel %vm1142_vm14, %v3111_v22, %v2881_v57 }
 0x47e   : > { %v2802_v60 = vpop.permute.xlu0 %2801  ;;  %5984 = vmatmul.mubr.msk.bf16.gmra.mrb[24].mxu0 %vm2275_vm6, %v3267_v62 }
 0x47f   : > { %v2914_v31 = vpop.permute.xlu1 %2913 }
 0x480   : > { %v3175_v13 = vsel %vm2100_vm0, %v3143_v33, %v2914_v31  ;;  %2931 = vrot.lane.b32.xlu0 %v2728_v46, %s6178_s8 }
 0x481   : > { %v3207_v11 = vsel %vm2133_vm1, %v3175_v13, %v2946_v16  ;;  %2929 = vrot.lane.b32.xlu1 %v2727_v6, %s6178_s8  ;;  %v3043_v16 = vsel %vm944_vm8, %v7660_v63, %v7917_v3 }
 0x482   : > { %v2887_v14 = vpop.permute.xlu0 %2886  ;;  %v3238_v26 = vsel %vm2166_vm2, %v3207_v11, %v7895_v7  ;;  %v3081_v28 = vsel %vm1010_vm10, %v3043_v16, %v2802_v60 }
 0x483   : > { %v2980_v55 = vpop.permute.xlu1 %2979  ;;  %v3269_v25 = vsel %vm2199_vm3, %v3238_v26, %v3006_v18  ;;  %v3113_v18 = vsel %vm1076_vm12, %v3081_v28, %v2850_v56 }
 0x484   : > { %5987 = vmatprep.mubr.msk.bf16.mxu0 %vm2275_vm6, %v3269_v25  ;;  %2959 = vrot.lane.b32.xlu0 %v7958_v23, %s6176_s23  ;;  %v3145_v27 = vsel %vm1142_vm14, %v3113_v18, %v7891_v49 }
 0x485   : > { %3021 = vrot.lane.b32.xlu1 %v2728_v46, %s6177_s29  ;;  %v3177_v52 = vsel %vm2100_vm0, %v3145_v27, %v2916_v29  ;;  %s5735_s29 = sshll.u32 %s269_s18, 3 }
 0x486   : > { %v2763_v9 = vpop.permute.xlu0 %2762 }
 0x487   : > { %v2885_v61 = vpop.permute.xlu1 %2884  ;;  %v3052_v31 = vsel %vm944_vm8, %v7688_v37, %v2763_v9 }
 0x488   : > { %2817 = vrot.lane.b32.xlu0 %v2727_v6, %s6169_s20 }
 0x48a   : > { %v2978_v57 = vpop.permute.xlu0 %2977 }
 0x48b   : > { %v2950_v54 = vpop.permute.xlu1 %2949 }
 0x48c   : > { %2991 = vrot.lane.b32.xlu0 %v7822_v38, %s6175_s21  ;;  %v3046_v38 = vsel %vm944_vm8, %v7624_v34, %v7903_v41 }
 0x48d   : > { %v3083_v63 = vsel %vm1010_vm10, %v3046_v38, %v7929_v39 }
 0x48e   : > { %v2761_v7 = vpop.permute.xlu0 %2760 }
 0x48f   : > { %v3010_v47 = vpop.permute.xlu1 %3009  ;;  %v3049_v35 = vsel %vm944_vm8, %v7733_v43, %v2761_v7 }
 0x492   : > { %v2854_v50 = vpop.permute.xlu0 %2853 }
 0x493   : > { %v2808_v36 = vpop.permute.xlu1 %2807 }
 0x494   : > { %v3087_v11 = vsel %vm1010_vm10, %v3052_v31, %v2808_v36 }
 0x496   : > { %v2920_v20 = vpop.permute.xlu0 %2919 }
 0x497   : > { %v3008_v17 = vpop.permute.xlu1 %3007 }
 0x49a   : > { %v2948_v42 = vpop.permute.xlu0 %2947 }
 0x49b   : > { %v3209_v3 = vsel %vm2133_vm1, %v3177_v52, %v2948_v42  ;;  %v2852_v10 = vpop.permute.xlu1 %2851 }
 0x49c   : > { %v3240_v56 = vsel %vm2166_vm2, %v3209_v3, %v2978_v57  ;;  %v3115_v0 = vsel %vm1076_vm12, %v3083_v63, %v2852_v10 }
 0x49d   : > { %v3271_v15 = vsel %vm2199_vm3, %v3240_v56, %v3008_v17  ;;  %v3147_v34 = vsel %vm1142_vm14, %v3115_v0, %v2885_v61 }
 0x49e   : > { %v2806_v49 = vpop.permute.xlu0 %2805  ;;  %5988 = vmatmul.mubr.msk.bf16.gmra.mrb[28].mxu0 %vm2275_vm6, %v3271_v15 }
 0x49f   : > { %v2918_v41 = vpop.permute.xlu1 %2917  ;;  %v3085_v8 = vsel %vm1010_vm10, %v3049_v35, %v2806_v49 }
 0x4a0   : > { %v3179_v2 = vsel %vm2100_vm0, %v3147_v34, %v2918_v41  ;;  %v3117_v22 = vsel %vm1076_vm12, %v3085_v8, %v2854_v50 }
 0x4a1   : > { %v3211_v29 = vsel %vm2133_vm1, %v3179_v2, %v2950_v54  ;;  %v3149_v33 = vsel %vm1142_vm14, %v3117_v22, %v2887_v14 }
 0x4a2   : > { %v2891_v39 = vpop.permute.xlu0 %2890  ;;  %v3242_v51 = vsel %vm2166_vm2, %v3211_v29, %v2980_v55  ;;  %v3181_v46 = vsel %vm2100_vm0, %v3149_v33, %v2920_v20 }
 0x4a3   : > { %v2984_v32 = vpop.permute.xlu1 %2983  ;;  %v3273_v48 = vsel %vm2199_vm3, %v3242_v51, %v3010_v47 }
 0x4a4   : > { %5991 = vmatprep.mubr.msk.bf16.mxu0 %vm2275_vm6, %v3273_v48 }
 0x4a6   : > { %v2767_v6 = vpop.permute.xlu0 %2766 }
 0x4a7   : > { %v2889_v44 = vpop.permute.xlu1 %2888  ;;  %v3058_v15 = vsel %vm944_vm8, %v7767_v45, %v2767_v6 }
 0x4aa   : > { %v2982_v30 = vpop.permute.xlu0 %2981 }
 0x4ab   : > { %v2954_v4 = vpop.permute.xlu1 %2953 }
 0x4ae   : > { %v2765_v21 = vpop.permute.xlu0 %2764 }
 0x4af   : > { %v3014_v40 = vpop.permute.xlu1 %3013  ;;  %v3055_v38 = vsel %vm944_vm8, %v7820_v5, %v2765_v21 }
 0x4b2   : > { %v2858_v53 = vpop.permute.xlu0 %2857 }
 0x4b3   : > { %v2812_v19 = vpop.permute.xlu1 %2811 }
 0x4b4   : > { %v3091_v41 = vsel %vm1010_vm10, %v3058_v15, %v2812_v19 }
 0x4b6   : > { %v2924_v62 = vpop.permute.xlu0 %2923 }
 0x4b7   : > { %v3012_v60 = vpop.permute.xlu1 %3011 }
 0x4ba   : > { %v2952_v13 = vpop.permute.xlu0 %2951 }
 0x4bb   : > { %v3213_v43 = vsel %vm2133_vm1, %v3181_v46, %v2952_v13  ;;  %v2856_v26 = vpop.permute.xlu1 %2855 }
 0x4bc   : > { %v3244_v55 = vsel %vm2166_vm2, %v3213_v43, %v2982_v30  ;;  %v3119_v25 = vsel %vm1076_vm12, %v3087_v11, %v2856_v26 }
 0x4bd   : > { %v3275_v61 = vsel %vm2199_vm3, %v3244_v55, %v3012_v60  ;;  %v3151_v14 = vsel %vm1142_vm14, %v3119_v25, %v2889_v44 }
 0x4be   : > { %v2810_v57 = vpop.permute.xlu0 %2809  ;;  %5992 = vmatmul.mubr.msk.bf16.gmra.mrb[32].mxu0 %vm2275_vm6, %v3275_v61 }
 0x4bf   : > { %v2922_v37 = vpop.permute.xlu1 %2921  ;;  %v3089_v52 = vsel %vm1010_vm10, %v3055_v38, %v2810_v57 }
 0x4c0   : > { %v3183_v9 = vsel %vm2100_vm0, %v3151_v14, %v2922_v37  ;;  %v3121_v3 = vsel %vm1076_vm12, %v3089_v52, %v2858_v53  ;;  %v6179_v52 = vmov 1983009808  }
 0x4c1   : > { %v3215_v54 = vsel %vm2133_vm1, %v3183_v9, %v2954_v4  ;;  %v3153_v0 = vsel %vm1142_vm14, %v3121_v3, %v2891_v39 }
 0x4c2   : > { %v2895_v7 = vpop.permute.xlu0 %2894  ;;  %v3246_v47 = vsel %vm2166_vm2, %v3215_v54, %v2984_v32  ;;  %v3185_v49 = vsel %vm2100_vm0, %v3153_v0, %v2924_v62 }
 0x4c3   : > { %v2988_v16 = vpop.permute.xlu1 %2987  ;;  %v3277_v28 = vsel %vm2199_vm3, %v3246_v47, %v3014_v40 }
 0x4c4   : > { %5995 = vmatprep.mubr.msk.bf16.mxu0 %vm2275_vm6, %v3277_v28 }
 0x4c6   : > { %v2771_v50 = vpop.permute.xlu0 %2770 }
 0x4c7   : > { %v2893_v36 = vpop.permute.xlu1 %2892  ;;  %v3064_v11 = vsel %vm944_vm8, %v7858_v12, %v2771_v50 }
 0x4ca   : > { %v2986_v18 = vpop.permute.xlu0 %2985 }
 0x4cb   : > { %v2958_v20 = vpop.permute.xlu1 %2957 }
 0x4ce   : > { %v2769_v17 = vpop.permute.xlu0 %2768 }
 0x4cf   : > { %v3018_v27 = vpop.permute.xlu1 %3017  ;;  %v3061_v19 = vsel %vm944_vm8, %v7907_v59, %v2769_v17 }
 0x4d2   : > { %v2862_v42 = vpop.permute.xlu0 %2861 }
 0x4d3   : > { %v2816_v63 = vpop.permute.xlu1 %2815 }
 0x4d4   : > { %v3095_v43 = vsel %vm1010_vm10, %v3064_v11, %v2816_v63  ;;  %v3594_v63 = vlaneseq }
 0x4d6   : > { %v2928_v10 = vpop.permute.xlu0 %2927 }
 0x4d7   : > { %v3016_v56 = vpop.permute.xlu1 %3015 }
 0x4da   : > { %v2956_v34 = vpop.permute.xlu0 %2955 }
 0x4db   : > { %v3217_v5 = vsel %vm2133_vm1, %v3185_v49, %v2956_v34  ;;  %v2860_v2 = vpop.permute.xlu1 %2859 }
 0x4dc   : > { %v3248_v29 = vsel %vm2166_vm2, %v3217_v5, %v2986_v18  ;;  %v3123_v51 = vsel %vm1076_vm12, %v3091_v41, %v2860_v2 }
 0x4dd   : > { %v3279_v32 = vsel %vm2199_vm3, %v3248_v29, %v3016_v56  ;;  %v3155_v39 = vsel %vm1142_vm14, %v3123_v51, %v2893_v36 }
 0x4de   : > { %v2814_v48 = vpop.permute.xlu0 %2813  ;;  %5996 = vmatmul.mubr.msk.bf16.gmra.mrb[36].mxu0 %vm2275_vm6, %v3279_v32 }
 0x4df   : > { %v2926_v45 = vpop.permute.xlu1 %2925  ;;  %v3093_v62 = vsel %vm1010_vm10, %v3061_v19, %v2814_v48 }
 0x4e0   : > { %v3187_v6 = vsel %vm2100_vm0, %v3155_v39, %v2926_v45  ;;  %v3125_v33 = vsel %vm1076_vm12, %v3093_v62, %v2862_v42  ;;  %v3592_v42 = vunpack.c.l.s4 %v6179_v52 }
 0x4e1   : > { %v3219_v44 = vsel %vm2133_vm1, %v3187_v6, %v2958_v20  ;;  %v3157_v13 = vsel %vm1142_vm14, %v3125_v33, %v2895_v7 }
 0x4e2   : > { %v2899_v30 = vpop.permute.xlu0 %2898  ;;  %v3250_v4 = vsel %vm2166_vm2, %v3219_v44, %v2988_v16  ;;  %v3189_v26 = vsel %vm2100_vm0, %v3157_v13, %v2928_v10  ;;  %v3593_v3 = vunpack.c.0.s8 %v3592_v42  ;;  %v8078_v10 = vshrl.u32 %v3594_v63, 7 }
 0x4e3   : > { %v2897_v21 = vpop.permute.xlu1 %2896  ;;  %v3281_v40 = vsel %vm2199_vm3, %v3250_v4, %v3018_v27 }
 0x4e4   : > { %5999 = vmatprep.mubr.msk.bf16.mxu0 %vm2275_vm6, %v3281_v40  ;;  %8977 = vst [vmem:[#allocation5_spill] sm:$0xff] %v8078_v10  ;;  %v8087_v0 = vsub.s32 %v3593_v3, %v8078_v10 }
 0x4e6   : > { %v2990_v35 = vpop.permute.xlu0 %2989 }
 0x4e7   : > { %v2962_v8 = vpop.permute.xlu1 %2961 }
 0x4ea   : > { %v2773_v53 = vpop.permute.xlu0 %2772 }
 0x4eb   : > { %v3020_v22 = vpop.permute.xlu1 %3019  ;;  %v3067_v37 = vsel %vm944_vm8, %v7958_v23, %v2773_v53 }
 0x4ee   : > { %v2866_v60 = vpop.permute.xlu0 %2865 }
 0x4ef   : > { %v2864_v31 = vpop.permute.xlu1 %2863 }
 0x4f0   : > { %v3127_v59 = vsel %vm1076_vm12, %v3095_v43, %v2864_v31 }
 0x4f1   : > { %v3159_v9 = vsel %vm1142_vm14, %v3127_v59, %v2897_v21 }
 0x4f2   : > { %v2932_v46 = vpop.permute.xlu0 %2931 }
 0x4f3   : > { %v2930_v61 = vpop.permute.xlu1 %2929 }
 0x4f4   : > { %v3191_v54 = vsel %vm2100_vm0, %v3159_v9, %v2930_v61 }
 0x4f5   : > { %v3223_v36 = vsel %vm2133_vm1, %v3191_v54, %v2962_v8 }
 0x4f6   : > { %v2960_v55 = vpop.permute.xlu0 %2959 }
 0x4f7   : > { %v3221_v25 = vsel %vm2133_vm1, %v3189_v26, %v2960_v55  ;;  %v3022_v18 = vpop.permute.xlu1 %3021 }
 0x4f8   : > { %v3252_v57 = vsel %vm2166_vm2, %v3221_v25, %v2990_v35 }
 0x4f9   : > { %v3283_v14 = vsel %vm2199_vm3, %v3252_v57, %v3020_v22 }
 0x4fa   : > { %v2818_v12 = vpop.permute.xlu0 %2817  ;;  %6000 = vmatmul.mubr.msk.bf16.gmra.mrb[40].mxu0 %vm2275_vm6, %v3283_v14 }
 0x4fb   : > { %v3097_v7 = vsel %vm1010_vm10, %v3067_v37, %v2818_v12 }
 0x4fc   : > { %v3129_v47 = vsel %vm1076_vm12, %v3097_v7, %v2866_v60 }
 0x4fd   : > { %v3161_v16 = vsel %vm1142_vm14, %v3129_v47, %v2899_v30 }
 0x4fe   : > { %v3193_v28 = vsel %vm2100_vm0, %v3161_v16, %v2932_v46  ;;  %v2992_v50 = vpop.permute.xlu0 %2991 }
 0x4ff   : > { %v3254_v23 = vsel %vm2166_vm2, %v3223_v36, %v2992_v50  ;;  %v3224_v20 = vsel %vm2133_vm1, %v3193_v28, %v7458_v1  ;;  %v8083_v1 = vld [vmem:[%s8960_s6] ss:$0 sm:$0xff] }
 0x500   : > { %v3285_v17 = vsel %vm2199_vm3, %v3254_v23, %v3022_v18  ;;  %v3255_v27 = vsel %vm2166_vm2, %v3224_v20, %v7464_v24 }
 0x501   : > { %6003 = vmatprep.mubr.msk.bf16.mxu0 %vm2275_vm6, %v3285_v17  ;;  %v3286_v38 = vsel %vm2199_vm3, %v3255_v27, %v7472_v58 }
 0x502   : > { %6004 = vmatmul.mubr.msk.bf16.gmra.mrb[44].mxu0 %vm2275_vm6, %v3286_v38  ;;  %vm5425_vm6 = vcmask 1046534  }
 0x511   : > { %v5977_v56 = vpop.f32.mrb[16].mxu0 }
 0x512   : > { %v3408_v24 = vadd.f32 %v5977_v56, %v8083_v1  ;;  %v3399_v58 = vpop.f32.mrb[17].mxu0 }
 0x513   : > { %v3400_v15 = vadd.f32 %v8083_v1, %v3399_v58  ;;  %v5978_v49 = vpop.f32.mrb[18].mxu0 }
 0x514   : > { %v3528_v34 = vmax.f32 %v3408_v24, 0.0  ;;  %v3411_v41 = vadd.f32 %v5978_v49, %v8083_v1  ;;  %v3402_v5 = vpop.f32.mrb[19].mxu0 }
 0x515   : > { %v3526_v2 = vmax.f32 %v3400_v15, 0.0  ;;  %v3403_v29 = vadd.f32 %v8083_v1, %v3402_v5 }
 0x516   : > { %v3624_v51 = vcombine.high %v3528_v34, %v3528_v34  ;;  %v3631_v32 = vrot.slane %v3528_v34, %v8087_v0  ;;  %v8093_v48 = vmax.f32 %v3411_v41, 0.0 }
 0x517   : > { %v3590_v39 = vcombine.high %v3526_v2, %v3526_v2  ;;  %v3597_v45 = vrot.slane %v3526_v2, %v8087_v0  ;;  %v8096_v6 = vmax.f32 %v3403_v29, 0.0 }
 0x518   : > { %v3638_v44 = vrot.slane %v3624_v51, %v8087_v0  ;;  %v3639_v30 = vcombine.high %v3631_v32, %v3631_v32  ;;  %v4319_v4 = vsel %vm4262_vm4, %v3631_v32, -inf  ;;  %v3641_v21 = vcombine.high %v8093_v48, %v8093_v48 }
 0x519   : > { %v4320_v40 = vrot.slane %v4319_v4, 4  ;;  %v3604_v35 = vrot.slane %v3590_v39, %v8087_v0  ;;  %v3605_v8 = vcombine.high %v3597_v45, %v3597_v45  ;;  %v4263_v53 = vsel %vm4262_vm4, %v3597_v45, -inf }
 0x51a   : > { %v3640_v19 = vcombine.high %v3638_v44, %v3638_v44  ;;  %v4326_v22 = vsel %vm4262_vm4, %v3639_v30, -inf  ;;  %v4333_v62 = vsel %vm4262_vm4, %v3638_v44, -inf  ;;  %v4264_v60 = vrot.slane %v4263_v53, 4 }
 0x51b   : > { %v4321_v33 = vmax.f32 %v4319_v4, %v4320_v40  ;;  %v4327_v31 = vrot.slane %v4326_v22, 4  ;;  %v4334_v46 = vrot.slane %v4333_v62, 4  ;;  %v3606_v13 = vcombine.high %v3604_v35, %v3604_v35 }
 0x51c   : > { %v4340_v11 = vsel %vm4262_vm4, %v3640_v19, -inf  ;;  %v4265_v43 = vmax.f32 %v4263_v53, %v4264_v60  ;;  %v4270_v26 = vsel %vm4262_vm4, %v3605_v8, -inf  ;;  %v4277_v55 = vsel %vm4262_vm4, %v3604_v35, -inf }
 0x51d   : > { %v4322_v59 = vrot.slane %v4321_v33, 2  ;;  %v4328_v25 = vmax.f32 %v4326_v22, %v4327_v31  ;;  %v4335_v61 = vmax.f32 %v4333_v62, %v4334_v46  ;;  %v4341_v57 = vrot.slane %v4340_v11, 4 }
 0x51e   : > { %v4266_v14 = vrot.slane %v4265_v43, 2  ;;  %v4271_v37 = vrot.slane %v4270_v26, 4  ;;  %v4278_v9 = vrot.slane %v4277_v55, 4  ;;  %v4284_v12 = vsel %vm4262_vm4, %v3606_v13, -inf }
 0x51f   : > { %v4323_v54 = vmax.f32 %v4321_v33, %v4322_v59  ;;  %v4329_v7 = vrot.slane %v4328_v25, 2  ;;  %v4336_v47 = vrot.slane %v4335_v61, 2  ;;  %v4342_v16 = vmax.f32 %v4340_v11, %v4341_v57 }
 0x520   : > { %v4267_v28 = vmax.f32 %v4265_v43, %v4266_v14  ;;  %v4272_v50 = vmax.f32 %v4270_v26, %v4271_v37  ;;  %v4279_v36 = vmax.f32 %v4277_v55, %v4278_v9  ;;  %v4285_v18 = vrot.slane %v4284_v12, 4 }
 0x521   : > { %v4324_v23 = vrot.slane %v4323_v54, 1  ;;  %v4330_v20 = vmax.f32 %v4328_v25, %v4329_v7  ;;  %v4337_v17 = vmax.f32 %v4335_v61, %v4336_v47  ;;  %v4343_v27 = vrot.slane %v4342_v16, 2 }
 0x522   : > { %v4268_v38 = vrot.slane %v4267_v28, 1  ;;  %v4273_v52 = vrot.slane %v4272_v50, 2  ;;  %v4280_v42 = vrot.slane %v4279_v36, 2  ;;  %v4286_v63 = vmax.f32 %v4284_v12, %v4285_v18 }
 0x523   : > { %v4325_v3 = vmax.f32 %v4323_v54, %v4324_v23  ;;  %v4331_v56 = vrot.slane %v4330_v20, 1  ;;  %v4338_v24 = vrot.slane %v4337_v17, 1  ;;  %v4344_v58 = vmax.f32 %v4342_v16, %v4343_v27 }
 0x524   : > { %v4269_v15 = vmax.f32 %v4267_v28, %v4268_v38  ;;  %v4274_v49 = vmax.f32 %v4272_v50, %v4273_v52  ;;  %v4281_v34 = vmax.f32 %v4279_v36, %v4280_v42  ;;  %v4287_v41 = vrot.slane %v4286_v63, 2 }
 0x525   : > { %v4332_v5 = vmax.f32 %v4330_v20, %v4331_v56  ;;  %v4339_v2 = vmax.f32 %v4337_v17, %v4338_v24  ;;  %v4345_v29 = vrot.slane %v4344_v58, 1  ;;  %v5160_v51 = vsel %vm944_vm8, %v4325_v3, -inf }
 0x526   : > { %v4275_v32 = vrot.slane %v4274_v49, 1  ;;  %v4282_v39 = vrot.slane %v4281_v34, 1  ;;  %v4288_v45 = vmax.f32 %v4286_v63, %v4287_v41  ;;  %v5159_v44 = vsel %vm944_vm8, %v4269_v15, -inf }
 0x527   : > { %v4346_v30 = vmax.f32 %v4344_v58, %v4345_v29  ;;  %v5163_v4 = vsel %vm944_vm8, %v4332_v5, -inf  ;;  %v5166_v40 = vsel %vm944_vm8, %v4339_v2, -inf  ;;  %v5161_v35 = vmax.f32 %v5159_v44, %v5160_v51 }
 0x528   : > { %v4276_v8 = vmax.f32 %v4274_v49, %v4275_v32  ;;  %v4283_v53 = vmax.f32 %v4281_v34, %v4282_v39  ;;  %v4289_v19 = vrot.slane %v4288_v45, 1  ;;  %v3648_v22 = vrot.slane %v8093_v48, %v8087_v0 }
 0x529   : > { %v8117_v62 = vsel %vm944_vm8, %v4346_v30, -inf  ;;  %v3655_v60 = vrot.slane %v3641_v21, %v8087_v0  ;;  %v3607_v33 = vcombine.high %v8096_v6, %v8096_v6  ;;  %v3614_v31 = vrot.slane %v8096_v6, %v8087_v0 }
 0x52a   : > { %v4290_v46 = vmax.f32 %v4288_v45, %v4289_v19  ;;  %v5162_v13 = vsel %vm944_vm8, %v4276_v8, -inf  ;;  %v5165_v11 = vsel %vm944_vm8, %v4283_v53, -inf  ;;  %v3656_v43 = vcombine.high %v3648_v22, %v3648_v22 }
 0x52b   : > { %v5164_v26 = vmax.f32 %v5162_v13, %v5163_v4  ;;  %v5167_v55 = vmax.f32 %v5165_v11, %v5166_v40  ;;  %v3657_v59 = vcombine.high %v3655_v60, %v3655_v60  ;;  %v4347_v25 = vsel %vm4262_vm4, %v3648_v22, -inf }
 0x52c   : > { %v8131_v48 = vsel %vm944_vm8, %v4290_v46, -inf  ;;  %v4348_v21 = vrot.slane %v4347_v25, 4  ;;  %v4354_v61 = vsel %vm4262_vm4, %v3656_v43, -inf  ;;  %v4361_v57 = vsel %vm4262_vm4, %v3655_v60, -inf }
 0x52d   : > { %v5170_v6 = vmax.f32 %v8131_v48, %v8117_v62  ;;  %v5416_v14 = vsel %vm5415_vm5, %v5164_v26, %v5161_v35  ;;  %v4355_v37 = vrot.slane %v4354_v61, 4  ;;  %v4362_v9 = vrot.slane %v4361_v57, 4 }
 0x52e   : > { %v5418_v12 = vsel %vm5417_vm9, %v5167_v55, %v5416_v14  ;;  %v4349_v54 = vmax.f32 %v4347_v25, %v4348_v21  ;;  %v4368_v7 = vsel %vm4262_vm4, %v3657_v59, -inf  ;;  %v3621_v47 = vrot.slane %v3607_v33, %v8087_v0 }
 0x52f   : > { %v4356_v16 = vmax.f32 %v4354_v61, %v4355_v37  ;;  %v4363_v28 = vmax.f32 %v4361_v57, %v4362_v9  ;;  %v4369_v50 = vrot.slane %v4368_v7, 4  ;;  %v3622_v36 = vcombine.high %v3614_v31, %v3614_v31 }
 0x530   : > { %v4350_v18 = vrot.slane %v4349_v54, 2  ;;  %v3623_v23 = vcombine.high %v3621_v47, %v3621_v47  ;;  %v4291_v20 = vsel %vm4262_vm4, %v3614_v31, -inf  ;;  %v4305_v17 = vsel %vm4262_vm4, %v3621_v47, -inf }
 0x531   : > { %v4357_v27 = vrot.slane %v4356_v16, 2  ;;  %v4364_v38 = vrot.slane %v4363_v28, 2  ;;  %v4370_v52 = vmax.f32 %v4368_v7, %v4369_v50  ;;  %v4292_v42 = vrot.slane %v4291_v20, 4  ;;  %v5981_v63 = vpop.f32.mrb[20].mxu0 }
 0x532   : > { %v4351_v3 = vmax.f32 %v4349_v54, %v4350_v18  ;;  %v4298_v56 = vsel %vm4262_vm4, %v3622_v36, -inf  ;;  %v4306_v24 = vrot.slane %v4305_v17, 4  ;;  %v4312_v58 = vsel %vm4262_vm4, %v3623_v23, -inf  ;;  %v3415_v15 = vpop.f32.mrb[21].mxu0 }
 0x533   : > { %v4358_v49 = vmax.f32 %v4356_v16, %v4357_v27  ;;  %v4365_v34 = vmax.f32 %v4363_v28, %v4364_v38  ;;  %v4371_v41 = vrot.slane %v4370_v52, 2  ;;  %v4293_v5 = vmax.f32 %v4291_v20, %v4292_v42  ;;  %v5982_v2 = vpop.f32.mrb[22].mxu0 }
 0x534   : > { %v4352_v29 = vrot.slane %v4351_v3, 1  ;;  %v4299_v51 = vrot.slane %v4298_v56, 4  ;;  %v4307_v32 = vmax.f32 %v4305_v17, %v4306_v24  ;;  %v4313_v39 = vrot.slane %v4312_v58, 4  ;;  %v3418_v45 = vpop.f32.mrb[23].mxu0 }
 0x535   : > { %v4359_v44 = vrot.slane %v4358_v49, 1  ;;  %v4366_v30 = vrot.slane %v4365_v34, 1  ;;  %v4372_v4 = vmax.f32 %v4370_v52, %v4371_v41  ;;  %v4294_v40 = vrot.slane %v4293_v5, 2 }
 0x536   : > { %v4353_v35 = vmax.f32 %v4351_v3, %v4352_v29  ;;  %v4300_v8 = vmax.f32 %v4298_v56, %v4299_v51  ;;  %v4308_v53 = vrot.slane %v4307_v32, 2  ;;  %v4314_v19 = vmax.f32 %v4312_v58, %v4313_v39 }
 0x537   : > { %v4360_v22 = vmax.f32 %v4358_v49, %v4359_v44  ;;  %v4367_v60 = vmax.f32 %v4365_v34, %v4366_v30  ;;  %v4373_v33 = vrot.slane %v4372_v4, 1  ;;  %v4295_v31 = vmax.f32 %v4293_v5, %v4294_v40 }
 0x538   : > { %v5172_v46 = vsel %vm944_vm8, %v4353_v35, -inf  ;;  %v4301_v13 = vrot.slane %v4300_v8, 2  ;;  %v4309_v11 = vmax.f32 %v4307_v32, %v4308_v53  ;;  %v4315_v43 = vrot.slane %v4314_v19, 2 }
 0x539   : > { %v4374_v26 = vmax.f32 %v4372_v4, %v4373_v33  ;;  %v5175_v55 = vsel %vm944_vm8, %v4360_v22, -inf  ;;  %v8148_v59 = vsel %vm944_vm8, %v4367_v60, -inf  ;;  %v4296_v25 = vrot.slane %v4295_v31, 1 }
 0x53a   : > { %v4302_v21 = vmax.f32 %v4300_v8, %v4301_v13  ;;  %v4310_v61 = vrot.slane %v4309_v11, 1  ;;  %v4316_v57 = vmax.f32 %v4314_v19, %v4315_v43  ;;  %v5420_v14 = vsel %vm5419_vm11, %v5170_v6, %v5418_v12 }
 0x53b   : > { %v8155_v37 = vsel %vm944_vm8, %v4374_v26, -inf  ;;  %v4297_v9 = vmax.f32 %v4295_v31, %v4296_v25  ;;  %v3424_v54 = vadd.f32 %v5981_v63, %v8083_v1  ;;  %v3416_v7 = vadd.f32 %v8083_v1, %v3415_v15 }
 0x53c   : > { %v4303_v47 = vrot.slane %v4302_v21, 1  ;;  %v4311_v16 = vmax.f32 %v4309_v11, %v4310_v61  ;;  %v4317_v28 = vrot.slane %v4316_v57, 1  ;;  %v8160_v50 = vadd.f32 %v5982_v2, %v8083_v1 }
 0x53d   : > { %v5171_v36 = vsel %vm944_vm8, %v4297_v9, -inf  ;;  %v3532_v18 = vmax.f32 %v3424_v54, 0.0  ;;  %v3530_v62 = vmax.f32 %v3416_v7, 0.0  ;;  %v8164_v48 = vadd.f32 %v8083_v1, %v3418_v45 }
 0x53e   : > { %v4304_v6 = vmax.f32 %v4302_v21, %v4303_v47  ;;  %v4318_v12 = vmax.f32 %v4316_v57, %v4317_v28  ;;  %v5173_v23 = vmax.f32 %v5171_v36, %v5172_v46  ;;  %v8167_v20 = vsel %vm944_vm8, %v4311_v16, -inf }
 0x53f   : > { %v3692_v27 = vcombine.high %v3532_v18, %v3532_v18  ;;  %v3699_v38 = vrot.slane %v3532_v18, %v8087_v0  ;;  %v3658_v52 = vcombine.high %v3530_v62, %v3530_v62  ;;  %v3665_v56 = vrot.slane %v3530_v62, %v8087_v0 }
 0x540   : > { %v5174_v42 = vsel %vm944_vm8, %v4304_v6, -inf  ;;  %v8174_v63 = vsel %vm944_vm8, %v4318_v12, -inf  ;;  %v5422_v3 = vsel %vm5421_vm13, %v5173_v23, %v5420_v14 }
 0x541   : > { %v5176_v24 = vmax.f32 %v5174_v42, %v5175_v55  ;;  %v3706_v15 = vrot.slane %v3692_v27, %v8087_v0  ;;  %v3707_v49 = vcombine.high %v3699_v38, %v3699_v38  ;;  %v4431_v34 = vsel %vm4262_vm4, %v3699_v38, -inf }
 0x542   : > { %v3672_v41 = vrot.slane %v3658_v52, %v8087_v0  ;;  %v3673_v5 = vcombine.high %v3665_v56, %v3665_v56  ;;  %v4375_v2 = vsel %vm4262_vm4, %v3665_v56, -inf  ;;  %v4432_v32 = vrot.slane %v4431_v34, 4 }
 0x543   : > { %v8185_v29 = vsel %vm5423_vm15, %v5176_v24, %v5422_v3  ;;  %v3708_v51 = vcombine.high %v3706_v15, %v3706_v15  ;;  %v4438_v39 = vsel %vm4262_vm4, %v3707_v49, -inf  ;;  %v4445_v44 = vsel %vm4262_vm4, %v3706_v15, -inf }
 0x544   : > { %v4439_v45 = vrot.slane %v4438_v39, 4  ;;  %v3674_v30 = vcombine.high %v3672_v41, %v3672_v41  ;;  %v4376_v4 = vrot.slane %v4375_v2, 4  ;;  %v4433_v40 = vmax.f32 %v4431_v34, %v4432_v32 }
 0x545   : > { %v4446_v35 = vrot.slane %v4445_v44, 4  ;;  %v4452_v8 = vsel %vm4262_vm4, %v3708_v51, -inf  ;;  %v4382_v53 = vsel %vm4262_vm4, %v3673_v5, -inf  ;;  %v4389_v13 = vsel %vm4262_vm4, %v3672_v41, -inf }
 0x546   : > { %v4440_v19 = vmax.f32 %v4438_v39, %v4439_v45  ;;  %v4453_v22 = vrot.slane %v4452_v8, 4  ;;  %v4377_v60 = vmax.f32 %v4375_v2, %v4376_v4  ;;  %v4383_v33 = vrot.slane %v4382_v53, 4 }
 0x547   : > { %v4434_v31 = vrot.slane %v4433_v40, 2  ;;  %v4447_v46 = vmax.f32 %v4445_v44, %v4446_v35  ;;  %v4396_v11 = vsel %vm4262_vm4, %v3674_v30, -inf  ;;  %v4390_v57 = vrot.slane %v4389_v13, 4 }
 0x548   : > { %v4441_v43 = vrot.slane %v4440_v19, 2  ;;  %v4454_v26 = vmax.f32 %v4452_v8, %v4453_v22  ;;  %v4378_v55 = vrot.slane %v4377_v60, 2  ;;  %v4384_v25 = vmax.f32 %v4382_v53, %v4383_v33 }
 0x549   : > { %v4435_v21 = vmax.f32 %v4433_v40, %v4434_v31  ;;  %v4448_v61 = vrot.slane %v4447_v46, 2  ;;  %v4397_v14 = vrot.slane %v4396_v11, 4  ;;  %v4391_v36 = vmax.f32 %v4389_v13, %v4390_v57 }
 0x54a   : > { %v4442_v9 = vmax.f32 %v4440_v19, %v4441_v43  ;;  %v4455_v54 = vrot.slane %v4454_v26, 2  ;;  %v4379_v7 = vmax.f32 %v4377_v60, %v4378_v55  ;;  %v4385_v47 = vrot.slane %v4384_v25, 2 }
 0x54b   : > { %v4436_v16 = vrot.slane %v4435_v21, 1  ;;  %v4449_v28 = vmax.f32 %v4447_v46, %v4448_v61  ;;  %v4398_v18 = vmax.f32 %v4396_v11, %v4397_v14  ;;  %v4392_v52 = vrot.slane %v4391_v36, 2 }
 0x54c   : > { %v4443_v62 = vrot.slane %v4442_v9, 1  ;;  %v4456_v6 = vmax.f32 %v4454_v26, %v4455_v54  ;;  %v4380_v12 = vrot.slane %v4379_v7, 1  ;;  %v4386_v23 = vmax.f32 %v4384_v25, %v4385_v47 }
 0x54d   : > { %v4437_v27 = vmax.f32 %v4435_v21, %v4436_v16  ;;  %v4450_v38 = vrot.slane %v4449_v28, 1  ;;  %v4399_v42 = vrot.slane %v4398_v18, 2  ;;  %v4393_v41 = vmax.f32 %v4391_v36, %v4392_v52 }
 0x54e   : > { %v4444_v3 = vmax.f32 %v4442_v9, %v4443_v62  ;;  %v4457_v56 = vrot.slane %v4456_v6, 1  ;;  %v4381_v24 = vmax.f32 %v4379_v7, %v4380_v12  ;;  %v4387_v15 = vrot.slane %v4386_v23, 1 }
 0x54f   : > { %v4451_v49 = vmax.f32 %v4449_v28, %v4450_v38  ;;  %v5184_v34 = vsel %vm944_vm8, %v4437_v27, -inf  ;;  %v4400_v5 = vmax.f32 %v4398_v18, %v4399_v42  ;;  %v4394_v44 = vrot.slane %v4393_v41, 1 }
 0x550   : > { %v4458_v2 = vmax.f32 %v4456_v6, %v4457_v56  ;;  %v5187_v51 = vsel %vm944_vm8, %v4444_v3, -inf  ;;  %v4388_v32 = vmax.f32 %v4386_v23, %v4387_v15  ;;  %v5183_v39 = vsel %vm944_vm8, %v4381_v24, -inf }
 0x551   : > { %v5190_v45 = vsel %vm944_vm8, %v4451_v49, -inf  ;;  %v4401_v30 = vrot.slane %v4400_v5, 1  ;;  %v5185_v4 = vmax.f32 %v5183_v39, %v5184_v34  ;;  %v5985_v40 = vpop.f32.mrb[24].mxu0  ;;  %v3533_v53 = vmax.f32 %v8160_v50, 0.0 }
 0x552   : > { %v8198_v35 = vsel %vm944_vm8, %v4458_v2, -inf  ;;  %v5186_v8 = vsel %vm944_vm8, %v4388_v32, -inf  ;;  %v3531_v19 = vmax.f32 %v8164_v48, 0.0  ;;  %v8203_v22 = vpop.f32.mrb[25].mxu0  ;;  %v4395_v60 = vmax.f32 %v4393_v41, %v4394_v44 }
 0x553   : > { %v4402_v33 = vmax.f32 %v4400_v5, %v4401_v30  ;;  %v5188_v31 = vmax.f32 %v5186_v8, %v5187_v51  ;;  %v3440_v46 = vadd.f32 %v5985_v40, %v8083_v1  ;;  %v8206_v13 = vpop.f32.mrb[26].mxu0  ;;  %v3709_v11 = vcombine.high %v3533_v53, %v3533_v53 }
 0x554   : > { %v3716_v43 = vrot.slane %v3533_v53, %v8087_v0  ;;  %v3675_v26 = vcombine.high %v3531_v19, %v3531_v19  ;;  %v3682_v55 = vrot.slane %v3531_v19, %v8087_v0  ;;  %v8210_v25 = vpop.f32.mrb[27].mxu0  ;;  %v5189_v50 = vsel %vm944_vm8, %v4395_v60, -inf }
 0x555   : > { %v8214_v48 = vsel %vm944_vm8, %v4402_v33, -inf  ;;  %v5429_v21 = vsel %vm5415_vm5, %v5188_v31, %v5185_v4  ;;  %v8217_v61 = vmax.f32 %v3440_v46, 0.0  ;;  %v5191_v57 = vmax.f32 %v5189_v50, %v5190_v45 }
 0x556   : > { %v5194_v14 = vmax.f32 %v8214_v48, %v8198_v35  ;;  %v3723_v9 = vrot.slane %v3709_v11, %v8087_v0  ;;  %v3724_v54 = vcombine.high %v3716_v43, %v3716_v43  ;;  %v4459_v7 = vsel %vm4262_vm4, %v3716_v43, -inf }
 0x557   : > { %v3689_v47 = vrot.slane %v3675_v26, %v8087_v0  ;;  %v3690_v16 = vcombine.high %v3682_v55, %v3682_v55  ;;  %v4403_v28 = vsel %vm4262_vm4, %v3682_v55, -inf  ;;  %v8226_v36 = vsel %vm5417_vm9, %v5191_v57, %v5429_v21 }
 0x558   : > { %v3725_v18 = vcombine.high %v3723_v9, %v3723_v9  ;;  %v4460_v62 = vrot.slane %v4459_v7, 4  ;;  %v4466_v6 = vsel %vm4262_vm4, %v3724_v54, -inf  ;;  %v4473_v23 = vsel %vm4262_vm4, %v3723_v9, -inf }
 0x559   : > { %v4467_v12 = vrot.slane %v4466_v6, 4  ;;  %v3691_v27 = vcombine.high %v3689_v47, %v3689_v47  ;;  %v4404_v38 = vrot.slane %v4403_v28, 4  ;;  %v4474_v42 = vrot.slane %v4473_v23, 4 }
 0x55a   : > { %v4461_v52 = vmax.f32 %v4459_v7, %v4460_v62  ;;  %v4480_v3 = vsel %vm4262_vm4, %v3725_v18, -inf  ;;  %v4410_v56 = vsel %vm4262_vm4, %v3690_v16, -inf  ;;  %v4417_v2 = vsel %vm4262_vm4, %v3689_v47, -inf }
 0x55b   : > { %v4468_v24 = vmax.f32 %v4466_v6, %v4467_v12  ;;  %v4481_v15 = vrot.slane %v4480_v3, 4  ;;  %v4405_v49 = vmax.f32 %v4403_v28, %v4404_v38  ;;  %v4411_v34 = vrot.slane %v4410_v56, 4 }
 0x55c   : > { %v4462_v41 = vrot.slane %v4461_v52, 2  ;;  %v4475_v5 = vmax.f32 %v4473_v23, %v4474_v42  ;;  %v4424_v51 = vsel %vm4262_vm4, %v3691_v27, -inf  ;;  %v4418_v40 = vrot.slane %v4417_v2, 4 }
 0x55d   : > { %v4469_v32 = vrot.slane %v4468_v24, 2  ;;  %v4482_v39 = vmax.f32 %v4480_v3, %v4481_v15  ;;  %v4406_v45 = vrot.slane %v4405_v49, 2  ;;  %v4412_v44 = vmax.f32 %v4410_v56, %v4411_v34 }
 0x55e   : > { %v4463_v30 = vmax.f32 %v4461_v52, %v4462_v41  ;;  %v4476_v4 = vrot.slane %v4475_v5, 2  ;;  %v4425_v8 = vrot.slane %v4424_v51, 4  ;;  %v4419_v11 = vmax.f32 %v4417_v2, %v4418_v40 }
 0x55f   : > { %v4470_v53 = vmax.f32 %v4468_v24, %v4469_v32  ;;  %v4483_v19 = vrot.slane %v4482_v39, 2  ;;  %v4407_v60 = vmax.f32 %v4405_v49, %v4406_v45  ;;  %v4413_v33 = vrot.slane %v4412_v44, 2 }
 0x560   : > { %v4464_v31 = vrot.slane %v4463_v30, 1  ;;  %v4477_v46 = vmax.f32 %v4475_v5, %v4476_v4  ;;  %v4426_v43 = vmax.f32 %v4424_v51, %v4425_v8  ;;  %v4420_v54 = vrot.slane %v4419_v11, 2 }
 0x561   : > { %v4471_v26 = vrot.slane %v4470_v53, 1  ;;  %v4484_v55 = vmax.f32 %v4482_v39, %v4483_v19  ;;  %v4408_v50 = vrot.slane %v4407_v60, 1  ;;  %v4414_v21 = vmax.f32 %v4412_v44, %v4413_v33 }
 0x562   : > { %v4465_v57 = vmax.f32 %v4463_v30, %v4464_v31  ;;  %v4478_v9 = vrot.slane %v4477_v46, 1  ;;  %v4427_v7 = vrot.slane %v4426_v43, 2  ;;  %v4421_v12 = vmax.f32 %v4419_v11, %v4420_v54 }
 0x563   : > { %v4472_v47 = vmax.f32 %v4470_v53, %v4471_v26  ;;  %v4485_v16 = vrot.slane %v4484_v55, 1  ;;  %v4409_v28 = vmax.f32 %v4407_v60, %v4408_v50  ;;  %v4415_v18 = vrot.slane %v4414_v21, 1 }
 0x564   : > { %v4479_v62 = vmax.f32 %v4477_v46, %v4478_v9  ;;  %v5196_v6 = vsel %vm944_vm8, %v4465_v57, -inf  ;;  %v4428_v23 = vmax.f32 %v4426_v43, %v4427_v7  ;;  %v4422_v56 = vrot.slane %v4421_v12, 1 }
 0x565   : > { %v4486_v27 = vmax.f32 %v4484_v55, %v4485_v16  ;;  %v5199_v38 = vsel %vm944_vm8, %v4472_v47, -inf  ;;  %v4416_v52 = vmax.f32 %v4414_v21, %v4415_v18  ;;  %v5195_v42 = vsel %vm944_vm8, %v4409_v28, -inf }
 0x566   : > { %v8238_v3 = vsel %vm944_vm8, %v4479_v62, -inf  ;;  %v4429_v24 = vrot.slane %v4428_v23, 1  ;;  %v5197_v15 = vmax.f32 %v5195_v42, %v5196_v6  ;;  %v5431_v41 = vsel %vm5419_vm11, %v5194_v14, %v8226_v36 }
 0x567   : > { %v8241_v49 = vsel %vm944_vm8, %v4486_v27, -inf  ;;  %v5198_v34 = vsel %vm944_vm8, %v4416_v52, -inf  ;;  %v3760_v5 = vcombine.high %v8217_v61, %v8217_v61  ;;  %v4423_v2 = vmax.f32 %v4421_v12, %v4422_v56 }
 0x568   : > { %v4430_v51 = vmax.f32 %v4428_v23, %v4429_v24  ;;  %v5200_v32 = vmax.f32 %v5198_v34, %v5199_v38  ;;  %v5432_v39 = vsel %vm5421_vm13, %v5197_v15, %v5431_v41  ;;  %v3767_v45 = vrot.slane %v8217_v61, %v8087_v0 }
 0x569   : > { %v3774_v44 = vrot.slane %v3760_v5, %v8087_v0  ;;  %v3432_v30 = vadd.f32 %v8083_v1, %v8203_v22  ;;  %v3443_v35 = vadd.f32 %v8206_v13, %v8083_v1  ;;  %v8260_v48 = vsel %vm944_vm8, %v4423_v2, -inf }
 0x56a   : > { %v8263_v14 = vsel %vm944_vm8, %v4430_v51, -inf  ;;  %v8266_v36 = vsel %vm5423_vm15, %v5200_v32, %v5432_v39  ;;  %v8270_v61 = vadd.f32 %v8083_v1, %v8210_v25  ;;  %v3775_v13 = vcombine.high %v3767_v45, %v3767_v45 }
 0x56b   : > { %v3776_v40 = vcombine.high %v3774_v44, %v3774_v44  ;;  %v4543_v8 = vsel %vm4262_vm4, %v3767_v45, -inf  ;;  %v4557_v53 = vsel %vm4262_vm4, %v3774_v44, -inf  ;;  %v3534_v19 = vmax.f32 %v3432_v30, 0.0 }
 0x56c   : > { %v3537_v60 = vmax.f32 %v3443_v35, 0.0  ;;  %v4544_v33 = vrot.slane %v4543_v8, 4  ;;  %v4550_v31 = vsel %vm4262_vm4, %v3775_v13, -inf  ;;  %v4558_v46 = vrot.slane %v4557_v53, 4 }
 0x56d   : > { %v4564_v25 = vsel %vm4262_vm4, %v3776_v40, -inf  ;;  %v4551_v11 = vrot.slane %v4550_v31, 4  ;;  %v3726_v26 = vcombine.high %v3534_v19, %v3534_v19  ;;  %v3733_v55 = vrot.slane %v3534_v19, %v8087_v0 }
 0x56e   : > { %v4565_v43 = vrot.slane %v4564_v25, 4  ;;  %v4545_v50 = vmax.f32 %v4543_v8, %v4544_v33  ;;  %v4559_v21 = vmax.f32 %v4557_v53, %v4558_v46  ;;  %v3777_v57 = vcombine.high %v3537_v60, %v3537_v60 }
 0x56f   : > { %v3784_v9 = vrot.slane %v3537_v60, %v8087_v0  ;;  %v4552_v54 = vmax.f32 %v4550_v31, %v4551_v11  ;;  %v3740_v47 = vrot.slane %v3726_v26, %v8087_v0  ;;  %v3741_v16 = vcombine.high %v3733_v55, %v3733_v55 }
 0x570   : > { %v4566_v7 = vmax.f32 %v4564_v25, %v4565_v43  ;;  %v4546_v28 = vrot.slane %v4545_v50, 2  ;;  %v4560_v18 = vrot.slane %v4559_v21, 2  ;;  %v4487_v62 = vsel %vm4262_vm4, %v3733_v55, -inf }
 0x571   : > { %v8285_v6 = vrot.slane %v3777_v57, %v8087_v0  ;;  %v8287_v12 = vpop.f32.mrb[28].mxu0  ;;  %v4553_v23 = vrot.slane %v4552_v54, 2  ;;  %v3742_v38 = vcombine.high %v3740_v47, %v3740_v47  ;;  %v4488_v52 = vrot.slane %v4487_v62, 4 }
 0x572   : > { %v4567_v27 = vrot.slane %v4566_v7, 2  ;;  %v8289_v42 = vpop.f32.mrb[29].mxu0  ;;  %v4547_v56 = vmax.f32 %v4545_v50, %v4546_v28  ;;  %v4561_v24 = vmax.f32 %v4559_v21, %v4560_v18  ;;  %v4494_v15 = vsel %vm4262_vm4, %v3741_v16, -inf }
 0x573   : > { %v4501_v34 = vsel %vm4262_vm4, %v3740_v47, -inf  ;;  %v8293_v41 = vpop.f32.mrb[30].mxu0  ;;  %v4554_v5 = vmax.f32 %v4552_v54, %v4553_v23  ;;  %v4489_v51 = vmax.f32 %v4487_v62, %v4488_v52  ;;  %v4495_v32 = vrot.slane %v4494_v15, 4 }
 0x574   : > { %v4568_v2 = vmax.f32 %v4566_v7, %v4567_v27  ;;  %v8295_v39 = vpop.f32.mrb[31].mxu0  ;;  %v4548_v45 = vrot.slane %v4547_v56, 1  ;;  %v4562_v44 = vrot.slane %v4561_v24, 1  ;;  %v4502_v30 = vrot.slane %v4501_v34, 4 }
 0x575   : > { %v4508_v35 = vsel %vm4262_vm4, %v3742_v38, -inf  ;;  %v4555_v13 = vrot.slane %v4554_v5, 1  ;;  %v4490_v8 = vrot.slane %v4489_v51, 2  ;;  %v4496_v53 = vmax.f32 %v4494_v15, %v4495_v32 }
 0x576   : > { %v4569_v40 = vrot.slane %v4568_v2, 1  ;;  %v4549_v19 = vmax.f32 %v4547_v56, %v4548_v45  ;;  %v4563_v60 = vmax.f32 %v4561_v24, %v4562_v44  ;;  %v4503_v33 = vmax.f32 %v4501_v34, %v4502_v30 }
 0x577   : > { %v4509_v31 = vrot.slane %v4508_v35, 4  ;;  %v4556_v46 = vmax.f32 %v4554_v5, %v4555_v13  ;;  %v4491_v11 = vmax.f32 %v4489_v51, %v4490_v8  ;;  %v4497_v43 = vrot.slane %v4496_v53, 2 }
 0x578   : > { %v4570_v25 = vmax.f32 %v4568_v2, %v4569_v40  ;;  %v5208_v26 = vsel %vm944_vm8, %v4549_v19, -inf  ;;  %v5214_v55 = vsel %vm944_vm8, %v4563_v60, -inf  ;;  %v4504_v50 = vrot.slane %v4503_v33, 2 }
 0x579   : > { %v4510_v21 = vmax.f32 %v4508_v35, %v4509_v31  ;;  %v5211_v57 = vsel %vm944_vm8, %v4556_v46, -inf  ;;  %v4492_v7 = vrot.slane %v4491_v11, 1  ;;  %v4498_v47 = vmax.f32 %v4496_v53, %v4497_v43 }
 0x57a   : > { %v5217_v54 = vsel %vm944_vm8, %v4570_v25, -inf  ;;  %v4505_v16 = vmax.f32 %v4503_v33, %v4504_v50  ;;  %v3792_v18 = vcombine.high %v3784_v9, %v3784_v9  ;;  %v3793_v62 = vcombine.high %v8285_v6, %v8285_v6 }
 0x57b   : > { %v4511_v28 = vrot.slane %v4510_v21, 2  ;;  %v4493_v23 = vmax.f32 %v4491_v11, %v4492_v7  ;;  %v4499_v27 = vrot.slane %v4498_v47, 1  ;;  %v4571_v38 = vsel %vm4262_vm4, %v3784_v9, -inf }
 0x57c   : > { %v4585_v52 = vsel %vm4262_vm4, %v8285_v6, -inf  ;;  %v4506_v56 = vrot.slane %v4505_v16, 1  ;;  %v4572_v15 = vrot.slane %v4571_v38, 4  ;;  %v4578_v34 = vsel %vm4262_vm4, %v3792_v18, -inf }
 0x57d   : > { %v4512_v24 = vmax.f32 %v4510_v21, %v4511_v28  ;;  %v4500_v5 = vmax.f32 %v4498_v47, %v4499_v27  ;;  %v5207_v2 = vsel %vm944_vm8, %v4493_v23, -inf  ;;  %v4579_v51 = vrot.slane %v4578_v34, 4 }
 0x57e   : > { %v4586_v32 = vrot.slane %v4585_v52, 4  ;;  %v4507_v45 = vmax.f32 %v4505_v16, %v4506_v56  ;;  %v5209_v30 = vmax.f32 %v5207_v2, %v5208_v26  ;;  %v4573_v35 = vmax.f32 %v4571_v38, %v4572_v15 }
 0x57f   : > { %v4513_v44 = vrot.slane %v4512_v24, 1  ;;  %v5210_v13 = vsel %vm944_vm8, %v4500_v5, -inf  ;;  %v4580_v9 = vmax.f32 %v4578_v34, %v4579_v51  ;;  %v4592_v6 = vsel %vm4262_vm4, %v3793_v62, -inf }
 0x580   : > { %v4587_v40 = vmax.f32 %v4585_v52, %v4586_v32  ;;  %v5212_v53 = vmax.f32 %v5210_v13, %v5211_v57  ;;  %v5213_v19 = vsel %vm944_vm8, %v4507_v45, -inf  ;;  %v4574_v60 = vrot.slane %v4573_v35, 2 }
 0x581   : > { %v4514_v8 = vmax.f32 %v4512_v24, %v4513_v44  ;;  %v5215_v33 = vmax.f32 %v5213_v19, %v5214_v55  ;;  %v4581_v31 = vrot.slane %v4580_v9, 2  ;;  %v4593_v25 = vrot.slane %v4592_v6, 4 }
 0x582   : > { %v4588_v46 = vrot.slane %v4587_v40, 2  ;;  %v5436_v43 = vsel %vm5415_vm5, %v5212_v53, %v5209_v30  ;;  %v4575_v26 = vmax.f32 %v4573_v35, %v4574_v60  ;;  %v3535_v50 = vmax.f32 %v8270_v61, 0.0 }
 0x583   : > { %v5216_v11 = vsel %vm944_vm8, %v4514_v8, -inf  ;;  %v5437_v7 = vsel %vm5417_vm9, %v5215_v33, %v5436_v43  ;;  %v4582_v47 = vmax.f32 %v4580_v9, %v4581_v31  ;;  %v4594_v28 = vmax.f32 %v4592_v6, %v4593_v25 }
 0x584   : > { %v5218_v21 = vmax.f32 %v5216_v11, %v5217_v54  ;;  %v4589_v16 = vmax.f32 %v4587_v40, %v4588_v46  ;;  %v4576_v57 = vrot.slane %v4575_v26, 1  ;;  %v3743_v18 = vcombine.high %v3535_v50, %v3535_v50 }
 0x585   : > { %v3750_v55 = vrot.slane %v3535_v50, %v8087_v0  ;;  %v4583_v62 = vrot.slane %v4582_v47, 1  ;;  %v3456_v38 = vadd.f32 %v8287_v12, %v8083_v1  ;;  %v4595_v61 = vrot.slane %v4594_v28, 2 }
 0x586   : > { %v4590_v23 = vrot.slane %v4589_v16, 1  ;;  %v8318_v27 = vsel %vm5419_vm11, %v5218_v21, %v5437_v7  ;;  %v4577_v52 = vmax.f32 %v4575_v26, %v4576_v57  ;;  %v3757_v54 = vrot.slane %v3743_v18, %v8087_v0 }
 0x587   : > { %v3758_v56 = vcombine.high %v3750_v55, %v3750_v55  ;;  %v4584_v24 = vmax.f32 %v4582_v47, %v4583_v62  ;;  %v4515_v34 = vsel %vm4262_vm4, %v3750_v55, -inf  ;;  %v3540_v5 = vmax.f32 %v3456_v38, 0.0 }
 0x588   : > { %v4591_v15 = vmax.f32 %v4589_v16, %v4590_v23  ;;  %v4596_v2 = vmax.f32 %v4594_v28, %v4595_v61  ;;  %v8325_v51 = vsel %vm944_vm8, %v4577_v52, -inf  ;;  %v3759_v32 = vcombine.high %v3757_v54, %v3757_v54 }
 0x589   : > { %v4516_v45 = vrot.slane %v4515_v34, 4  ;;  %v8328_v44 = vsel %vm944_vm8, %v4584_v24, -inf  ;;  %v4522_v30 = vsel %vm4262_vm4, %v3758_v56, -inf  ;;  %v4529_v35 = vsel %vm4262_vm4, %v3757_v54, -inf }
 0x58a   : > { %v8331_v12 = vsel %vm944_vm8, %v4591_v15, -inf  ;;  %v4597_v13 = vrot.slane %v4596_v2, 1  ;;  %v4523_v40 = vrot.slane %v4522_v30, 4  ;;  %v4530_v6 = vrot.slane %v4529_v35, 4 }
 0x58b   : > { %v4517_v9 = vmax.f32 %v4515_v34, %v4516_v45  ;;  %v4536_v8 = vsel %vm4262_vm4, %v3759_v32, -inf  ;;  %v3828_v53 = vcombine.high %v3540_v5, %v3540_v5  ;;  %v3835_v19 = vrot.slane %v3540_v5, %v8087_v0 }
 0x58c   : > { %v3448_v60 = vadd.f32 %v8083_v1, %v8289_v42  ;;  %v4598_v33 = vmax.f32 %v4596_v2, %v4597_v13  ;;  %v4524_v46 = vmax.f32 %v4522_v30, %v4523_v40  ;;  %v4531_v25 = vmax.f32 %v4529_v35, %v4530_v6 }
 0x58d   : > { %v4518_v31 = vrot.slane %v4517_v9, 2  ;;  %v4537_v11 = vrot.slane %v4536_v8, 4  ;;  %v3842_v43 = vrot.slane %v3828_v53, %v8087_v0  ;;  %v3843_v26 = vcombine.high %v3835_v19, %v3835_v19 }
 0x58e   : > { %v4655_v50 = vsel %vm4262_vm4, %v3835_v19, -inf  ;;  %v8342_v21 = vsel %vm944_vm8, %v4598_v33, -inf  ;;  %v4525_v47 = vrot.slane %v4524_v46, 2  ;;  %v4532_v16 = vrot.slane %v4531_v25, 2 }
 0x58f   : > { %8978 = vst [vmem:[#allocation6_spill] sm:$0xff] %v8342_v21  ;;  %v4519_v7 = vmax.f32 %v4517_v9, %v4518_v31  ;;  %v4538_v57 = vmax.f32 %v4536_v8, %v4537_v11  ;;  %v3844_v28 = vcombine.high %v3842_v43, %v3842_v43  ;;  %v4656_v18 = vrot.slane %v4655_v50, 4 }
 0x590   : > { %v4662_v1 = vsel %vm4262_vm4, %v3843_v26, -inf  ;;  %v4526_v55 = vmax.f32 %v4524_v46, %v4525_v47  ;;  %v4533_v62 = vmax.f32 %v4531_v25, %v4532_v16  ;;  %v4669_v54 = vsel %vm4262_vm4, %v3842_v43, -inf }
 0x591   : > { %v4520_v42 = vrot.slane %v4519_v7, 1  ;;  %v4663_v23 = vrot.slane %v4662_v1, 4  ;;  %v8345_v38 = vpop.f32.mrb[32].mxu0  ;;  %v4539_v52 = vrot.slane %v4538_v57, 2  ;;  %v4657_v61 = vmax.f32 %v4655_v50, %v4656_v18 }
 0x592   : > { %v4676_v56 = vsel %vm4262_vm4, %v3844_v28, -inf  ;;  %v8349_v24 = vpop.f32.mrb[33].mxu0  ;;  %v4527_v34 = vrot.slane %v4526_v55, 1  ;;  %v4534_v5 = vrot.slane %v4533_v62, 1  ;;  %v4670_v35 = vrot.slane %v4669_v54, 4 }
 0x593   : > { %v4521_v15 = vmax.f32 %v4519_v7, %v4520_v42  ;;  %v4664_v2 = vmax.f32 %v4662_v1, %v4663_v23  ;;  %v8351_v32 = vpop.f32.mrb[34].mxu0  ;;  %v4540_v45 = vmax.f32 %v4538_v57, %v4539_v52  ;;  %v4658_v30 = vrot.slane %v4657_v61, 2 }
 0x594   : > { %v4677_v13 = vrot.slane %v4676_v56, 4  ;;  %v8353_v9 = vpop.f32.mrb[35].mxu0  ;;  %v4528_v40 = vmax.f32 %v4526_v55, %v4527_v34  ;;  %v4535_v6 = vmax.f32 %v4533_v62, %v4534_v5  ;;  %v4671_v46 = vmax.f32 %v4669_v54, %v4670_v35 }
 0x595   : > { %v5219_v8 = vsel %vm944_vm8, %v4521_v15, -inf  ;;  %v4665_v53 = vrot.slane %v4664_v2, 2  ;;  %v4541_v19 = vrot.slane %v4540_v45, 1  ;;  %v4659_v31 = vmax.f32 %v4657_v61, %v4658_v30 }
 0x596   : > { %v5221_v33 = vmax.f32 %v5219_v8, %v8325_v51  ;;  %v5222_v25 = vsel %vm944_vm8, %v4528_v40, -inf  ;;  %v8359_v11 = vsel %vm944_vm8, %v4535_v6, -inf  ;;  %v4678_v26 = vmax.f32 %v4676_v56, %v4677_v13 }
 0x597   : > { %v4666_v43 = vmax.f32 %v4664_v2, %v4665_v53  ;;  %v4542_v50 = vmax.f32 %v4540_v45, %v4541_v19  ;;  %v5224_v7 = vmax.f32 %v5222_v25, %v8328_v44  ;;  %v4660_v57 = vrot.slane %v4659_v31, 1  ;;  %v8375_v44 = vld [vmem:[%s8960_s6] ss:$0 sm:$0xff] }
 0x598   : > { %v5439_v16 = vsel %vm5421_vm13, %v5221_v33, %v8318_v27  ;;  %v4672_v28 = vrot.slane %v4671_v46, 2  ;;  %v4679_v18 = vrot.slane %v4678_v26, 2  ;;  %v3538_v55 = vmax.f32 %v3448_v60, 0.0 }
 0x599   : > { %v4667_v51 = vrot.slane %v4666_v43, 1  ;;  %v8367_v1 = vsel %vm944_vm8, %v4542_v50, -inf  ;;  %v8370_v42 = vsel %vm5423_vm15, %v5224_v7, %v5439_v16  ;;  %v3459_v62 = vadd.f32 %v8375_v44, %v8293_v41 }
 0x59a   : > { %v4661_v23 = vmax.f32 %v4659_v31, %v4660_v57  ;;  %v4673_v61 = vmax.f32 %v4671_v46, %v4672_v28  ;;  %v4680_v54 = vmax.f32 %v4678_v26, %v4679_v18  ;;  %v3794_v56 = vcombine.high %v3538_v55, %v3538_v55 }
 0x59b   : > { %v4668_v52 = vmax.f32 %v4666_v43, %v4667_v51  ;;  %v3801_v15 = vrot.slane %v3538_v55, %v8087_v0  ;;  %v3541_v34 = vmax.f32 %v3459_v62, 0.0  ;;  %v8390_v41 = vadd.f32 %v8375_v44, %v8295_v39 }
 0x59c   : > { %v4674_v60 = vrot.slane %v4673_v61, 1  ;;  %v8383_v5 = vsel %vm944_vm8, %v4661_v23, -inf  ;;  %v4681_v45 = vrot.slane %v4680_v54, 1  ;;  %v3808_v30 = vrot.slane %v3794_v56, %v8087_v0 }
 0x59d   : > { %v8386_v2 = vsel %vm944_vm8, %v4668_v52, -inf  ;;  %v3809_v35 = vcombine.high %v3801_v15, %v3801_v15  ;;  %v4599_v13 = vsel %vm4262_vm4, %v3801_v15, -inf  ;;  %v3845_v8 = vcombine.high %v3541_v34, %v3541_v34 }
 0x59e   : > { %v4675_v40 = vmax.f32 %v4673_v61, %v4674_v60  ;;  %v4600_v6 = vrot.slane %v4599_v13, 4  ;;  %v3852_v53 = vrot.slane %v3541_v34, %v8087_v0  ;;  %v4682_v19 = vmax.f32 %v4680_v54, %v4681_v45 }
 0x59f   : > { %v3810_v33 = vcombine.high %v3808_v30, %v3808_v30  ;;  %v4606_v31 = vsel %vm4262_vm4, %v3809_v35, -inf  ;;  %v4613_v46 = vsel %vm4262_vm4, %v3808_v30, -inf  ;;  %v3859_v16 = vrot.slane %v3845_v8, %v8087_v0 }
 0x5a0   : > { %v8398_v39 = vsel %vm944_vm8, %v4675_v40, -inf  ;;  %v4601_v25 = vmax.f32 %v4599_v13, %v4600_v6  ;;  %v4607_v43 = vrot.slane %v4606_v31, 4  ;;  %v4614_v26 = vrot.slane %v4613_v46, 4 }
 0x5a1   : > { %v8401_v50 = vsel %vm944_vm8, %v4682_v19, -inf  ;;  %v4620_v7 = vsel %vm4262_vm4, %v3810_v33, -inf  ;;  %v3860_v57 = vcombine.high %v3852_v53, %v3852_v53  ;;  %v3861_v62 = vcombine.high %v3859_v16, %v3859_v16 }
 0x5a2   : > { %v4602_v51 = vrot.slane %v4601_v25, 2  ;;  %v4608_v28 = vmax.f32 %v4606_v31, %v4607_v43  ;;  %v4615_v18 = vmax.f32 %v4613_v46, %v4614_v26  ;;  %v4621_v55 = vrot.slane %v4620_v7, 4 }
 0x5a3   : > { %v4683_v23 = vsel %vm4262_vm4, %v3852_v53, -inf  ;;  %v4690_v52 = vsel %vm4262_vm4, %v3860_v57, -inf  ;;  %v4697_v61 = vsel %vm4262_vm4, %v3859_v16, -inf  ;;  %v4704_v35 = vsel %vm4262_vm4, %v3861_v62, -inf }
 0x5a4   : > { %v4603_v54 = vmax.f32 %v4601_v25, %v4602_v51  ;;  %v4609_v56 = vrot.slane %v4608_v28, 2  ;;  %v4616_v15 = vrot.slane %v4615_v18, 2  ;;  %v4622_v34 = vmax.f32 %v4620_v7, %v4621_v55 }
 0x5a5   : > { %v4684_v60 = vrot.slane %v4683_v23, 4  ;;  %v4691_v45 = vrot.slane %v4690_v52, 4  ;;  %v4698_v30 = vrot.slane %v4697_v61, 4  ;;  %v4705_v31 = vrot.slane %v4704_v35, 4 }
 0x5a6   : > { %v4604_v13 = vrot.slane %v4603_v54, 1  ;;  %v4610_v40 = vmax.f32 %v4608_v28, %v4609_v56  ;;  %v4617_v6 = vmax.f32 %v4615_v18, %v4616_v15  ;;  %v4623_v8 = vrot.slane %v4622_v34, 2 }
 0x5a7   : > { %v4685_v19 = vmax.f32 %v4683_v23, %v4684_v60  ;;  %v4692_v33 = vmax.f32 %v4690_v52, %v4691_v45  ;;  %v4699_v53 = vmax.f32 %v4697_v61, %v4698_v30  ;;  %v4706_v51 = vmax.f32 %v4704_v35, %v4705_v31 }
 0x5a8   : > { %v4605_v46 = vmax.f32 %v4603_v54, %v4604_v13  ;;  %v4611_v43 = vrot.slane %v4610_v40, 1  ;;  %v4618_v26 = vrot.slane %v4617_v6, 1  ;;  %v4624_v25 = vmax.f32 %v4622_v34, %v4623_v8 }
 0x5a9   : > { %v4686_v16 = vrot.slane %v4685_v19, 2  ;;  %v4693_v57 = vrot.slane %v4692_v33, 2  ;;  %v4700_v7 = vrot.slane %v4699_v53, 2  ;;  %v4707_v15 = vrot.slane %v4706_v51, 2 }
 0x5aa   : > { %v4612_v55 = vmax.f32 %v4610_v40, %v4611_v43  ;;  %v4619_v27 = vmax.f32 %v4617_v6, %v4618_v26  ;;  %v4625_v47 = vrot.slane %v4624_v25, 1  ;;  %v5231_v62 = vsel %vm944_vm8, %v4605_v46, -inf }
 0x5ab   : > { %v5233_v28 = vmax.f32 %v5231_v62, %v8383_v5  ;;  %v4687_v18 = vmax.f32 %v4685_v19, %v4686_v16  ;;  %v4694_v23 = vmax.f32 %v4692_v33, %v4693_v57  ;;  %v4701_v52 = vmax.f32 %v4699_v53, %v4700_v7 }
 0x5ac   : > { %v4626_v61 = vmax.f32 %v4624_v25, %v4625_v47  ;;  %v5234_v54 = vsel %vm944_vm8, %v4612_v55, -inf  ;;  %v5237_v56 = vsel %vm944_vm8, %v4619_v27, -inf  ;;  %v4708_v40 = vmax.f32 %v4706_v51, %v4707_v15 }
 0x5ad   : > { %v5236_v34 = vmax.f32 %v5234_v54, %v8386_v2  ;;  %v5239_v60 = vmax.f32 %v5237_v56, %v8398_v39  ;;  %v4688_v45 = vrot.slane %v4687_v18, 1  ;;  %v4695_v30 = vrot.slane %v4694_v23, 1 }
 0x5ae   : > { %v5240_v35 = vsel %vm944_vm8, %v4626_v61, -inf  ;;  %v4702_v13 = vrot.slane %v4701_v52, 1  ;;  %v3539_v5 = vmax.f32 %v8390_v41, 0.0  ;;  %v4709_v2 = vrot.slane %v4708_v40, 1 }
 0x5af   : > { %v5242_v6 = vmax.f32 %v5240_v35, %v8401_v50  ;;  %v5443_v47 = vsel %vm5415_vm5, %v5236_v34, %v5233_v28  ;;  %v4689_v8 = vmax.f32 %v4687_v18, %v4688_v45  ;;  %v4696_v19 = vmax.f32 %v4694_v23, %v4695_v30 }
 0x5b0   : > { %v5444_v27 = vsel %vm5417_vm9, %v5239_v60, %v5443_v47  ;;  %v4703_v33 = vmax.f32 %v4701_v52, %v4702_v13  ;;  %v3811_v53 = vcombine.high %v3539_v5, %v3539_v5  ;;  %v3818_v41 = vrot.slane %v3539_v5, %v8087_v0 }
 0x5b1   : > { %v8420_v39 = vpop.f32.mrb[36].mxu0  ;;  %v8423_v31 = vsel %vm944_vm8, %v4689_v8, -inf  ;;  %v8426_v46 = vsel %vm944_vm8, %v4696_v19, -inf  ;;  %v8430_v50 = vsel %vm5419_vm11, %v5242_v6, %v5444_v27  ;;  %v4710_v26 = vmax.f32 %v4708_v40, %v4709_v2 }
 0x5b2   : > { %v8432_v43 = vpop.f32.mrb[37].mxu0  ;;  %v8435_v25 = vsel %vm944_vm8, %v4703_v33, -inf  ;;  %v3825_v16 = vrot.slane %v3811_v53, %v8087_v0  ;;  %v3472_v57 = vadd.f32 %v8375_v44, %v8345_v38  ;;  %v3826_v51 = vcombine.high %v3818_v41, %v3818_v41 }
 0x5b3   : > { %v8440_v7 = vpop.f32.mrb[38].mxu0  ;;  %v4627_v55 = vsel %vm4262_vm4, %v3818_v41, -inf  ;;  %v3464_v62 = vadd.f32 %v8375_v44, %v8349_v24  ;;  %v3475_v28 = vadd.f32 %v8375_v44, %v8351_v32  ;;  %v8450_v23 = vsel %vm944_vm8, %v4710_v26, -inf }
 0x5b4   : > { %v8447_v18 = vpop.f32.mrb[39].mxu0  ;;  %8979 = vst [vmem:[#allocation7_spill] sm:$0xff] %v8450_v23  ;;  %v3827_v52 = vcombine.high %v3825_v16, %v3825_v16  ;;  %v4628_v61 = vrot.slane %v4627_v55, 4  ;;  %v4641_v38 = vsel %vm4262_vm4, %v3825_v16, -inf  ;;  %v4634_v54 = vsel %vm4262_vm4, %v3826_v51, -inf }
 0x5b5   : > { %v4642_v56 = vrot.slane %v4641_v38, 4  ;;  %v3544_v15 = vmax.f32 %v3472_v57, 0.0  ;;  %v3542_v34 = vmax.f32 %v3464_v62, 0.0  ;;  %v4635_v45 = vrot.slane %v4634_v54, 4 }
 0x5b6   : > { %v4629_v60 = vmax.f32 %v4627_v55, %v4628_v61  ;;  %v4648_v24 = vsel %vm4262_vm4, %v3827_v52, -inf  ;;  %v8455_v30 = vmax.f32 %v3475_v28, 0.0 }
 0x5b7   : > { %v4643_v32 = vmax.f32 %v4641_v38, %v4642_v56  ;;  %v4649_v35 = vrot.slane %v4648_v24, 4  ;;  %v3896_v13 = vcombine.high %v3544_v15, %v3544_v15  ;;  %v3903_v40 = vrot.slane %v3544_v15, %v8087_v0 }
 0x5b8   : > { %v4630_v5 = vrot.slane %v4629_v60, 2  ;;  %v4636_v6 = vmax.f32 %v4634_v54, %v4635_v45  ;;  %v3862_v47 = vcombine.high %v3542_v34, %v3542_v34  ;;  %v3869_v8 = vrot.slane %v3542_v34, %v8087_v0 }
 0x5b9   : > { %v4644_v19 = vrot.slane %v4643_v32, 2  ;;  %v4650_v27 = vmax.f32 %v4648_v24, %v4649_v35  ;;  %v3910_v33 = vrot.slane %v3896_v13, %v8087_v0  ;;  %v3911_v2 = vcombine.high %v3903_v40, %v3903_v40 }
 0x5ba   : > { %v4631_v53 = vmax.f32 %v4629_v60, %v4630_v5  ;;  %v4637_v41 = vrot.slane %v4636_v6, 2  ;;  %v4767_v26 = vsel %vm4262_vm4, %v3903_v40, -inf  ;;  %v3876_v16 = vrot.slane %v3862_v47, %v8087_v0 }
 0x5bb   : > { %v4645_v57 = vmax.f32 %v4643_v32, %v4644_v19  ;;  %v4651_v51 = vrot.slane %v4650_v27, 2  ;;  %v3912_v55 = vcombine.high %v3910_v33, %v3910_v33  ;;  %v4768_v62 = vrot.slane %v4767_v26, 4 }
 0x5bc   : > { %v4632_v28 = vrot.slane %v4631_v53, 1  ;;  %v4638_v52 = vmax.f32 %v4636_v6, %v4637_v41  ;;  %v4774_v61 = vsel %vm4262_vm4, %v3911_v2, -inf  ;;  %v4781_v38 = vsel %vm4262_vm4, %v3910_v33, -inf }
 0x5bd   : > { %v4646_v54 = vrot.slane %v4645_v57, 1  ;;  %v4652_v56 = vmax.f32 %v4650_v27, %v4651_v51  ;;  %v4769_v15 = vmax.f32 %v4767_v26, %v4768_v62  ;;  %v4775_v34 = vrot.slane %v4774_v61, 4 }
 0x5be   : > { %v4633_v60 = vmax.f32 %v4631_v53, %v4632_v28  ;;  %v4639_v45 = vrot.slane %v4638_v52, 1  ;;  %v4782_v24 = vrot.slane %v4781_v38, 4  ;;  %v4788_v35 = vsel %vm4262_vm4, %v3912_v55, -inf }
 0x5bf   : > { %v4647_v13 = vmax.f32 %v4645_v57, %v4646_v54  ;;  %v4653_v32 = vrot.slane %v4652_v56, 1  ;;  %v4770_v40 = vrot.slane %v4769_v15, 2  ;;  %v4776_v5 = vmax.f32 %v4774_v61, %v4775_v34 }
 0x5c0   : > { %v4640_v47 = vmax.f32 %v4638_v52, %v4639_v45  ;;  %v5243_v6 = vsel %vm944_vm8, %v4633_v60, -inf  ;;  %v4783_v19 = vmax.f32 %v4781_v38, %v4782_v24  ;;  %v4789_v2 = vrot.slane %v4788_v35, 4 }
 0x5c1   : > { %v4654_v41 = vmax.f32 %v4652_v56, %v4653_v32  ;;  %v5245_v33 = vmax.f32 %v5243_v6, %v8423_v31  ;;  %v8468_v27 = vsel %vm944_vm8, %v4647_v13, -inf  ;;  %v4771_v53 = vmax.f32 %v4769_v15, %v4770_v40 }
 0x5c2   : > { %v5246_v26 = vsel %vm944_vm8, %v4640_v47, -inf  ;;  %v4777_v51 = vrot.slane %v4776_v5, 2  ;;  %v4784_v55 = vrot.slane %v4783_v19, 2  ;;  %v4790_v56 = vmax.f32 %v4788_v35, %v4789_v2 }
 0x5c3   : > { %v5248_v62 = vmax.f32 %v5246_v26, %v8426_v46  ;;  %v8475_v28 = vsel %vm944_vm8, %v4654_v41, -inf  ;;  %v5446_v52 = vsel %vm5421_vm13, %v5245_v33, %v8430_v50  ;;  %v4772_v31 = vrot.slane %v4771_v53, 1 }
 0x5c4   : > { %8980 = vst [vmem:[#allocation8_spill] sm:$0xff] %v8475_v28  ;;  %v4778_v38 = vmax.f32 %v4776_v5, %v4777_v51  ;;  %v4785_v54 = vmax.f32 %v4783_v19, %v4784_v55  ;;  %v3877_v60 = vcombine.high %v3869_v8, %v3869_v8  ;;  %v3878_v45 = vcombine.high %v3876_v16, %v3876_v16 }
 0x5c5   : > { %v8482_v15 = vsel %vm5423_vm15, %v5248_v62, %v5446_v52  ;;  %v4773_v34 = vmax.f32 %v4771_v53, %v4772_v31  ;;  %v4791_v13 = vrot.slane %v4790_v56, 2  ;;  %v4711_v32 = vsel %vm4262_vm4, %v3869_v8, -inf }
 0x5c6   : > { %v4779_v46 = vrot.slane %v4778_v38, 1  ;;  %v4786_v24 = vrot.slane %v4785_v54, 1  ;;  %v4712_v40 = vrot.slane %v4711_v32, 4  ;;  %v4718_v47 = vsel %vm4262_vm4, %v3877_v60, -inf }
 0x5c7   : > { %v8486_v50 = vsel %vm944_vm8, %v4773_v34, -inf  ;;  %v4725_v5 = vsel %vm4262_vm4, %v3876_v16, -inf  ;;  %v4792_v19 = vmax.f32 %v4790_v56, %v4791_v13  ;;  %v4719_v2 = vrot.slane %v4718_v47, 4 }
 0x5c8   : > { %v4780_v35 = vmax.f32 %v4778_v38, %v4779_v46  ;;  %v4787_v6 = vmax.f32 %v4785_v54, %v4786_v24  ;;  %v4713_v41 = vmax.f32 %v4711_v32, %v4712_v40  ;;  %v4726_v33 = vrot.slane %v4725_v5, 4 }
 0x5c9   : > { %v4732_v53 = vsel %vm4262_vm4, %v3878_v45, -inf  ;;  %v3913_v26 = vcombine.high %v8455_v30, %v8455_v30  ;;  %v4793_v8 = vrot.slane %v4792_v19, 1  ;;  %v4720_v62 = vmax.f32 %v4718_v47, %v4719_v2 }
 0x5ca   : > { %v5259_v51 = vsel %vm944_vm8, %v4780_v35, -inf  ;;  %v8495_v55 = vsel %vm944_vm8, %v4787_v6, -inf  ;;  %v4714_v52 = vrot.slane %v4713_v41, 2  ;;  %v4727_v16 = vmax.f32 %v4725_v5, %v4726_v33 }
 0x5cb   : > { %v4733_v31 = vrot.slane %v4732_v53, 4  ;;  %v3920_v38 = vrot.slane %v8455_v30, %v8087_v0  ;;  %v4794_v54 = vmax.f32 %v4792_v19, %v4793_v8  ;;  %v4721_v56 = vrot.slane %v4720_v62, 2 }
 0x5cc   : > { %v3927_v34 = vrot.slane %v3913_v26, %v8087_v0  ;;  %v3467_v60 = vadd.f32 %v8375_v44, %v8353_v9  ;;  %v4715_v46 = vmax.f32 %v4713_v41, %v4714_v52  ;;  %v4728_v24 = vrot.slane %v4727_v16, 2 }
 0x5cd   : > { %v8502_v45 = vpop.f32.mrb[40].mxu0  ;;  %v4734_v13 = vmax.f32 %v4732_v53, %v4733_v31  ;;  %v3928_v32 = vcombine.high %v3920_v38, %v3920_v38  ;;  %v5265_v47 = vsel %vm944_vm8, %v4794_v54, -inf  ;;  %v4722_v5 = vmax.f32 %v4720_v62, %v4721_v56 }
 0x5ce   : > { %v8504_v40 = vpop.f32.mrb[41].mxu0  ;;  %v3929_v35 = vcombine.high %v3927_v34, %v3927_v34  ;;  %v4795_v30 = vsel %vm4262_vm4, %v3920_v38, -inf  ;;  %v4716_v19 = vrot.slane %v4715_v46, 1  ;;  %v4729_v2 = vmax.f32 %v4727_v16, %v4728_v24 }
 0x5cf   : > { %v8508_v6 = vpop.f32.mrb[42].mxu0  ;;  %v4735_v33 = vrot.slane %v4734_v13, 2  ;;  %v4796_v9 = vrot.slane %v4795_v30, 4  ;;  %v4723_v41 = vrot.slane %v4722_v5, 1  ;;  %v4802_v53 = vsel %vm4262_vm4, %v3928_v32, -inf }
 0x5d0   : > { %v8510_v26 = vpop.f32.mrb[43].mxu0  ;;  %v4809_v8 = vsel %vm4262_vm4, %v3927_v34, -inf  ;;  %v4816_v52 = vsel %vm4262_vm4, %v3929_v35, -inf  ;;  %v4717_v31 = vmax.f32 %v4715_v46, %v4716_v19  ;;  %v4730_v62 = vrot.slane %v4729_v2, 1 }
 0x5d1   : > { %v4736_v54 = vmax.f32 %v4734_v13, %v4735_v33  ;;  %v4797_v56 = vmax.f32 %v4795_v30, %v4796_v9  ;;  %v4724_v38 = vmax.f32 %v4722_v5, %v4723_v41  ;;  %v4803_v61 = vrot.slane %v4802_v53, 4 }
 0x5d2   : > { %v4810_v57 = vrot.slane %v4809_v8, 4  ;;  %v4817_v22 = vrot.slane %v4816_v52, 4  ;;  %v4731_v16 = vmax.f32 %v4729_v2, %v4730_v62  ;;  %v5255_v4 = vsel %vm944_vm8, %v4717_v31, -inf }
 0x5d3   : > { %v4737_v24 = vrot.slane %v4736_v54, 1  ;;  %v4798_v58 = vrot.slane %v4797_v56, 2  ;;  %v5257_v17 = vmax.f32 %v5255_v4, %v8486_v50  ;;  %v5258_v32 = vsel %vm944_vm8, %v4724_v38, -inf }
 0x5d4   : > { %v4804_v34 = vmax.f32 %v4802_v53, %v4803_v61  ;;  %v4811_v10 = vmax.f32 %v4809_v8, %v4810_v57  ;;  %v5260_v13 = vmax.f32 %v5258_v32, %v5259_v51  ;;  %v5261_v5 = vsel %vm944_vm8, %v4731_v16, -inf }
 0x5d5   : > { %v8518_v35 = vpop.f32.mrb[44].mxu0  ;;  %v4738_v46 = vmax.f32 %v4736_v54, %v4737_v24  ;;  %v4799_v30 = vmax.f32 %v4797_v56, %v4798_v58  ;;  %v5263_v2 = vmax.f32 %v5261_v5, %v8495_v55  ;;  %v4818_v41 = vmax.f32 %v4816_v52, %v4817_v22 }
 0x5d6   : > { %v8521_v19 = vpop.f32.mrb[45].mxu0  ;;  %v4805_v33 = vrot.slane %v4804_v34, 2  ;;  %v4812_v9 = vrot.slane %v4811_v10, 2  ;;  %v5450_v57 = vsel %vm5415_vm5, %v5260_v13, %v5257_v17  ;;  %v3543_v50 = vmax.f32 %v3467_v60, 0.0 }
 0x5d7   : > { %v8524_v31 = vpop.f32.mrb[46].mxu0  ;;  %v5264_v4 = vsel %vm944_vm8, %v4738_v46, -inf  ;;  %v4800_v61 = vrot.slane %v4799_v30, 1  ;;  %v5451_v58 = vsel %vm5417_vm9, %v5263_v2, %v5450_v57  ;;  %v4819_v55 = vrot.slane %v4818_v41, 2 }
 0x5d8   : > { %v8528_v53 = vpop.f32.mrb[47].mxu0  ;;  %v5266_v51 = vmax.f32 %v5264_v4, %v5265_v47  ;;  %v4806_v8 = vmax.f32 %v4804_v34, %v4805_v33  ;;  %v4813_v62 = vmax.f32 %v4811_v10, %v4812_v9  ;;  %v3879_v56 = vcombine.high %v3543_v50, %v3543_v50 }
 0x5d9   : > { %v4801_v54 = vmax.f32 %v4799_v30, %v4800_v61  ;;  %v3886_v22 = vrot.slane %v3543_v50, %v8087_v0  ;;  %v3488_v17 = vadd.f32 %v8375_v44, %v8420_v39  ;;  %v4820_v60 = vmax.f32 %v4818_v41, %v4819_v55 }
 0x5da   : > { %v4807_v52 = vrot.slane %v4806_v8, 1  ;;  %v4814_v38 = vrot.slane %v4813_v62, 1  ;;  %v8533_v16 = vsel %vm5419_vm11, %v5266_v51, %v5451_v58  ;;  %v3893_v24 = vrot.slane %v3879_v56, %v8087_v0 }
 0x5db   : > { %v8538_v47 = vsel %vm944_vm8, %v4801_v54, -inf  ;;  %v3894_v10 = vcombine.high %v3886_v22, %v3886_v22  ;;  %v4739_v46 = vsel %vm4262_vm4, %v3886_v22, -inf  ;;  %v3548_v13 = vmax.f32 %v3488_v17, 0.0 }
 0x5dc   : > { %v4808_v32 = vmax.f32 %v4806_v8, %v4807_v52  ;;  %v4815_v34 = vmax.f32 %v4813_v62, %v4814_v38  ;;  %v4821_v5 = vrot.slane %v4820_v60, 1  ;;  %v3895_v30 = vcombine.high %v3893_v24, %v3893_v24 }
 0x5dd   : > { %v4740_v2 = vrot.slane %v4739_v46, 4  ;;  %v4746_v33 = vsel %vm4262_vm4, %v3894_v10, -inf  ;;  %v4753_v4 = vsel %vm4262_vm4, %v3893_v24, -inf  ;;  %v3964_v62 = vcombine.high %v3548_v13, %v3548_v13 }
 0x5de   : > { %v8544_v9 = vsel %vm944_vm8, %v4808_v32, -inf  ;;  %v8547_v39 = vsel %vm944_vm8, %v4815_v34, -inf  ;;  %v4747_v41 = vrot.slane %v4746_v33, 4  ;;  %v4822_v57 = vmax.f32 %v4820_v60, %v4821_v5 }
 0x5df   : > { %v4741_v61 = vmax.f32 %v4739_v46, %v4740_v2  ;;  %v4754_v50 = vrot.slane %v4753_v4, 4  ;;  %v4760_v51 = vsel %vm4262_vm4, %v3895_v30, -inf  ;;  %v3971_v54 = vrot.slane %v3548_v13, %v8087_v0 }
 0x5e0   : > { %v4748_v58 = vmax.f32 %v4746_v33, %v4747_v41  ;;  %v4761_v8 = vrot.slane %v4760_v51, 4  ;;  %v8553_v55 = vsel %vm944_vm8, %v4822_v57, -inf  ;;  %v3480_v52 = vadd.f32 %v8375_v44, %v8432_v43 }
 0x5e1   : > { %8981 = vst [vmem:[#allocation9_spill] sm:$0xff] %v8553_v55  ;;  %v4742_v56 = vrot.slane %v4741_v61, 2  ;;  %v4755_v22 = vmax.f32 %v4753_v4, %v4754_v50  ;;  %v3978_v60 = vrot.slane %v3964_v62, %v8087_v0  ;;  %v3979_v24 = vcombine.high %v3971_v54, %v3971_v54 }
 0x5e2   : > { %v4749_v38 = vrot.slane %v4748_v58, 2  ;;  %v4762_v17 = vmax.f32 %v4760_v51, %v4761_v8  ;;  %v4879_v34 = vsel %vm4262_vm4, %v3971_v54, -inf  ;;  %v3546_v46 = vmax.f32 %v3480_v52, 0.0 }
 0x5e3   : > { %v4743_v10 = vmax.f32 %v4741_v61, %v4742_v56  ;;  %v4756_v32 = vrot.slane %v4755_v22, 2  ;;  %v3980_v30 = vcombine.high %v3978_v60, %v3978_v60  ;;  %v4880_v2 = vrot.slane %v4879_v34, 4 }
 0x5e4   : > { %v4750_v5 = vmax.f32 %v4748_v58, %v4749_v38  ;;  %v4763_v13 = vrot.slane %v4762_v17, 2  ;;  %v4886_v4 = vsel %vm4262_vm4, %v3979_v24, -inf  ;;  %v4893_v43 = vsel %vm4262_vm4, %v3978_v60, -inf }
 0x5e5   : > { %v4744_v33 = vrot.slane %v4743_v10, 1  ;;  %v4757_v41 = vmax.f32 %v4755_v22, %v4756_v32  ;;  %v4881_v51 = vmax.f32 %v4879_v34, %v4880_v2  ;;  %v4887_v8 = vrot.slane %v4886_v4, 4 }
 0x5e6   : > { %v4751_v57 = vrot.slane %v4750_v5, 1  ;;  %v4764_v50 = vmax.f32 %v4762_v17, %v4763_v13  ;;  %v4894_v56 = vrot.slane %v4893_v43, 4  ;;  %v4900_v54 = vsel %vm4262_vm4, %v3980_v30, -inf }
 0x5e7   : > { %v4745_v62 = vmax.f32 %v4743_v10, %v4744_v33  ;;  %v4758_v61 = vrot.slane %v4757_v41, 1  ;;  %v4882_v38 = vrot.slane %v4881_v51, 2  ;;  %v4888_v23 = vmax.f32 %v4886_v4, %v4887_v8 }
 0x5e8   : > { %v4752_v52 = vmax.f32 %v4750_v5, %v4751_v57  ;;  %v4765_v58 = vrot.slane %v4764_v50, 1  ;;  %v4895_v32 = vmax.f32 %v4893_v43, %v4894_v56  ;;  %v4901_v24 = vrot.slane %v4900_v54, 4 }
 0x5e9   : > { %v4759_v28 = vmax.f32 %v4757_v41, %v4758_v61  ;;  %v5267_v22 = vsel %vm944_vm8, %v4745_v62, -inf  ;;  %v4883_v34 = vmax.f32 %v4881_v51, %v4882_v38  ;;  %v4889_v5 = vrot.slane %v4888_v23, 2 }
 0x5ea   : > { %v4766_v21 = vmax.f32 %v4764_v50, %v4765_v58  ;;  %v5269_v60 = vmax.f32 %v5267_v22, %v8538_v47  ;;  %v5270_v17 = vsel %vm944_vm8, %v4752_v52, -inf  ;;  %v4896_v30 = vrot.slane %v4895_v32, 2 }
 0x5eb   : > { %v5272_v10 = vmax.f32 %v5270_v17, %v8544_v9  ;;  %v8567_v13 = vsel %vm944_vm8, %v4759_v28, -inf  ;;  %v4884_v47 = vrot.slane %v4883_v34, 1  ;;  %v4890_v28 = vmax.f32 %v4888_v23, %v4889_v5 }
 0x5ec   : > { %v8572_v33 = vsel %vm944_vm8, %v4766_v21, -inf  ;;  %v5453_v41 = vsel %vm5421_vm13, %v5269_v60, %v8533_v16  ;;  %v4897_v43 = vmax.f32 %v4895_v32, %v4896_v30  ;;  %v4902_v50 = vmax.f32 %v4900_v54, %v4901_v24 }
 0x5ed   : > { %8982 = vst [vmem:[#allocation10_spill] sm:$0xff] %v8572_v33  ;;  %v8579_v9 = vsel %vm5423_vm15, %v5272_v10, %v5453_v41  ;;  %v4885_v57 = vmax.f32 %v4883_v34, %v4884_v47  ;;  %v3930_v51 = vcombine.high %v3546_v46, %v3546_v46  ;;  %v3937_v8 = vrot.slane %v3546_v46, %v8087_v0 }
 0x5ee   : > { %v4891_v62 = vrot.slane %v4890_v28, 1  ;;  %v4898_v21 = vrot.slane %v4897_v43, 1  ;;  %v3491_v61 = vadd.f32 %v8375_v44, %v8440_v7  ;;  %v3483_v16 = vadd.f32 %v8375_v44, %v8447_v18 }
 0x5ef   : > { %v4903_v56 = vrot.slane %v4902_v50, 2  ;;  %v8587_v52 = vsel %vm944_vm8, %v4885_v57, -inf  ;;  %v3944_v23 = vrot.slane %v3930_v51, %v8087_v0  ;;  %v3945_v58 = vcombine.high %v3937_v8, %v3937_v8 }
 0x5f0   : > { %v4892_v38 = vmax.f32 %v4890_v28, %v4891_v62  ;;  %v4899_v54 = vmax.f32 %v4897_v43, %v4898_v21  ;;  %v4823_v22 = vsel %vm4262_vm4, %v3937_v8, -inf  ;;  %v3549_v46 = vmax.f32 %v3491_v61, 0.0 }
 0x5f1   : > { %v4904_v32 = vmax.f32 %v4902_v50, %v4903_v56  ;;  %v3946_v24 = vcombine.high %v3944_v23, %v3944_v23  ;;  %v4824_v60 = vrot.slane %v4823_v22, 4  ;;  %v4830_v7 = vsel %vm4262_vm4, %v3945_v58, -inf }
 0x5f2   : > { %v8593_v17 = vsel %vm944_vm8, %v4892_v38, -inf  ;;  %v8596_v18 = vsel %vm944_vm8, %v4899_v54, -inf  ;;  %v4831_v34 = vrot.slane %v4830_v7, 4  ;;  %v4837_v10 = vsel %vm4262_vm4, %v3944_v23, -inf }
 0x5f3   : > { %v4905_v5 = vrot.slane %v4904_v32, 1  ;;  %v4825_v30 = vmax.f32 %v4823_v22, %v4824_v60  ;;  %v4838_v41 = vrot.slane %v4837_v10, 4  ;;  %v4844_v47 = vsel %vm4262_vm4, %v3946_v24, -inf }
 0x5f4   : > { %v4832_v28 = vmax.f32 %v4830_v7, %v4831_v34  ;;  %v4845_v43 = vrot.slane %v4844_v47, 4  ;;  %v3981_v57 = vcombine.high %v3549_v46, %v3549_v46  ;;  %v3988_v50 = vrot.slane %v3549_v46, %v8087_v0 }
 0x5f5   : > { %v4906_v51 = vmax.f32 %v4904_v32, %v4905_v5  ;;  %v4826_v8 = vrot.slane %v4825_v30, 2  ;;  %v4839_v62 = vmax.f32 %v4837_v10, %v4838_v41  ;;  %v3547_v21 = vmax.f32 %v3483_v16, 0.0 }
 0x5f6   : > { %v4833_v61 = vrot.slane %v4832_v28, 2  ;;  %v4846_v56 = vmax.f32 %v4844_v47, %v4845_v43  ;;  %v3995_v58 = vrot.slane %v3981_v57, %v8087_v0  ;;  %v3996_v38 = vcombine.high %v3988_v50, %v3988_v50 }
 0x5f7   : > { %v5289_v23 = vsel %vm944_vm8, %v4906_v51, -inf  ;;  %v4827_v54 = vmax.f32 %v4825_v30, %v4826_v8  ;;  %v4840_v22 = vrot.slane %v4839_v62, 2  ;;  %v4907_v24 = vsel %vm4262_vm4, %v3988_v50, -inf }
 0x5f8   : > { %v4834_v60 = vmax.f32 %v4832_v28, %v4833_v61  ;;  %v4847_v7 = vrot.slane %v4846_v56, 2  ;;  %v3997_v34 = vcombine.high %v3995_v58, %v3995_v58  ;;  %v4908_v4 = vrot.slane %v4907_v24, 4 }
 0x5f9   : > { %v4828_v46 = vrot.slane %v4827_v54, 1  ;;  %v4841_v32 = vmax.f32 %v4839_v62, %v4840_v22  ;;  %v4914_v10 = vsel %vm4262_vm4, %v3996_v38, -inf  ;;  %v4921_v16 = vsel %vm4262_vm4, %v3995_v58, -inf }
 0x5fa   : > { %v4835_v5 = vrot.slane %v4834_v60, 1  ;;  %v4848_v41 = vmax.f32 %v4846_v56, %v4847_v7  ;;  %v4909_v47 = vmax.f32 %v4907_v24, %v4908_v4  ;;  %v4915_v43 = vrot.slane %v4914_v10, 4 }
 0x5fb   : > { %v4829_v57 = vmax.f32 %v4827_v54, %v4828_v46  ;;  %v4842_v51 = vrot.slane %v4841_v32, 1  ;;  %v4922_v30 = vrot.slane %v4921_v16, 4  ;;  %v4928_v8 = vsel %vm4262_vm4, %v3997_v34, -inf }
 0x5fc   : > { %v4836_v50 = vmax.f32 %v4834_v60, %v4835_v5  ;;  %v4849_v28 = vrot.slane %v4848_v41, 1  ;;  %v4910_v61 = vrot.slane %v4909_v47, 2  ;;  %v4916_v2 = vmax.f32 %v4914_v10, %v4915_v43 }
 0x5fd   : > { %v4843_v55 = vmax.f32 %v4841_v32, %v4842_v51  ;;  %v5279_v62 = vsel %vm944_vm8, %v4829_v57, -inf  ;;  %v4923_v22 = vmax.f32 %v4921_v16, %v4922_v30  ;;  %v4929_v38 = vrot.slane %v4928_v8, 4 }
 0x5fe   : > { %v4850_v33 = vmax.f32 %v4848_v41, %v4849_v28  ;;  %v5281_v58 = vmax.f32 %v5279_v62, %v8587_v52  ;;  %v5282_v4 = vsel %vm944_vm8, %v4836_v50, -inf  ;;  %v4911_v56 = vmax.f32 %v4909_v47, %v4910_v61 }
 0x5ff   : > { %v5284_v54 = vmax.f32 %v5282_v4, %v8593_v17  ;;  %v5285_v24 = vsel %vm944_vm8, %v4843_v55, -inf  ;;  %v4917_v7 = vrot.slane %v4916_v2, 2  ;;  %v4924_v60 = vrot.slane %v4923_v22, 2 }
 0x600   : > { %v5287_v34 = vmax.f32 %v5285_v24, %v8596_v18  ;;  %v5288_v46 = vsel %vm944_vm8, %v4850_v33, -inf  ;;  %v4912_v32 = vrot.slane %v4911_v56, 1  ;;  %v4930_v10 = vmax.f32 %v4928_v8, %v4929_v38 }
 0x601   : > { %v5290_v16 = vmax.f32 %v5288_v46, %v5289_v23  ;;  %v5457_v5 = vsel %vm5415_vm5, %v5284_v54, %v5281_v58  ;;  %v4918_v41 = vmax.f32 %v4916_v2, %v4917_v7  ;;  %v4925_v52 = vmax.f32 %v4923_v22, %v4924_v60 }
 0x602   : > { %v5458_v43 = vsel %vm5417_vm9, %v5287_v34, %v5457_v5  ;;  %v4913_v47 = vmax.f32 %v4911_v56, %v4912_v32  ;;  %v4931_v57 = vrot.slane %v4930_v10, 2  ;;  %v3947_v17 = vcombine.high %v3547_v21, %v3547_v21 }
 0x603   : > { %v4919_v51 = vrot.slane %v4918_v41, 1  ;;  %v4926_v55 = vrot.slane %v4925_v52, 1  ;;  %v3954_v30 = vrot.slane %v3547_v21, %v8087_v0  ;;  %v8618_v18 = vsel %vm5419_vm11, %v5290_v16, %v5458_v43 }
 0x604   : > { %v4932_v33 = vmax.f32 %v4930_v10, %v4931_v57  ;;  %v8621_v8 = vsel %vm944_vm8, %v4913_v47, -inf  ;;  %v3961_v23 = vrot.slane %v3947_v17, %v8087_v0  ;;  %v3504_v2 = vadd.f32 %v8375_v44, %v8502_v45 }
 0x605   : > { %v4920_v50 = vmax.f32 %v4918_v41, %v4919_v51  ;;  %v4927_v28 = vmax.f32 %v4925_v52, %v4926_v55  ;;  %v3962_v61 = vcombine.high %v3954_v30, %v3954_v30  ;;  %v4851_v62 = vsel %vm4262_vm4, %v3954_v30, -inf }
 0x606   : > { %v4933_v22 = vrot.slane %v4932_v33, 1  ;;  %v3963_v38 = vcombine.high %v3961_v23, %v3961_v23  ;;  %v4852_v21 = vrot.slane %v4851_v62, 4  ;;  %v4865_v58 = vsel %vm4262_vm4, %v3961_v23, -inf }
 0x607   : > { %v8629_v4 = vsel %vm944_vm8, %v4920_v50, -inf  ;;  %v8632_v56 = vsel %vm944_vm8, %v4927_v28, -inf  ;;  %v4858_v54 = vsel %vm4262_vm4, %v3962_v61, -inf  ;;  %v4866_v24 = vrot.slane %v4865_v58, 4 }
 0x608   : > { %8983 = vst [vmem:[#allocation11_spill] sm:$0xff] %v8632_v56  ;;  %v4934_v45 = vmax.f32 %v4932_v33, %v4933_v22  ;;  %v4853_v7 = vmax.f32 %v4851_v62, %v4852_v21  ;;  %v4859_v60 = vrot.slane %v4858_v54, 4  ;;  %v4872_v34 = vsel %vm4262_vm4, %v3963_v38, -inf }
 0x609   : > { %v4867_v46 = vmax.f32 %v4865_v58, %v4866_v24  ;;  %v4873_v32 = vrot.slane %v4872_v34, 4  ;;  %v3552_v10 = vmax.f32 %v3504_v2, 0.0  ;;  %v3496_v16 = vadd.f32 %v8375_v44, %v8504_v40 }
 0x60a   : > { %v8639_v5 = vsel %vm944_vm8, %v4934_v45, -inf  ;;  %v4854_v41 = vrot.slane %v4853_v7, 2  ;;  %v4860_v52 = vmax.f32 %v4858_v54, %v4859_v60  ;;  %v3507_v43 = vadd.f32 %v8375_v44, %v8508_v6 }
 0x60b   : > { %8984 = vst [vmem:[#allocation12_spill] sm:$0xff] %v8639_v5  ;;  %v4868_v47 = vrot.slane %v4867_v46, 2  ;;  %v4874_v57 = vmax.f32 %v4872_v34, %v4873_v32  ;;  %v4032_v17 = vcombine.high %v3552_v10, %v3552_v10  ;;  %v4039_v51 = vrot.slane %v3552_v10, %v8087_v0 }
 0x60c   : > { %v4855_v55 = vmax.f32 %v4853_v7, %v4854_v41  ;;  %v4861_v30 = vrot.slane %v4860_v52, 2  ;;  %v3550_v33 = vmax.f32 %v3496_v16, 0.0  ;;  %v8644_v23 = vmax.f32 %v3507_v43, 0.0 }
 0x60d   : > { %v4869_v2 = vmax.f32 %v4867_v46, %v4868_v47  ;;  %v4875_v40 = vrot.slane %v4874_v57, 2  ;;  %v4046_v50 = vrot.slane %v4032_v17, %v8087_v0  ;;  %v4047_v28 = vcombine.high %v4039_v51, %v4039_v51 }
 0x60e   : > { %v4856_v61 = vrot.slane %v4855_v55, 1  ;;  %v4862_v62 = vmax.f32 %v4860_v52, %v4861_v30  ;;  %v4991_v22 = vsel %vm4262_vm4, %v4039_v51, -inf  ;;  %v3998_v44 = vcombine.high %v3550_v33, %v3550_v33 }
 0x60f   : > { %v4870_v6 = vrot.slane %v4869_v2, 1  ;;  %v4876_v38 = vmax.f32 %v4874_v57, %v4875_v40  ;;  %v4048_v21 = vcombine.high %v4046_v50, %v4046_v50  ;;  %v4992_v58 = vrot.slane %v4991_v22, 4 }
 0x610   : > { %v4857_v54 = vmax.f32 %v4855_v55, %v4856_v61  ;;  %v4863_v24 = vrot.slane %v4862_v62, 1  ;;  %v4998_v45 = vsel %vm4262_vm4, %v4047_v28, -inf  ;;  %v5005_v7 = vsel %vm4262_vm4, %v4046_v50, -inf }
 0x611   : > { %v4871_v60 = vmax.f32 %v4869_v2, %v4870_v6  ;;  %v4877_v34 = vrot.slane %v4876_v38, 1  ;;  %v4993_v46 = vmax.f32 %v4991_v22, %v4992_v58  ;;  %v4999_v32 = vrot.slane %v4998_v45, 4 }
 0x612   : > { %v4864_v10 = vmax.f32 %v4862_v62, %v4863_v24  ;;  %v5291_v16 = vsel %vm944_vm8, %v4857_v54, -inf  ;;  %v5006_v41 = vrot.slane %v5005_v7, 4  ;;  %v5012_v52 = vsel %vm4262_vm4, %v4048_v21, -inf }
 0x613   : > { %v4878_v43 = vmax.f32 %v4876_v38, %v4877_v34  ;;  %v5293_v47 = vmax.f32 %v5291_v16, %v8621_v8  ;;  %v8654_v57 = vsel %vm944_vm8, %v4871_v60, -inf  ;;  %v4994_v17 = vrot.slane %v4993_v46, 2 }
 0x614   : > { %v5294_v51 = vsel %vm944_vm8, %v4864_v10, -inf  ;;  %v5000_v30 = vmax.f32 %v4998_v45, %v4999_v32  ;;  %v5007_v2 = vmax.f32 %v5005_v7, %v5006_v41  ;;  %v5013_v6 = vrot.slane %v5012_v52, 4 }
 0x615   : > { %v5296_v40 = vmax.f32 %v5294_v51, %v8629_v4  ;;  %v8661_v50 = vsel %vm944_vm8, %v4878_v43, -inf  ;;  %v5460_v28 = vsel %vm5421_vm13, %v5293_v47, %v8618_v18  ;;  %v4995_v8 = vmax.f32 %v4993_v46, %v4994_v17 }
 0x616   : > { %8985 = vst [vmem:[#allocation13_spill] sm:$0xff] %v8661_v50  ;;  %v5001_v62 = vrot.slane %v5000_v30, 2  ;;  %v5008_v22 = vrot.slane %v5007_v2, 2  ;;  %v4005_v58 = vrot.slane %v3550_v33, %v8087_v0  ;;  %v4012_v4 = vrot.slane %v3998_v44, %v8087_v0 }
 0x617   : > { %v8668_v38 = vsel %vm5423_vm15, %v5296_v40, %v5460_v28  ;;  %v4996_v21 = vrot.slane %v4995_v8, 1  ;;  %v5014_v45 = vmax.f32 %v5012_v52, %v5013_v6  ;;  %v4049_v18 = vcombine.high %v8644_v23, %v8644_v23 }
 0x618   : > { %v5002_v54 = vmax.f32 %v5000_v30, %v5001_v62  ;;  %v5009_v24 = vmax.f32 %v5007_v2, %v5008_v22  ;;  %v4013_v60 = vcombine.high %v4005_v58, %v4005_v58  ;;  %v4014_v34 = vcombine.high %v4012_v4, %v4012_v4 }
 0x619   : > { %v4997_v7 = vmax.f32 %v4995_v8, %v4996_v21  ;;  %v4935_v46 = vsel %vm4262_vm4, %v4005_v58, -inf  ;;  %v5015_v16 = vrot.slane %v5014_v45, 2  ;;  %v4949_v44 = vsel %vm4262_vm4, %v4012_v4, -inf }
 0x61a   : > { %v5003_v32 = vrot.slane %v5002_v54, 1  ;;  %v5010_v10 = vrot.slane %v5009_v24, 1  ;;  %v4936_v41 = vrot.slane %v4935_v46, 4  ;;  %v4942_v33 = vsel %vm4262_vm4, %v4013_v60, -inf }
 0x61b   : > { %v8676_v43 = vsel %vm944_vm8, %v4997_v7, -inf  ;;  %v4956_v52 = vsel %vm4262_vm4, %v4014_v34, -inf  ;;  %v5016_v51 = vmax.f32 %v5014_v45, %v5015_v16  ;;  %v4943_v2 = vrot.slane %v4942_v33, 4 }
 0x61c   : > { %v5004_v47 = vmax.f32 %v5002_v54, %v5003_v32  ;;  %v5011_v17 = vmax.f32 %v5009_v24, %v5010_v10  ;;  %v4937_v30 = vmax.f32 %v4935_v46, %v4936_v41  ;;  %v4950_v40 = vrot.slane %v4949_v44, 4 }
 0x61d   : > { %v4957_v28 = vrot.slane %v4956_v52, 4  ;;  %v4056_v8 = vrot.slane %v8644_v23, %v8087_v0  ;;  %v5017_v62 = vrot.slane %v5016_v51, 1  ;;  %v4944_v58 = vmax.f32 %v4942_v33, %v4943_v2 }
 0x61e   : > { %v5307_v22 = vsel %vm944_vm8, %v5004_v47, -inf  ;;  %v5310_v6 = vsel %vm944_vm8, %v5011_v17, -inf  ;;  %v4938_v21 = vrot.slane %v4937_v30, 2  ;;  %v4951_v4 = vmax.f32 %v4949_v44, %v4950_v40 }
 0x61f   : > { %v4958_v7 = vmax.f32 %v4956_v52, %v4957_v28  ;;  %v4063_v54 = vrot.slane %v4049_v18, %v8087_v0  ;;  %v5018_v24 = vmax.f32 %v5016_v51, %v5017_v62  ;;  %v4064_v60 = vcombine.high %v4056_v8, %v4056_v8 }
 0x620   : > { %v4939_v45 = vmax.f32 %v4937_v30, %v4938_v21  ;;  %v5019_v34 = vsel %vm4262_vm4, %v4056_v8, -inf  ;;  %v4945_v46 = vrot.slane %v4944_v58, 2  ;;  %v4952_v32 = vrot.slane %v4951_v4, 2 }
 0x621   : > { %v4959_v10 = vrot.slane %v4958_v7, 2  ;;  %v4065_v23 = vcombine.high %v4063_v54, %v4063_v54  ;;  %v5313_v16 = vsel %vm944_vm8, %v5018_v24, -inf  ;;  %v5020_v47 = vrot.slane %v5019_v34, 4 }
 0x622   : > { %v4940_v41 = vrot.slane %v4939_v45, 1  ;;  %v5026_v17 = vsel %vm4262_vm4, %v4064_v60, -inf  ;;  %v4946_v33 = vmax.f32 %v4944_v58, %v4945_v46  ;;  %v4953_v44 = vmax.f32 %v4951_v4, %v4952_v32 }
 0x623   : > { %v4960_v52 = vmax.f32 %v4958_v7, %v4959_v10  ;;  %v5027_v2 = vrot.slane %v5026_v17, 4  ;;  %v5021_v51 = vmax.f32 %v5019_v34, %v5020_v47  ;;  %v5033_v30 = vsel %vm4262_vm4, %v4063_v54, -inf }
 0x624   : > { %v4941_v18 = vmax.f32 %v4939_v45, %v4940_v41  ;;  %v5040_v40 = vsel %vm4262_vm4, %v4065_v23, -inf  ;;  %v4947_v28 = vrot.slane %v4946_v33, 1  ;;  %v4954_v8 = vrot.slane %v4953_v44, 1  ;;  %v8699_v41 = vld [vmem:[%s8960_s6] ss:$0 sm:$0xff] }
 0x625   : > { %v4961_v62 = vrot.slane %v4960_v52, 1  ;;  %v5028_v21 = vmax.f32 %v5026_v17, %v5027_v2  ;;  %v5022_v61 = vrot.slane %v5021_v51, 2  ;;  %v5034_v55 = vrot.slane %v5033_v30, 4 }
 0x626   : > { %v5303_v24 = vsel %vm944_vm8, %v4941_v18, -inf  ;;  %v5041_v5 = vrot.slane %v5040_v40, 4  ;;  %v4948_v60 = vmax.f32 %v4946_v33, %v4947_v28  ;;  %v4955_v58 = vmax.f32 %v4953_v44, %v4954_v8 }
 0x627   : > { %v4962_v4 = vmax.f32 %v4960_v52, %v4961_v62  ;;  %v5305_v7 = vmax.f32 %v5303_v24, %v8676_v43  ;;  %v5023_v45 = vmax.f32 %v5021_v51, %v5022_v61  ;;  %v5029_v34 = vrot.slane %v5028_v21, 2 }
 0x628   : > { %v5035_v46 = vmax.f32 %v5033_v30, %v5034_v55  ;;  %v5042_v54 = vmax.f32 %v5040_v40, %v5041_v5  ;;  %v5306_v32 = vsel %vm944_vm8, %v4948_v60, -inf  ;;  %v5309_v10 = vsel %vm944_vm8, %v4955_v58, -inf }
 0x629   : > { %v5312_v23 = vsel %vm944_vm8, %v4962_v4, -inf  ;;  %v3499_v47 = vadd.f32 %v8699_v41, %v8510_v26  ;;  %v5308_v17 = vmax.f32 %v5306_v32, %v5307_v22  ;;  %v5311_v43 = vmax.f32 %v5309_v10, %v5310_v6 }
 0x62a   : > { %v5314_v61 = vmax.f32 %v5312_v23, %v5313_v16  ;;  %v5024_v33 = vrot.slane %v5023_v45, 1  ;;  %v5030_v55 = vmax.f32 %v5028_v21, %v5029_v34  ;;  %v5036_v5 = vrot.slane %v5035_v46, 2 }
 0x62b   : > { %v5043_v44 = vrot.slane %v5042_v54, 2  ;;  %v3551_v52 = vmax.f32 %v3499_v47, 0.0  ;;  %v5464_v2 = vsel %vm5415_vm5, %v5308_v17, %v5305_v7  ;;  %v3520_v51 = vadd.f32 %v8699_v41, %v8518_v35 }
 0x62c   : > { %v5025_v18 = vmax.f32 %v5023_v45, %v5024_v33  ;;  %v3512_v30 = vadd.f32 %v8699_v41, %v8521_v19  ;;  %v5465_v40 = vsel %vm5417_vm9, %v5311_v43, %v5464_v2  ;;  %v5031_v26 = vrot.slane %v5030_v55, 1 }
 0x62d   : > { %v5037_v22 = vmax.f32 %v5035_v46, %v5036_v5  ;;  %v5044_v6 = vmax.f32 %v5042_v54, %v5043_v44  ;;  %v4015_v28 = vcombine.high %v3551_v52, %v3551_v52  ;;  %v4022_v8 = vrot.slane %v3551_v52, %v8087_v0 }
 0x62e   : > { %v8710_v16 = vsel %vm944_vm8, %v5025_v18, -inf  ;;  %v8714_v62 = vsel %vm5419_vm11, %v5314_v61, %v5465_v40  ;;  %v5032_v21 = vmax.f32 %v5030_v55, %v5031_v26  ;;  %v3556_v60 = vmax.f32 %v3520_v51, 0.0 }
 0x62f   : > { %v5038_v24 = vrot.slane %v5037_v22, 1  ;;  %v5045_v35 = vrot.slane %v5044_v6, 1  ;;  %v4029_v19 = vrot.slane %v4015_v28, %v8087_v0  ;;  %v4030_v58 = vcombine.high %v4022_v8, %v4022_v8 }
 0x630   : > { %v4963_v4 = vsel %vm4262_vm4, %v4022_v8, -inf  ;;  %v8718_v7 = vmax.f32 %v3512_v30, 0.0  ;;  %v8721_v46 = vsel %vm944_vm8, %v5032_v21, -inf  ;;  %v4100_v47 = vcombine.high %v3556_v60, %v3556_v60 }
 0x631   : > { %v5039_v45 = vmax.f32 %v5037_v22, %v5038_v24  ;;  %v5046_v34 = vmax.f32 %v5044_v6, %v5045_v35  ;;  %v4964_v54 = vrot.slane %v4963_v4, 4  ;;  %v4031_v32 = vcombine.high %v4029_v19, %v4029_v19 }
 0x632   : > { %v4970_v10 = vsel %vm4262_vm4, %v4030_v58, -inf  ;;  %v4977_v23 = vsel %vm4262_vm4, %v4029_v19, -inf  ;;  %v4107_v44 = vrot.slane %v3556_v60, %v8087_v0  ;;  %v4114_v52 = vrot.slane %v4100_v47, %v8087_v0 }
 0x633   : > { %v8726_v17 = vsel %vm944_vm8, %v5039_v45, -inf  ;;  %v8729_v43 = vsel %vm944_vm8, %v5046_v34, -inf  ;;  %v4965_v61 = vmax.f32 %v4963_v4, %v4964_v54  ;;  %v4971_v33 = vrot.slane %v4970_v10, 4 }
 0x634   : > { %v4978_v55 = vrot.slane %v4977_v23, 4  ;;  %v4984_v5 = vsel %vm4262_vm4, %v4031_v32, -inf  ;;  %v4066_v30 = vcombine.high %v8718_v7, %v8718_v7  ;;  %v4115_v26 = vcombine.high %v4107_v44, %v4107_v44 }
 0x635   : > { %v4966_v2 = vrot.slane %v4965_v61, 2  ;;  %v4972_v18 = vmax.f32 %v4970_v10, %v4971_v33  ;;  %v4985_v51 = vrot.slane %v4984_v5, 4  ;;  %v4116_v22 = vcombine.high %v4114_v52, %v4114_v52 }
 0x636   : > { %v4979_v40 = vmax.f32 %v4977_v23, %v4978_v55  ;;  %v5103_v6 = vsel %vm4262_vm4, %v4107_v44, -inf  ;;  %v5110_v60 = vsel %vm4262_vm4, %v4115_v26, -inf  ;;  %v5117_v19 = vsel %vm4262_vm4, %v4114_v52, -inf }
 0x637   : > { %v4967_v28 = vmax.f32 %v4965_v61, %v4966_v2  ;;  %v4973_v8 = vrot.slane %v4972_v18, 2  ;;  %v4986_v21 = vmax.f32 %v4984_v5, %v4985_v51  ;;  %v5104_v24 = vrot.slane %v5103_v6, 4 }
 0x638   : > { %v4980_v35 = vrot.slane %v4979_v40, 2  ;;  %v5124_v58 = vsel %vm4262_vm4, %v4116_v22, -inf  ;;  %v5111_v10 = vrot.slane %v5110_v60, 4  ;;  %v5118_v23 = vrot.slane %v5117_v19, 4 }
 0x639   : > { %v4968_v4 = vrot.slane %v4967_v28, 1  ;;  %v4974_v45 = vmax.f32 %v4972_v18, %v4973_v8  ;;  %v4987_v34 = vrot.slane %v4986_v21, 2  ;;  %v5105_v54 = vmax.f32 %v5103_v6, %v5104_v24 }
 0x63a   : > { %v4981_v32 = vmax.f32 %v4979_v40, %v4980_v35  ;;  %v5125_v47 = vrot.slane %v5124_v58, 4  ;;  %v5112_v2 = vmax.f32 %v5110_v60, %v5111_v10  ;;  %v5119_v51 = vmax.f32 %v5117_v19, %v5118_v23 }
 0x63b   : > { %v4969_v33 = vmax.f32 %v4967_v28, %v4968_v4  ;;  %v4975_v61 = vrot.slane %v4974_v45, 1  ;;  %v4988_v55 = vmax.f32 %v4986_v21, %v4987_v34  ;;  %v5106_v5 = vrot.slane %v5105_v54, 2 }
 0x63c   : > { %v4982_v44 = vrot.slane %v4981_v32, 1  ;;  %v5126_v26 = vmax.f32 %v5124_v58, %v5125_v47  ;;  %v5113_v40 = vrot.slane %v5112_v2, 2  ;;  %v5120_v8 = vrot.slane %v5119_v51, 2 }
 0x63d   : > { %v4976_v50 = vmax.f32 %v4974_v45, %v4975_v61  ;;  %v4989_v52 = vrot.slane %v4988_v55, 1  ;;  %v5315_v22 = vsel %vm944_vm8, %v4969_v33, -inf  ;;  %v5107_v56 = vmax.f32 %v5105_v54, %v5106_v5 }
 0x63e   : > { %v4983_v18 = vmax.f32 %v4981_v32, %v4982_v44  ;;  %v5317_v6 = vmax.f32 %v5315_v22, %v8710_v16  ;;  %v5127_v21 = vrot.slane %v5126_v26, 2  ;;  %v5114_v58 = vmax.f32 %v5112_v2, %v5113_v40 }
 0x63f   : > { %v4990_v24 = vmax.f32 %v4988_v55, %v4989_v52  ;;  %v5318_v28 = vsel %vm944_vm8, %v4976_v50, -inf  ;;  %v5108_v35 = vrot.slane %v5107_v56, 1  ;;  %v5121_v54 = vmax.f32 %v5119_v51, %v5120_v8 }
 0x640   : > { %v5320_v4 = vmax.f32 %v5318_v28, %v8721_v46  ;;  %v8745_v60 = vsel %vm944_vm8, %v4983_v18, -inf  ;;  %v5467_v19 = vsel %vm5421_vm13, %v5317_v6, %v8714_v62  ;;  %v5115_v32 = vrot.slane %v5114_v58, 1 }
 0x641   : > { %v5323_v45 = vmax.f32 %v8745_v60, %v8726_v17  ;;  %v8752_v16 = vsel %vm944_vm8, %v4990_v24, -inf  ;;  %v5109_v34 = vmax.f32 %v5107_v56, %v5108_v35  ;;  %v5128_v10 = vmax.f32 %v5126_v26, %v5127_v21 }
 0x642   : > { %v5326_v50 = vmax.f32 %v8752_v16, %v8729_v43  ;;  %v8757_v46 = vsel %vm5423_vm15, %v5320_v4, %v5467_v19  ;;  %v5122_v23 = vrot.slane %v5121_v54, 1  ;;  %v4073_v47 = vrot.slane %v8718_v7, %v8087_v0 }
 0x643   : > { %v8760_v62 = vsel %vm944_vm8, %v5109_v34, -inf  ;;  %v4080_v33 = vrot.slane %v4066_v30, %v8087_v0  ;;  %v5116_v61 = vmax.f32 %v5114_v58, %v5115_v32  ;;  %v5129_v56 = vrot.slane %v5128_v10, 1 }
 0x644   : > { %v3523_v55 = vadd.f32 %v8699_v41, %v8524_v31  ;;  %v3515_v5 = vadd.f32 %v8699_v41, %v8528_v53  ;;  %v5123_v44 = vmax.f32 %v5121_v54, %v5122_v23  ;;  %v4081_v2 = vcombine.high %v4073_v47, %v4073_v47 }
 0x645   : > { %v4082_v51 = vcombine.high %v4080_v33, %v4080_v33  ;;  %v5047_v26 = vsel %vm4262_vm4, %v4073_v47, -inf  ;;  %v5130_v52 = vmax.f32 %v5128_v10, %v5129_v56  ;;  %v8771_v22 = vsel %vm944_vm8, %v5116_v61, -inf }
 0x646   : > { %v5048_v7 = vrot.slane %v5047_v26, 4  ;;  %v5061_v30 = vsel %vm4262_vm4, %v4080_v33, -inf  ;;  %v8775_v18 = vsel %vm944_vm8, %v5123_v44, -inf  ;;  %v5054_v31 = vsel %vm4262_vm4, %v4081_v2, -inf }
 0x647   : > { %v5062_v6 = vrot.slane %v5061_v30, 4  ;;  %v5068_v53 = vsel %vm4262_vm4, %v4082_v51, -inf  ;;  %v8780_v41 = vsel %vm944_vm8, %v5130_v52, -inf  ;;  %v5055_v8 = vrot.slane %v5054_v31, 4 }
 0x648   : > { %v5049_v40 = vmax.f32 %v5047_v26, %v5048_v7  ;;  %v5069_v24 = vrot.slane %v5068_v53, 4  ;;  %v3557_v35 = vmax.f32 %v3523_v55, 0.0  ;;  %v3555_v21 = vmax.f32 %v3515_v5, 0.0 }
 0x649   : > { %v5063_v28 = vmax.f32 %v5061_v30, %v5062_v6  ;;  %v5056_v19 = vmax.f32 %v5054_v31, %v5055_v8  ;;  %v8986_v34 = vmax.f32 %v8167_v20, %v8148_v59 }
 0x64a   : > { %v5050_v4 = vrot.slane %v5049_v40, 2  ;;  %v5070_v58 = vmax.f32 %v5068_v53, %v5069_v24  ;;  %v4117_v10 = vcombine.high %v3557_v35, %v3557_v35  ;;  %v4124_v23 = vrot.slane %v3557_v35, %v8087_v0 }
 0x64b   : > { %v8787_v54 = vsel %vm5425_vm6, %v8986_v34, %v8185_v29  ;;  %v5064_v32 = vrot.slane %v5063_v28, 2  ;;  %v4083_v47 = vcombine.high %v3555_v21, %v3555_v21  ;;  %v5057_v61 = vrot.slane %v5056_v19, 2 }
 0x64c   : > { %v5051_v33 = vmax.f32 %v5049_v40, %v5050_v4  ;;  %v5071_v56 = vrot.slane %v5070_v58, 2  ;;  %v4090_v55 = vrot.slane %v3555_v21, %v8087_v0  ;;  %v4131_v44 = vrot.slane %v4117_v10, %v8087_v0 }
 0x64d   : > { %v5065_v5 = vmax.f32 %v5063_v28, %v5064_v32  ;;  %v4132_v2 = vcombine.high %v4124_v23, %v4124_v23  ;;  %v5131_v51 = vsel %vm4262_vm4, %v4124_v23, -inf  ;;  %v5058_v20 = vmax.f32 %v5056_v19, %v5057_v61 }
 0x64e   : > { %v5052_v59 = vrot.slane %v5051_v33, 1  ;;  %v5072_v29 = vmax.f32 %v5070_v58, %v5071_v56  ;;  %v5132_v26 = vrot.slane %v5131_v51, 4  ;;  %v4133_v7 = vcombine.high %v4131_v44, %v4131_v44 }
 0x64f   : > { %v5066_v52 = vrot.slane %v5065_v5, 1  ;;  %v5138_v30 = vsel %vm4262_vm4, %v4132_v2, -inf  ;;  %v5145_v31 = vsel %vm4262_vm4, %v4131_v44, -inf  ;;  %v5059_v53 = vrot.slane %v5058_v20, 1 }
 0x650   : > { %v5053_v6 = vmax.f32 %v5051_v33, %v5052_v59  ;;  %v5073_v40 = vrot.slane %v5072_v29, 1  ;;  %v5133_v8 = vmax.f32 %v5131_v51, %v5132_v26  ;;  %v5139_v28 = vrot.slane %v5138_v30, 4 }
 0x651   : > { %v5067_v24 = vmax.f32 %v5065_v5, %v5066_v52  ;;  %v5146_v35 = vrot.slane %v5145_v31, 4  ;;  %v5152_v21 = vsel %vm4262_vm4, %v4133_v7, -inf  ;;  %v5060_v4 = vmax.f32 %v5058_v20, %v5059_v53 }
 0x652   : > { %v5074_v34 = vmax.f32 %v5072_v29, %v5073_v40  ;;  %v5327_v19 = vsel %vm944_vm8, %v5053_v6, -inf  ;;  %v5134_v58 = vrot.slane %v5133_v8, 2  ;;  %v5140_v23 = vmax.f32 %v5138_v30, %v5139_v28 }
 0x653   : > { %v5329_v32 = vmax.f32 %v5327_v19, %v8760_v62  ;;  %v5333_v10 = vsel %vm944_vm8, %v5067_v24, -inf  ;;  %v5147_v61 = vmax.f32 %v5145_v31, %v5146_v35  ;;  %v5330_v33 = vsel %vm944_vm8, %v5060_v4, -inf }
 0x654   : > { %v5335_v56 = vmax.f32 %v5333_v10, %v8775_v18  ;;  %v5336_v5 = vsel %vm944_vm8, %v5074_v34, -inf  ;;  %v5135_v44 = vmax.f32 %v5133_v8, %v5134_v58  ;;  %v5332_v2 = vmax.f32 %v5330_v33, %v8771_v22 }
 0x655   : > { %v5338_v51 = vmax.f32 %v5336_v5, %v8780_v41  ;;  %v5141_v59 = vrot.slane %v5140_v23, 2  ;;  %v5148_v20 = vrot.slane %v5147_v61, 2  ;;  %v5153_v26 = vrot.slane %v5152_v21, 4 }
 0x656   : > { %v5136_v29 = vrot.slane %v5135_v44, 1  ;;  %v4097_v62 = vrot.slane %v4083_v47, %v8087_v0  ;;  %v4098_v52 = vcombine.high %v4090_v55, %v4090_v55  ;;  %v5471_v7 = vsel %vm5415_vm5, %v5332_v2, %v5329_v32 }
 0x657   : > { %v5142_v30 = vmax.f32 %v5140_v23, %v5141_v59  ;;  %v5149_v31 = vmax.f32 %v5147_v61, %v5148_v20  ;;  %v5075_v18 = vsel %vm4262_vm4, %v4090_v55, -inf  ;;  %v5472_v6 = vsel %vm5417_vm9, %v5335_v56, %v5471_v7 }
 0x658   : > { %v5137_v53 = vmax.f32 %v5135_v44, %v5136_v29  ;;  %v5154_v40 = vmax.f32 %v5152_v21, %v5153_v26  ;;  %v4099_v22 = vcombine.high %v4097_v62, %v4097_v62  ;;  %v5076_v24 = vrot.slane %v5075_v18, 4 }
 0x659   : > { %v5143_v8 = vrot.slane %v5142_v30, 1  ;;  %v5150_v41 = vrot.slane %v5149_v31, 1  ;;  %v5082_v28 = vsel %vm4262_vm4, %v4098_v52, -inf  ;;  %v5089_v34 = vsel %vm4262_vm4, %v4097_v62, -inf }
 0x65a   : > { %v5155_v35 = vrot.slane %v5154_v40, 2  ;;  %v5340_v47 = vsel %vm944_vm8, %v5137_v53, -inf  ;;  %v5083_v4 = vrot.slane %v5082_v28, 4  ;;  %v5077_v32 = vmax.f32 %v5075_v18, %v5076_v24 }
 0x65b   : > { %v5144_v19 = vmax.f32 %v5142_v30, %v5143_v8  ;;  %v5151_v58 = vmax.f32 %v5149_v31, %v5150_v41  ;;  %v5090_v55 = vrot.slane %v5089_v34, 4  ;;  %v5096_v21 = vsel %vm4262_vm4, %v4099_v22, -inf }
 0x65c   : > { %v5156_v10 = vmax.f32 %v5154_v40, %v5155_v35  ;;  %v5084_v23 = vmax.f32 %v5082_v28, %v5083_v4  ;;  %v5473_v61 = vsel %vm5419_vm11, %v5338_v51, %v5472_v6  ;;  %v5078_v5 = vrot.slane %v5077_v32, 2 }
 0x65d   : > { %v5343_v33 = vsel %vm944_vm8, %v5144_v19, -inf  ;;  %v5346_v56 = vsel %vm944_vm8, %v5151_v58, -inf  ;;  %v5091_v44 = vmax.f32 %v5089_v34, %v5090_v55  ;;  %v5097_v20 = vrot.slane %v5096_v21, 4  ;;  %v8998_v34 = vld [vmem:[#allocation10_spill] sm:$0xff]  ;;  %v8999_v19 = vld [vmem:[#allocation9_spill] sm:$0xff] }
 0x65e   : > { %v5157_v2 = vrot.slane %v5156_v10, 1  ;;  %v5085_v59 = vrot.slane %v5084_v23, 2  ;;  %v5079_v29 = vmax.f32 %v5077_v32, %v5078_v5  ;;  %v8987_v62 = vmax.f32 %v8174_v63, %v8155_v37  ;;  %v9001_v32 = vld [vmem:[#allocation11_spill] sm:$0xff]  ;;  %v9003_v5 = vld [vmem:[#allocation13_spill] sm:$0xff] }
 0x65f   : > { %v5092_v26 = vrot.slane %v5091_v44, 2  ;;  %v8988_v51 = vmax.f32 %v8260_v48, %v8238_v3  ;;  %v5098_v18 = vmax.f32 %v5096_v21, %v5097_v20  ;;  %v8989_v6 = vmax.f32 %v8263_v14, %v8241_v49  ;;  %v8992_v14 = vld [vmem:[#allocation6_spill] sm:$0xff] }
 0x660   : > { %v5428_v52 = vsel %vm5427_vm7, %v8987_v62, %v8787_v54  ;;  %v5158_v30 = vmax.f32 %v5156_v10, %v5157_v2  ;;  %v5086_v31 = vmax.f32 %v5084_v23, %v5085_v59  ;;  %v5080_v40 = vrot.slane %v5079_v29, 1 }
 0x661   : > { %v5434_v7 = vsel %vm5425_vm6, %v8988_v51, %v8266_v36  ;;  %v5093_v22 = vmax.f32 %v5091_v44, %v5092_v26  ;;  %v8990_v37 = vmax.f32 %v8359_v11, %v8331_v12  ;;  %v8991_v3 = vmax.f32 %v8468_v27, %v8435_v25  ;;  %v8994_v12 = vld [vmem:[#allocation8_spill] sm:$0xff]  ;;  %v8995_v11 = vld [vmem:[#allocation7_spill] sm:$0xff] }
 0x662   : > { %v5435_v53 = vsel %vm5427_vm7, %v8989_v6, %v5434_v7  ;;  %v5349_v36 = vsel %vm944_vm8, %v5158_v30, -inf  ;;  %v5087_v54 = vrot.slane %v5086_v31, 1  ;;  %v5099_v49 = vrot.slane %v5098_v18, 2 }
 0x663   : > { %v5441_v63 = vsel %vm5425_vm6, %v8990_v37, %v8370_v42  ;;  %v5448_v48 = vsel %vm5425_vm6, %v8991_v3, %v8482_v15  ;;  %v8993_v8 = vmax.f32 %v8367_v1, %v8992_v14  ;;  %v5081_v24 = vmax.f32 %v5079_v29, %v5080_v40  ;;  %v9006_v14 = vld [vmem:[#allocation5_spill] sm:$0xff] }
 0x664   : > { %v5094_v28 = vrot.slane %v5093_v22, 1  ;;  %v8996_v42 = vmax.f32 %v8994_v12, %v8995_v11  ;;  %v8997_v25 = vmax.f32 %v8567_v13, %v8547_v39  ;;  %v5088_v15 = vmax.f32 %v5086_v31, %v5087_v54  ;;  %v9004_v39 = vld [vmem:[#allocation12_spill] sm:$0xff] }
 0x665   : > { %v5442_v41 = vsel %vm5427_vm7, %v8993_v8, %v5441_v63  ;;  %v5100_v4 = vmax.f32 %v5098_v18, %v5099_v49  ;;  %v9000_v1 = vmax.f32 %v8998_v34, %v8999_v19  ;;  %v9002_v55 = vmax.f32 %v8654_v57, %v9001_v32 }
 0x666   : > { %v5449_v35 = vsel %vm5427_vm7, %v8996_v42, %v5448_v48  ;;  %v5455_v27 = vsel %vm5425_vm6, %v8997_v25, %v8579_v9  ;;  %v5095_v23 = vmax.f32 %v5093_v22, %v5094_v28  ;;  %v5339_v21 = vsel %vm944_vm8, %v5081_v24, -inf }
 0x667   : > { %v5456_v58 = vsel %vm5427_vm7, %v9000_v1, %v5455_v27  ;;  %v5462_v10 = vsel %vm5425_vm6, %v9002_v55, %v8668_v38  ;;  %v9005_v13 = vmax.f32 %v9003_v5, %v9004_v39  ;;  %v5469_v44 = vsel %vm5425_vm6, %v5323_v45, %v8757_v46 }
 0x668   : > { %v5101_v2 = vrot.slane %v5100_v4, 1  ;;  %v5341_v59 = vmax.f32 %v5339_v21, %v5340_v47  ;;  %v5342_v57 = vsel %vm944_vm8, %v5088_v15, -inf  ;;  %v5470_v38 = vsel %vm5427_vm7, %v5326_v50, %v5469_v44 }
 0x669   : > { %v5463_v9 = vsel %vm5427_vm7, %v9005_v13, %v5462_v10  ;;  %v5344_v20 = vmax.f32 %v5342_v57, %v5343_v33  ;;  %v5345_v29 = vsel %vm944_vm8, %v5095_v23, -inf  ;;  %v5486_v26 = vcombine.low %v5428_v52, %v5442_v41 }
 0x66a   : > { %v5502_v62 = vcombine.low %v5435_v53, %v5449_v35  ;;  %v5102_v51 = vmax.f32 %v5100_v4, %v5101_v2  ;;  %v5347_v7 = vmax.f32 %v5345_v29, %v5346_v56  ;;  %v5474_v17 = vsel %vm5421_vm13, %v5341_v59, %v5473_v61 }
 0x66b   : > { %v5518_v60 = vcombine.low %v5456_v58, %v5470_v38  ;;  %v5475_v45 = vsel %vm5423_vm15, %v5344_v20, %v5474_v17  ;;  %v5494_v46 = vrot.slane %v5486_v26, %v8087_v0  ;;  %v6180_v50 = vmov 1934713408  }
 0x66c   : > { %v5510_v47 = vrot.slane %v5502_v62, %v8087_v0  ;;  %v5348_v43 = vsel %vm944_vm8, %v5102_v51, -inf  ;;  %v5476_v16 = vsel %vm5425_vm6, %v5347_v7, %v5475_v45  ;;  %v5553_v33 = vunpack.c.l.s4 %v6180_v50 }
 0x66d   : > { %v5350_v30 = vmax.f32 %v5348_v43, %v5349_v36  ;;  %v5487_v6 = vcombine.high %v5428_v52, %v5442_v41  ;;  %v5503_v40 = vcombine.high %v5435_v53, %v5449_v35  ;;  %v5519_v61 = vcombine.high %v5456_v58, %v5470_v38 }
 0x66e   : > { %v5551_v31 = vcombine.high %v5494_v46, %v5510_v47  ;;  %v5550_v18 = vcombine.low %v5494_v46, %v5510_v47  ;;  %v5554_v56 = vunpack.c.0.s8 %v5553_v33  ;;  %v5526_v54 = vrot.slane %v5518_v60, %v8087_v0 }
 0x66f   : > { %v5477_v22 = vsel %vm5427_vm7, %v5350_v30, %v5476_v16  ;;  %v5501_v63 = vrot.slane %v5487_v6, %v8087_v0  ;;  %v5517_v3 = vrot.slane %v5503_v40, %v8087_v0  ;;  %v5533_v52 = vrot.slane %v5519_v61, %v8087_v0 }
 0x670   : > { %v5534_v37 = vcombine.low %v5463_v9, %v5477_v22  ;;  %v5535_v48 = vcombine.high %v5463_v9, %v5477_v22  ;;  %v5557_v36 = vsub.s32 %v5554_v56, %v9006_v14 }
 0x671   : > { %v5566_v8 = vcombine.low %v5501_v63, %v5517_v3  ;;  %v5567_v41 = vcombine.high %v5501_v63, %v5517_v3 }
 0x672   : > { %v5542_v49 = vrot.slane %v5534_v37, %v8087_v0  ;;  %v5549_v53 = vrot.slane %v5535_v48, %v8087_v0  ;;  %v5565_v42 = vrot.slane %v5551_v31, %v5557_v36  ;;  %v5558_v25 = vrot.slane %v5550_v18, %v5557_v36 }
 0x673   : > { %v5574_v15 = vrot.slane %v5566_v8, %v5557_v36  ;;  %v5581_v34 = vrot.slane %v5567_v41, %v5557_v36 }
 0x674   : > { %v5583_v24 = vcombine.high %v5526_v54, %v5542_v49  ;;  %v5582_v28 = vcombine.low %v5526_v54, %v5542_v49  ;;  %v5598_v12 = vcombine.low %v5533_v52, %v5549_v53  ;;  %v5599_v11 = vcombine.high %v5533_v52, %v5549_v53 }
 0x676   : > { %v5597_v35 = vrot.slane %v5583_v24, %v5557_v36  ;;  %v5590_v27 = vrot.slane %v5582_v28, %v5557_v36  ;;  %v5606_v4 = vrot.slane %v5598_v12, %v5557_v36  ;;  %v5613_v19 = vrot.slane %v5599_v11, %v5557_v36 }
 0x678   : > { %v5616_v1 = vcombine.low %v5565_v42, %v5597_v35  ;;  %v5615_v58 = vcombine.high %v5558_v25, %v5590_v27  ;;  %v5617_v32 = vcombine.high %v5565_v42, %v5597_v35  ;;  %v5614_v55 = vcombine.low %v5558_v25, %v5590_v27 }
 0x679   : > { %v5618_v10 = vcombine.low %v5574_v15, %v5606_v4  ;;  %v5620_v0 = vcombine.low %v5581_v34, %v5613_v19  ;;  %v5619_v23 = vcombine.high %v5574_v15, %v5606_v4  ;;  %v5621_v21 = vcombine.high %v5581_v34, %v5613_v19 }
 0x67a   : > { %5627 = vrot.lane.b32.xlu1 %v5616_v1, %s6169_s20  ;;  %5623 = vrot.lane.b32.xlu0 %v5615_v58, %s6168_s14  ;;  %s5820_s14 = sshll.u32 %s6243_s28, 7  ;;  %s271_s20 = scalar_lea.vmem [#allocation2], %s5735_s29 }
 0x67b   : > { %s5659_s28 = scalar_lea.sflag [#allocation3], %s269_s18 }
 0x67e   : > { %5635 = vrot.lane.b32.xlu1 %v5618_v10, %s6174_s22  ;;  %5631 = vrot.lane.b32.xlu0 %v5617_v32, %s6172_s17  ;;  %s5672_s17 = sshll.u32 %s271_s20, 4  ;;  %s8912_s17 = int_to_ptr.vmem [resolvable:$true] %s5672_s17 }
 0x67f   : > { %p6109_p0 = scmp.lt.s32.totalorder %s8912_s17, %s6107_s19 }
 0x682   : > { %5643 = vrot.lane.b32.xlu1 %v5620_v0, %s6176_s23  ;;  %5639 = vrot.lane.b32.xlu0 %v5619_v23, %s6178_s8  ;;  %s8910_s23 = scalar_lea.hbm %s8961_s7, %s5820_s14  ;;  %s6102_s8 = scalar_lea.vmem %s8912_s17, 128 }
 0x683   : > { %p6103_p11 = scmp.ne.s32.totalorder %s8912_s17, %s6102_s8  ;;  %p6110_p1 = scmp.lt.s32.totalorder %s6108_s9, %s6102_s8 }
 0x685   : > { %p6104_p12 = pnand %p6103_p11, %p6260_p5  ;;  %p6111_p2 = por %p6110_p1, %p6109_p0 }
 0x686   : > { %5647 = vrot.lane.b32.xlu0 %v5621_v21, %s6175_s21 }
 0x687   : > { %p6105_p13 = pneg %p6104_p12 }
 0x689   : > { %p6112_p3 = pnand %p6111_p2, %p6105_p13 }
 0x6ec   : > { %v5628_v5 = vpop.permute.xlu1 %5627  ;;  %v5624_v39 = vpop.permute.xlu0 %5623 }
 0x6ed   : > { %v5650_v13 = vsel %vm944_vm8, %v5614_v55, %v5624_v39 }
 0x6ee   : > { %v5651_v2 = vsel %vm1010_vm10, %v5650_v13, %v5628_v5 }
 0x6f0   : > { %v5636_v9 = vpop.permute.xlu1 %5635  ;;  %v5632_v44 = vpop.permute.xlu0 %5631 }
 0x6f1   : > { %v5652_v59 = vsel %vm1076_vm12, %v5651_v2, %v5632_v44 }
 0x6f2   : > { %v5653_v38 = vsel %vm1142_vm14, %v5652_v59, %v5636_v9 }
 0x6f4   : > { %v5640_v57 = vpop.permute.xlu0 %5639  ;;  %v5644_v20 = vpop.permute.xlu1 %5643 }
 0x6f5   : > { %v5654_v29 = vsel %vm2100_vm0, %v5653_v38, %v5640_v57 }
 0x6f6   : > { %v5655_v62 = vsel %vm2133_vm1, %v5654_v29, %v5644_v20 }
 0x6f8   : > { %v5648_v26 = vpop.permute.xlu0 %5647 }
 0x6f9   : > { %v5656_v51 = vsel %vm2166_vm2, %v5655_v62, %v5648_v26 }
 0x6fa   : > { %5657 = vst.msk [vmem:[%s271_s20] sm:$0xff] %vm2199_vm3, %v5656_v51 }
 0x6fb   : > { %6115 = shalt.err (!%p6112_p3)
}
 0x6fc   : > { %s6116_s15 = scalar_lea.hbm %s8910_s23, 128  ;;  %s6120_s29 = scalar_lea.hbm %s8961_s7, 256 }
 0x6fd   : > { %p6117_p4 = scmp.ne.s32.totalorder %s8910_s23, %s6116_s15  ;;  %p6121_p9 = scmp.lt.u32.totalorder %s8910_s23, %s8961_s7 }
 0x6fe   : > { %p6122_p10 = scmp.lt.u32.totalorder %s6120_s29, %s6116_s15  ;;  %p6124_p12 = scmp.lt.u32.totalorder %s6116_s15, %s8910_s23 }
 0x6ff   : > { %p6118_p7 = pnand %p6117_p4, %p6260_p5 }
 0x700   : > { %p6123_p11 = por %p6122_p10, %p6121_p9 }
 0x701   : > { %p6119_p8 = pneg %p6118_p7 }
 0x702   : > { %p6125_p13 = por %p6124_p12, %p6123_p11 }
 0x704   : > { %p6126_p0 = pnand %p6125_p13, %p6119_p8 }
 0x706   : > { %6129 = shalt.err (!%p6126_p0)
}
 0x707   : > { %6017 = dma.vmem_to_hbm [thread:$0]  (%p6260_p5), %s8912_s17, 128, %s8910_s23, %s5659_s28  }
 0x708 PF: > { %p6023_p1 = scmp.ge.s32.totalorder %s6164_s27, 2  ;;  %s5684_s22 = sand.u32 1, %s6152_s24  }
 0x709   : > { %s5685_s21 = scalar_lea.sflag [#allocation3], %s5684_s22 }
 0x70a   : > { %p6020_p2 = pnand %p6023_p1, %p6264_p6 }
 0x70c   : > { %6147 = dma.done.wait (!%p6020_p2), %s5685_s21, 128  }
 0x70d   : > { %6149 = vsyncadd (!%p6020_p2), %s5685_s21, 4294967168  ;;  %p17_p3 = scmp.ge.s32.totalorder %s6247_s30, 4   ;;  %s9007_s24 = smov %s6156_s25 }
 0x70e   : > { %s9008_s25 = smov %s6160_s26  ;;  %s9009_s26 = smov %s6258_s10 }
 0x70f   : > { %s9010_s27 = smov %s6247_s30  ;;  %19 = sbr.rel (!%p17_p3) target bundleno = 3 (0x3), region = 83 }
 0x716   :  { %5690 = vsyncpa [#allocation3], 1 }
 0x717   :  { %5692 = vsyncpa [#allocation3 + $0x1], 1 }

</bundles_post_ra>
